<compile_context>
chip_gen: v7x
topology: tpu7x:2x2x1
jax: 0.10.0
libtpu: 0.0.40
codegen_flags: <defaults>
</compile_context>

<pallas_src>
import functools

import jax
import jax.numpy as jnp
from jax import lax
from jax.experimental import pallas as pl
from jax.experimental.pallas import tpu as pltpu


# ----------------------------------------------------------------------------
# Pallas kernel
# ----------------------------------------------------------------------------
def _mixer_kernel(x_ref, wqkv_ref, wc_ref, wmaps_ref, pk_ref, out_ref,
                  kv_scr, sum_scr, *, H, W, HW, Bb):
    C = x_ref.shape[0]
    L = x_ref.shape[1]            # Bb * HW lanes
    inv_hw = 1.0 / HW

    # Hoist the small parameter table once (review: no per-use strided slices).
    pk = pk_ref[...]              # (2C, 3): col0 spatial shift, col1 pw, col2 dwc|proj bias

    def dw3x3(t, wrow0):
        # Depthwise 3x3, padding=1 (PyTorch cross-correlation), on (nc, L) with
        # spatial (and image) dims flattened onto lanes.  Neighbor taps are
        # in-register lane rotations (XLU); border/cross-image validity and the
        # per-channel tap weight (and folded BN scale) are pre-multiplied into
        # wmaps host-side, so each tap costs 1 VPU mul + 1 VPU add.
        nc = t.shape[0]
        acc = t * wmaps_ref[4, wrow0:wrow0 + nc, :]                  # centre tap
        for idx in range(9):
            if idx == 4:
                continue
            di, dj = idx // 3 - 1, idx % 3 - 1
            s = di * W + dj                                          # flat neighbor offset
            shifted = pltpu.roll(t, (-s) % L, 1)                     # shifted[:, l] = t[:, l + s]
            acc = acc + shifted * wmaps_ref[idx, wrow0:wrow0 + nc, :]
        return acc

    def per_image_mean(t):
        # Pool-first channel gate: per-image mean over lanes, computed in f32.
        cols = [jnp.sum(t[:, i * HW:(i + 1) * HW], axis=1, keepdims=True) * inv_hw
                for i in range(Bb)]
        return cols[0] if Bb == 1 else jnp.concatenate(cols, axis=1)  # (C, Bb)

    def per_image_scale(t, gate):
        if Bb == 1:
            return t * gate
        return jnp.concatenate(
            [t[:, i * HW:(i + 1) * HW] * gate[:, i:i + 1] for i in range(Bb)], axis=1)

    def qk_path(t, r0):
        # SpatialOperation: dw3x3 (BN scale folded into wmaps) + shift, ReLU,
        # 1x1 conv (dim -> 1, no bias), sigmoid gate.
        u = jnp.maximum(dw3x3(t, r0) + pk[r0:r0 + C, 0:1], 0.0)
        attn = jnp.sum(u * pk[r0:r0 + C, 1:2], axis=0, keepdims=True)   # (1, L)
        t = t * jax.nn.sigmoid(attn)
        # ChannelOperation (pool-first): f32 per-image mean, bf16 matvec gate.
        pooled = per_image_mean(t)                                       # (C, Bb) f32
        gate = jax.nn.sigmoid(
            jnp.dot(wc_ref[r0 // C], pooled.astype(jnp.bfloat16),
                    preferred_element_type=jnp.float32))                 # (C, Bb)
        return per_image_scale(t, gate)

    # ---- qkv 1x1 conv: one fused bf16 MXU matmul, f32 accumulation ----
    x = x_ref[...].astype(jnp.bfloat16)                                  # (C, L)
    qkv = jnp.dot(wqkv_ref[...], x, preferred_element_type=jnp.float32)  # (3C, L)

    # Park k and v in VMEM scratch to cut vreg pressure across the long q path.
    kv_scr[...] = qkv[C:, :]                                             # rows 0:C=k, C:2C=v

    # q and k paths run sequentially (half the peak live set of the fused 2C path).
    sum_scr[...] = qk_path(qkv[:C, :], 0)                                # gated q -> VMEM
    k_g = qk_path(kv_scr[:C, :], C)                                      # gated k
    qk_sum = sum_scr[...] + k_g

    # ---- proj(dwc(q + k) * v) ----
    y = dw3x3(qk_sum, 2 * C) + pk[:C, 2:3]                               # dwc + bias
    fused = y * kv_scr[C:, :]                                            # * v (from VMEM)
    out = dw3x3(fused, 3 * C) + pk[C:, 2:3]                              # proj + bias
    out_ref[...] = out.astype(out_ref.dtype)


# ----------------------------------------------------------------------------
# Wrapper
# ----------------------------------------------------------------------------
def _pick_images_per_step(B, max_bb=2):
    """Batch images onto lanes to amortize per-step overhead, but keep >= 2
    grid steps (v7x megacore) when the batch allows it.  max_bb kept small so
    the dw3x3 tap loop stays within the 64-vreg budget."""
    if B <= 1:
        return 1
    bb = max(1, min(max_bb, B // 2))
    while B % bb:
        bb -= 1
    return bb


def additive_token_mixer(x_nchw, kparams, images_per_step=1):
    wqkv, wc, wmaps, pk = kparams
    B, C, H, W = x_nchw.shape
    HW = H * W
    Bb = images_per_step
    assert B % Bb == 0, "batch must be divisible by images_per_step"
    L = Bb * HW
    assert L % 128 == 0, "lane block (images_per_step * H * W) must be a multiple of 128"
    assert wmaps.shape == (9, 4 * C, L), "wmaps packed for a different images_per_step"
    G = B // Bb

    # NCHW -> (C, B*HW): channels on sublanes, batch*spatial flattened on lanes.
    x = x_nchw.reshape(B, C, HW).transpose(1, 0, 2).reshape(C, B * HW)

    kernel = functools.partial(_mixer_kernel, H=H, W=W, HW=HW, Bb=Bb)
    out = pl.pallas_call(
        kernel,
        out_shape=jax.ShapeDtypeStruct((C, B * HW), jnp.float32),
        grid_spec=pltpu.PrefetchScalarGridSpec(
            num_scalar_prefetch=0,
            grid=(G,),
            in_specs=[
                pl.BlockSpec((C, L), lambda g: (0, g)),
                # Grid-invariant parameters (constant index_map -> fetched once).
                pl.BlockSpec(wqkv.shape, lambda g: (0, 0)),
                pl.BlockSpec(wc.shape, lambda g: (0, 0, 0)),
                pl.BlockSpec(wmaps.shape, lambda g: (0, 0, 0)),
                pl.BlockSpec(pk.shape, lambda g: (0, 0)),
            ],
            out_specs=pl.BlockSpec((C, L), lambda g: (0, g)),
            scratch_shapes=[
                pltpu.VMEM((2 * C, L), jnp.float32),   # parked [k ; v]
                pltpu.VMEM((C, L), jnp.float32),        # parked gated-q accumulator
            ],
        ),
        compiler_params=pltpu.CompilerParams(dimension_semantics=("parallel",)),
    )(x, wqkv, wc, wmaps, pk)
    return out.reshape(C, B, HW).transpose(1, 0, 2).reshape(B, C, H, W)


# ----------------------------------------------------------------------------
# Deterministic parameter init (PyTorch-shaped) and conversion to kernel layout
# ----------------------------------------------------------------------------
def init_params(key, dim):
    ks = jax.random.split(key, 24)
    n = lambda k, shape, s=0.1: s * jax.random.normal(k, shape, dtype=jnp.float32)
    p = {}
    p['qkv_w'] = n(ks[0], (3 * dim, dim, 1, 1))
    # SpatialOperation / ChannelOperation for q
    p['sq_dw_w'] = n(ks[1], (dim, 1, 3, 3)); p['sq_dw_b'] = n(ks[2], (dim,), 0.05)
    p['sq_bn_g'] = 1.0 + n(ks[3], (dim,));   p['sq_bn_b'] = n(ks[4], (dim,))
    p['sq_bn_rm'] = n(ks[5], (dim,))
    p['sq_bn_rv'] = jax.random.uniform(ks[6], (dim,), jnp.float32, 0.5, 1.5)
    p['sq_pw_w'] = n(ks[7], (1, dim, 1, 1))
    p['cq_w'] = n(ks[8], (dim, dim, 1, 1))
    # SpatialOperation / ChannelOperation for k
    p['sk_dw_w'] = n(ks[9], (dim, 1, 3, 3)); p['sk_dw_b'] = n(ks[10], (dim,), 0.05)
    p['sk_bn_g'] = 1.0 + n(ks[11], (dim,));  p['sk_bn_b'] = n(ks[12], (dim,))
    p['sk_bn_rm'] = n(ks[13], (dim,))
    p['sk_bn_rv'] = jax.random.uniform(ks[14], (dim,), jnp.float32, 0.5, 1.5)
    p['sk_pw_w'] = n(ks[15], (1, dim, 1, 1))
    p['ck_w'] = n(ks[16], (dim, dim, 1, 1))
    # dwc + proj (depthwise 3x3, bias=True)
    p['dwc_w'] = n(ks[17], (dim, 1, 3, 3));  p['dwc_b'] = n(ks[18], (dim,), 0.05)
    p['proj_w'] = n(ks[19], (dim, 1, 3, 3)); p['proj_b'] = n(ks[20], (dim,), 0.05)
    return p


def pack_params(p, dim, H, W, images_per_step=1, eps=1e-5):
    C = dim
    HW = H * W
    Bb = images_per_step
    L = Bb * HW
    f32 = jnp.float32

    # fused qkv 1x1 conv weight (bf16 for the MXU)
    wqkv = p['qkv_w'][:, :, 0, 0].astype(jnp.bfloat16)                 # (3C, C)

    # per-path channel-gate weights (pool-first -> tiny matvec)
    wc = jnp.stack([p['cq_w'][:, :, 0, 0], p['ck_w'][:, :, 0, 0]], 0).astype(jnp.bfloat16)  # (2,C,C)

    # 9 border-validity masks over the flattened H*W lane axis, tiled per image
    hh = jnp.arange(H)[:, None]
    ww = jnp.arange(W)[None, :]
    mrows = []
    for di in (-1, 0, 1):
        for dj in (-1, 0, 1):
            m = ((hh + di >= 0) & (hh + di < H) & (ww + dj >= 0) & (ww + dj < W))
            mrows.append(m.astype(f32).reshape(HW))
    masks = jnp.stack(mrows, axis=0)                                   # (9, HW)
    masks_t = jnp.tile(masks, (1, Bb))                                 # (9, L)

    def taps(w):                                                       # (C,1,3,3) -> (C,9)
        return w.reshape(C, 9).astype(f32)

    def bn_fold(g, b, rm, rv):
        s = g / jnp.sqrt(rv + eps)
        return s, b - rm * s

    sq_s, sq_t = bn_fold(p['sq_bn_g'], p['sq_bn_b'], p['sq_bn_rm'], p['sq_bn_rv'])
    sk_s, sk_t = bn_fold(p['sk_bn_g'], p['sk_bn_b'], p['sk_bn_rm'], p['sk_bn_rv'])

    # Per-tap weight maps: wmap[tap, c, l] = mask[tap, l] * tap_weight[c, tap]
    # (with the eval-mode BN scale folded in for the spatial paths).
    def wmap(tapw, scale=None):
        tw = taps(tapw)                                                # (C, 9)
        if scale is not None:
            tw = tw * scale[:, None]
        return tw.T[:, :, None] * masks_t[:, None, :]                  # (9, C, L)

    wmaps = jnp.concatenate([wmap(p['sq_dw_w'], sq_s),                 # rows 0:C   spatial-q
                             wmap(p['sk_dw_w'], sk_s),                 # rows C:2C  spatial-k
                             wmap(p['dwc_w']),                         # rows 2C:3C dwc
                             wmap(p['proj_w'])], axis=1).astype(f32)   # rows 3C:4C proj

    # Small per-channel parameter table (2C, 3):
    #   col0: spatial shift = dw_bias * bn_scale + bn_shift   (q | k)
    #   col1: pw (dim -> 1) weight                            (q | k)
    #   col2: dwc bias (rows 0:C) | proj bias (rows C:2C)
    cat = lambda a, b: jnp.concatenate([a, b], axis=0)[:, None]
    pk = jnp.concatenate([
        cat(p['sq_dw_b'] * sq_s + sq_t, p['sk_dw_b'] * sk_s + sk_t),
        cat(p['sq_pw_w'][0, :, 0, 0], p['sk_pw_w'][0, :, 0, 0]),
        cat(p['dwc_b'], p['proj_b']),
    ], axis=1).astype(f32)                                             # (2C, 3)

    return wqkv, wc, wmaps, pk


# ----------------------------------------------------------------------------
# Pure-JAX (NCHW) reference mirroring the PyTorch module.  The 1x1 "conv"
# matmuls use bf16 operands with f32 accumulation to match the kernel's MXU
# precision choice; everything else stays f32.
# ----------------------------------------------------------------------------
def ref_forward(x, p, eps=1e-5):
    HI = jax.lax.Precision.HIGHEST

    def conv1x1_bf16(t, w):  # w: (Cout, Cin, 1, 1)
        B, Ci, H, W = t.shape
        o = jnp.einsum('oi,bil->bol',
                       w[:, :, 0, 0].astype(jnp.bfloat16),
                       t.reshape(B, Ci, H * W).astype(jnp.bfloat16),
                       preferred_element_type=jnp.float32)
        return o.reshape(B, -1, H, W)

    def conv1x1_f32(t, w):
        return jnp.einsum('oi,bihw->bohw', w[:, :, 0, 0], t, precision=HI)

    def dwconv(t, w, b):  # w: (C, 1, 3, 3)
        C = t.shape[1]
        y = lax.conv_general_dilated(t, w, (1, 1), ((1, 1), (1, 1)),
                                     feature_group_count=C,
                                     dimension_numbers=('NCHW', 'OIHW', 'NCHW'),
                                     precision=HI)
        return y + b[None, :, None, None]

    def bn(t, g, b, rm, rv):
        return (t - rm[None, :, None, None]) / jnp.sqrt(rv + eps)[None, :, None, None] \
               * g[None, :, None, None] + b[None, :, None, None]

    def spatial(t, w, b, g, bb, rm, rv, pw):
        u = jnp.maximum(bn(dwconv(t, w, b), g, bb, rm, rv), 0.0)
        return t * jax.nn.sigmoid(conv1x1_f32(u, pw))

    def channel(t, w):
        pooled = jnp.mean(t, axis=(2, 3), keepdims=True)
        return t * jax.nn.sigmoid(conv1x1_bf16(pooled, w))

    qkv = conv1x1_bf16(x, p['qkv_w'])
    q, k, v = jnp.split(qkv, 3, axis=1)
    q = channel(spatial(q, p['sq_dw_w'], p['sq_dw_b'], p['sq_bn_g'], p['sq_bn_b'],
                        p['sq_bn_rm'], p['sq_bn_rv'], p['sq_pw_w']), p['cq_w'])
    k = channel(spatial(k, p['sk_dw_w'], p['sk_dw_b'], p['sk_bn_g'], p['sk_bn_b'],
                        p['sk_bn_rm'], p['sk_bn_rv'], p['sk_pw_w']), p['ck_w'])
    return dwconv(dwconv(q + k, p['dwc_w'], p['dwc_b']) * v, p['proj_w'], p['proj_b'])


# ----------------------------------------------------------------------------
if __name__ == "__main__":
    B, D, H, W = 2, 32, 16, 16
    key = jax.random.PRNGKey(0)
    k_param, k_x = jax.random.split(key)

    Bb = _pick_images_per_step(B)               # B=2 -> 1 image/step, grid=(2,)
    params = init_params(k_param, D)
    kparams = pack_params(params, D, H, W, images_per_step=Bb)
    x = jax.random.normal(k_x, (B, D, H, W), dtype=jnp.float32)

    out = jax.block_until_ready(additive_token_mixer(x, kparams, images_per_step=Bb))
    ref = jax.block_until_ready(ref_forward(x, params))

    assert out.shape == (B, D, H, W), out.shape
    err = float(jnp.max(jnp.abs(out - ref)))
    assert jnp.allclose(out, ref, atol=2e-3, rtol=2e-3), f"max abs err {err}"
    print("KERNEL_OK")
</pallas_src>

<mosaic_0001>
module attributes {stable_mosaic.version = 11 : i64} {
  func.func @_mixer_kernel(%arg0: i32, %arg1: memref<32x256xf32, #tpu.memory_space<vmem>>, %arg2: memref<96x32xbf16, #tpu.memory_space<vmem>>, %arg3: memref<2x32x32xbf16, #tpu.memory_space<vmem>>, %arg4: memref<9x128x256xf32, #tpu.memory_space<vmem>>, %arg5: memref<64x3xf32, #tpu.memory_space<vmem>>, %arg6: memref<32x256xf32, #tpu.memory_space<vmem>>, %arg7: memref<64x256xf32, #tpu.memory_space<vmem>>, %arg8: memref<32x256xf32, #tpu.memory_space<vmem>>) attributes {dimension_semantics = [#tpu.dimension_semantics<parallel>], iteration_bounds = array<i64: 2>, scalar_prefetch = 0 : i64, scratch_operands = 2 : i64, tpu.core_type = #tpu.core_type<tc>, window_params = [{transform_indices = @transform_0, window_bounds = array<i64: 32, 256>}, {pipeline_mode = #tpu.pipeline_mode<synchronous>, transform_indices = @transform_1, window_bounds = array<i64: 96, 32>}, {pipeline_mode = #tpu.pipeline_mode<synchronous>, transform_indices = @transform_2, window_bounds = array<i64: 2, 32, 32>}, {pipeline_mode = #tpu.pipeline_mode<synchronous>, transform_indices = @transform_3, window_bounds = array<i64: 9, 128, 256>}, {pipeline_mode = #tpu.pipeline_mode<synchronous>, transform_indices = @transform_4, window_bounds = array<i64: 64, 3>}, {transform_indices = @transform_5, window_bounds = array<i64: 32, 256>}]} {
    %c0 = arith.constant 0 : index
    %c0_0 = arith.constant 0 : index
    %0 = vector.load %arg5[%c0, %c0_0] : memref<64x3xf32, #tpu.memory_space<vmem>>, vector<64x3xf32>
    %c0_1 = arith.constant 0 : index
    %c0_2 = arith.constant 0 : index
    %1 = vector.load %arg1[%c0_1, %c0_2] : memref<32x256xf32, #tpu.memory_space<vmem>>, vector<32x256xf32>
    %2 = arith.truncf %1 : vector<32x256xf32> to vector<32x256xbf16>
    %c0_3 = arith.constant 0 : index
    %c0_4 = arith.constant 0 : index
    %3 = vector.load %arg2[%c0_3, %c0_4] : memref<96x32xbf16, #tpu.memory_space<vmem>>, vector<96x32xbf16>
    %cst = arith.constant dense<0.000000e+00> : vector<96x256xf32>
    %4 = tpu.matmul %3, %2, %cst {dimension_numbers = #tpu.dot_dimension_numbers<[1], [0], [0], [1], [0, 0, 1, 1], [], []>} : vector<96x32xbf16>, vector<32x256xbf16>, vector<96x256xf32> -> vector<96x256xf32>
    %5 = vector.extract_strided_slice %4 {offsets = [32, 0], sizes = [64, 256], strides = [1, 1]} : vector<96x256xf32> to vector<64x256xf32>
    %c0_5 = arith.constant 0 : index
    %c0_6 = arith.constant 0 : index
    %6 = vector.load %arg7[%c0_5, %c0_6] : memref<64x256xf32, #tpu.memory_space<vmem>>, vector<64x256xf32>
    tpu.vector_store %arg7[%c0_5, %c0_6], %5 {strides = array<i32>} : memref<64x256xf32, #tpu.memory_space<vmem>>, vector<64x256xf32>,
    %7 = vector.extract_strided_slice %4 {offsets = [0, 0], sizes = [32, 256], strides = [1, 1]} : vector<96x256xf32> to vector<32x256xf32>
    %c4 = arith.constant 4 : index
    %c0_7 = arith.constant 0 : index
    %c0_8 = arith.constant 0 : index
    %8 = vector.load %arg4[%c4, %c0_7, %c0_8] : memref<9x128x256xf32, #tpu.memory_space<vmem>>, vector<1x32x256xf32>
    %9 = vector.shape_cast %8 : vector<1x32x256xf32> to vector<32x256xf32>
    %10 = arith.mulf %7, %9 : vector<32x256xf32>
    %c17_i32 = arith.constant 17 : i32
    %11 = tpu.dynamic_rotate %7 by %c17_i32 dim 1 : vector<32x256xf32>, i32 -> vector<32x256xf32>
    %c0_9 = arith.constant 0 : index
    %c0_10 = arith.constant 0 : index
    %c0_11 = arith.constant 0 : index
    %12 = vector.load %arg4[%c0_9, %c0_10, %c0_11] : memref<9x128x256xf32, #tpu.memory_space<vmem>>, vector<1x32x256xf32>
    %13 = vector.shape_cast %12 : vector<1x32x256xf32> to vector<32x256xf32>
    %14 = arith.mulf %11, %13 : vector<32x256xf32>
    %15 = arith.addf %10, %14 : vector<32x256xf32>
    %c16_i32 = arith.constant 16 : i32
    %16 = tpu.dynamic_rotate %7 by %c16_i32 dim 1 : vector<32x256xf32>, i32 -> vector<32x256xf32>
    %c1 = arith.constant 1 : index
    %c0_12 = arith.constant 0 : index
    %c0_13 = arith.constant 0 : index
    %17 = vector.load %arg4[%c1, %c0_12, %c0_13] : memref<9x128x256xf32, #tpu.memory_space<vmem>>, vector<1x32x256xf32>
    %18 = vector.shape_cast %17 : vector<1x32x256xf32> to vector<32x256xf32>
    %19 = arith.mulf %16, %18 : vector<32x256xf32>
    %20 = arith.addf %15, %19 : vector<32x256xf32>
    %c15_i32 = arith.constant 15 : i32
    %21 = tpu.dynamic_rotate %7 by %c15_i32 dim 1 : vector<32x256xf32>, i32 -> vector<32x256xf32>
    %c2 = arith.constant 2 : index
    %c0_14 = arith.constant 0 : index
    %c0_15 = arith.constant 0 : index
    %22 = vector.load %arg4[%c2, %c0_14, %c0_15] : memref<9x128x256xf32, #tpu.memory_space<vmem>>, vector<1x32x256xf32>
    %23 = vector.shape_cast %22 : vector<1x32x256xf32> to vector<32x256xf32>
    %24 = arith.mulf %21, %23 : vector<32x256xf32>
    %25 = arith.addf %20, %24 : vector<32x256xf32>
    %c1_i32 = arith.constant 1 : i32
    %26 = tpu.dynamic_rotate %7 by %c1_i32 dim 1 : vector<32x256xf32>, i32 -> vector<32x256xf32>
    %c3 = arith.constant 3 : index
    %c0_16 = arith.constant 0 : index
    %c0_17 = arith.constant 0 : index
    %27 = vector.load %arg4[%c3, %c0_16, %c0_17] : memref<9x128x256xf32, #tpu.memory_space<vmem>>, vector<1x32x256xf32>
    %28 = vector.shape_cast %27 : vector<1x32x256xf32> to vector<32x256xf32>
    %29 = arith.mulf %26, %28 : vector<32x256xf32>
    %30 = arith.addf %25, %29 : vector<32x256xf32>
    %c255_i32 = arith.constant 255 : i32
    %31 = tpu.dynamic_rotate %7 by %c255_i32 dim 1 : vector<32x256xf32>, i32 -> vector<32x256xf32>
    %c5 = arith.constant 5 : index
    %c0_18 = arith.constant 0 : index
    %c0_19 = arith.constant 0 : index
    %32 = vector.load %arg4[%c5, %c0_18, %c0_19] : memref<9x128x256xf32, #tpu.memory_space<vmem>>, vector<1x32x256xf32>
    %33 = vector.shape_cast %32 : vector<1x32x256xf32> to vector<32x256xf32>
    %34 = arith.mulf %31, %33 : vector<32x256xf32>
    %35 = arith.addf %30, %34 : vector<32x256xf32>
    %c241_i32 = arith.constant 241 : i32
    %36 = tpu.dynamic_rotate %7 by %c241_i32 dim 1 : vector<32x256xf32>, i32 -> vector<32x256xf32>
    %c6 = arith.constant 6 : index
    %c0_20 = arith.constant 0 : index
    %c0_21 = arith.constant 0 : index
    %37 = vector.load %arg4[%c6, %c0_20, %c0_21] : memref<9x128x256xf32, #tpu.memory_space<vmem>>, vector<1x32x256xf32>
    %38 = vector.shape_cast %37 : vector<1x32x256xf32> to vector<32x256xf32>
    %39 = arith.mulf %36, %38 : vector<32x256xf32>
    %40 = arith.addf %35, %39 : vector<32x256xf32>
    %c240_i32 = arith.constant 240 : i32
    %41 = tpu.dynamic_rotate %7 by %c240_i32 dim 1 : vector<32x256xf32>, i32 -> vector<32x256xf32>
    %c7 = arith.constant 7 : index
    %c0_22 = arith.constant 0 : index
    %c0_23 = arith.constant 0 : index
    %42 = vector.load %arg4[%c7, %c0_22, %c0_23] : memref<9x128x256xf32, #tpu.memory_space<vmem>>, vector<1x32x256xf32>
    %43 = vector.shape_cast %42 : vector<1x32x256xf32> to vector<32x256xf32>
    %44 = arith.mulf %41, %43 : vector<32x256xf32>
    %45 = arith.addf %40, %44 : vector<32x256xf32>
    %c239_i32 = arith.constant 239 : i32
    %46 = tpu.dynamic_rotate %7 by %c239_i32 dim 1 : vector<32x256xf32>, i32 -> vector<32x256xf32>
    %c8 = arith.constant 8 : index
    %c0_24 = arith.constant 0 : index
    %c0_25 = arith.constant 0 : index
    %47 = vector.load %arg4[%c8, %c0_24, %c0_25] : memref<9x128x256xf32, #tpu.memory_space<vmem>>, vector<1x32x256xf32>
    %48 = vector.shape_cast %47 : vector<1x32x256xf32> to vector<32x256xf32>
    %49 = arith.mulf %46, %48 : vector<32x256xf32>
    %50 = arith.addf %45, %49 : vector<32x256xf32>
    %51 = vector.extract_strided_slice %0 {offsets = [0, 0], sizes = [32, 1], strides = [1, 1]} : vector<64x3xf32> to vector<32x1xf32>
    %52 = vector.broadcast %51 : vector<32x1xf32> to vector<32x256xf32>
    %53 = arith.addf %50, %52 : vector<32x256xf32>
    %cst_26 = arith.constant 0.000000e+00 : f32
    %54 = vector.broadcast %cst_26 : f32 to vector<32x256xf32>
    %55 = arith.maximumf %53, %54 : vector<32x256xf32>
    %56 = vector.extract_strided_slice %0 {offsets = [0, 1], sizes = [32, 1], strides = [1, 1]} : vector<64x3xf32> to vector<32x1xf32>
    %57 = vector.broadcast %56 : vector<32x1xf32> to vector<32x256xf32>
    %58 = arith.mulf %55, %57 : vector<32x256xf32>
    %cst_27 = arith.constant dense<0.000000e+00> : vector<256xf32>
    %59 = vector.multi_reduction <add>, %58, %cst_27 [0] : vector<32x256xf32> to vector<256xf32>
    %60 = vector.shape_cast %59 : vector<256xf32> to vector<1x256xf32>
    %61 = arith.negf %60 : vector<1x256xf32>
    %62 = math.exp %61 : vector<1x256xf32>
    %cst_28 = arith.constant 1.000000e+00 : f32
    %63 = vector.broadcast %cst_28 : f32 to vector<1x256xf32>
    %64 = arith.addf %63, %62 : vector<1x256xf32>
    %65 = arith.divf %63, %64 : vector<1x256xf32>
    %66 = vector.broadcast %65 : vector<1x256xf32> to vector<32x256xf32>
    %67 = arith.mulf %7, %66 : vector<32x256xf32>
    %cst_29 = arith.constant dense<0.000000e+00> : vector<32xf32>
    %68 = vector.multi_reduction <add>, %67, %cst_29 [1] : vector<32x256xf32> to vector<32xf32>
    %69 = vector.shape_cast %68 : vector<32xf32> to vector<32x1xf32>
    %cst_30 = arith.constant 3.906250e-03 : f32
    %70 = vector.broadcast %cst_30 : f32 to vector<32x1xf32>
    %71 = arith.mulf %69, %70 : vector<32x1xf32>
    %c0_31 = arith.constant 0 : index
    %c0_32 = arith.constant 0 : index
    %c0_33 = arith.constant 0 : index
    %72 = vector.load %arg3[%c0_31, %c0_32, %c0_33] : memref<2x32x32xbf16, #tpu.memory_space<vmem>>, vector<1x32x32xbf16>
    %73 = vector.shape_cast %72 : vector<1x32x32xbf16> to vector<32x32xbf16>
    %74 = arith.truncf %71 : vector<32x1xf32> to vector<32x1xbf16>
    %cst_34 = arith.constant dense<0.000000e+00> : vector<32x1xf32>
    %75 = tpu.matmul %73, %74, %cst_34 {dimension_numbers = #tpu.dot_dimension_numbers<[1], [0], [0], [1], [0, 0, 1, 1], [], []>} : vector<32x32xbf16>, vector<32x1xbf16>, vector<32x1xf32> -> vector<32x1xf32>
    %76 = arith.negf %75 : vector<32x1xf32>
    %77 = math.exp %76 : vector<32x1xf32>
    %cst_35 = arith.constant 1.000000e+00 : f32
    %78 = vector.broadcast %cst_35 : f32 to vector<32x1xf32>
    %79 = arith.addf %78, %77 : vector<32x1xf32>
    %80 = arith.divf %78, %79 : vector<32x1xf32>
    %81 = vector.broadcast %80 : vector<32x1xf32> to vector<32x256xf32>
    %82 = arith.mulf %67, %81 : vector<32x256xf32>
    %c0_36 = arith.constant 0 : index
    %c0_37 = arith.constant 0 : index
    %83 = vector.load %arg8[%c0_36, %c0_37] : memref<32x256xf32, #tpu.memory_space<vmem>>, vector<32x256xf32>
    tpu.vector_store %arg8[%c0_36, %c0_37], %82 {strides = array<i32>} : memref<32x256xf32, #tpu.memory_space<vmem>>, vector<32x256xf32>,
    %c0_38 = arith.constant 0 : index
    %c0_39 = arith.constant 0 : index
    %84 = vector.load %arg7[%c0_38, %c0_39] : memref<64x256xf32, #tpu.memory_space<vmem>>, vector<32x256xf32>
    %c4_40 = arith.constant 4 : index
    %c32 = arith.constant 32 : index
    %c0_41 = arith.constant 0 : index
    %85 = vector.load %arg4[%c4_40, %c32, %c0_41] : memref<9x128x256xf32, #tpu.memory_space<vmem>>, vector<1x32x256xf32>
    %86 = vector.shape_cast %85 : vector<1x32x256xf32> to vector<32x256xf32>
    %87 = arith.mulf %84, %86 : vector<32x256xf32>
    %c17_i32_42 = arith.constant 17 : i32
    %88 = tpu.dynamic_rotate %84 by %c17_i32_42 dim 1 : vector<32x256xf32>, i32 -> vector<32x256xf32>
    %c0_43 = arith.constant 0 : index
    %c32_44 = arith.constant 32 : index
    %c0_45 = arith.constant 0 : index
    %89 = vector.load %arg4[%c0_43, %c32_44, %c0_45] : memref<9x128x256xf32, #tpu.memory_space<vmem>>, vector<1x32x256xf32>
    %90 = vector.shape_cast %89 : vector<1x32x256xf32> to vector<32x256xf32>
    %91 = arith.mulf %88, %90 : vector<32x256xf32>
    %92 = arith.addf %87, %91 : vector<32x256xf32>
    %c16_i32_46 = arith.constant 16 : i32
    %93 = tpu.dynamic_rotate %84 by %c16_i32_46 dim 1 : vector<32x256xf32>, i32 -> vector<32x256xf32>
    %c1_47 = arith.constant 1 : index
    %c32_48 = arith.constant 32 : index
    %c0_49 = arith.constant 0 : index
    %94 = vector.load %arg4[%c1_47, %c32_48, %c0_49] : memref<9x128x256xf32, #tpu.memory_space<vmem>>, vector<1x32x256xf32>
    %95 = vector.shape_cast %94 : vector<1x32x256xf32> to vector<32x256xf32>
    %96 = arith.mulf %93, %95 : vector<32x256xf32>
    %97 = arith.addf %92, %96 : vector<32x256xf32>
    %c15_i32_50 = arith.constant 15 : i32
    %98 = tpu.dynamic_rotate %84 by %c15_i32_50 dim 1 : vector<32x256xf32>, i32 -> vector<32x256xf32>
    %c2_51 = arith.constant 2 : index
    %c32_52 = arith.constant 32 : index
    %c0_53 = arith.constant 0 : index
    %99 = vector.load %arg4[%c2_51, %c32_52, %c0_53] : memref<9x128x256xf32, #tpu.memory_space<vmem>>, vector<1x32x256xf32>
    %100 = vector.shape_cast %99 : vector<1x32x256xf32> to vector<32x256xf32>
    %101 = arith.mulf %98, %100 : vector<32x256xf32>
    %102 = arith.addf %97, %101 : vector<32x256xf32>
    %c1_i32_54 = arith.constant 1 : i32
    %103 = tpu.dynamic_rotate %84 by %c1_i32_54 dim 1 : vector<32x256xf32>, i32 -> vector<32x256xf32>
    %c3_55 = arith.constant 3 : index
    %c32_56 = arith.constant 32 : index
    %c0_57 = arith.constant 0 : index
    %104 = vector.load %arg4[%c3_55, %c32_56, %c0_57] : memref<9x128x256xf32, #tpu.memory_space<vmem>>, vector<1x32x256xf32>
    %105 = vector.shape_cast %104 : vector<1x32x256xf32> to vector<32x256xf32>
    %106 = arith.mulf %103, %105 : vector<32x256xf32>
    %107 = arith.addf %102, %106 : vector<32x256xf32>
    %c255_i32_58 = arith.constant 255 : i32
    %108 = tpu.dynamic_rotate %84 by %c255_i32_58 dim 1 : vector<32x256xf32>, i32 -> vector<32x256xf32>
    %c5_59 = arith.constant 5 : index
    %c32_60 = arith.constant 32 : index
    %c0_61 = arith.constant 0 : index
    %109 = vector.load %arg4[%c5_59, %c32_60, %c0_61] : memref<9x128x256xf32, #tpu.memory_space<vmem>>, vector<1x32x256xf32>
    %110 = vector.shape_cast %109 : vector<1x32x256xf32> to vector<32x256xf32>
    %111 = arith.mulf %108, %110 : vector<32x256xf32>
    %112 = arith.addf %107, %111 : vector<32x256xf32>
    %c241_i32_62 = arith.constant 241 : i32
    %113 = tpu.dynamic_rotate %84 by %c241_i32_62 dim 1 : vector<32x256xf32>, i32 -> vector<32x256xf32>
    %c6_63 = arith.constant 6 : index
    %c32_64 = arith.constant 32 : index
    %c0_65 = arith.constant 0 : index
    %114 = vector.load %arg4[%c6_63, %c32_64, %c0_65] : memref<9x128x256xf32, #tpu.memory_space<vmem>>, vector<1x32x256xf32>
    %115 = vector.shape_cast %114 : vector<1x32x256xf32> to vector<32x256xf32>
    %116 = arith.mulf %113, %115 : vector<32x256xf32>
    %117 = arith.addf %112, %116 : vector<32x256xf32>
    %c240_i32_66 = arith.constant 240 : i32
    %118 = tpu.dynamic_rotate %84 by %c240_i32_66 dim 1 : vector<32x256xf32>, i32 -> vector<32x256xf32>
    %c7_67 = arith.constant 7 : index
    %c32_68 = arith.constant 32 : index
    %c0_69 = arith.constant 0 : index
    %119 = vector.load %arg4[%c7_67, %c32_68, %c0_69] : memref<9x128x256xf32, #tpu.memory_space<vmem>>, vector<1x32x256xf32>
    %120 = vector.shape_cast %119 : vector<1x32x256xf32> to vector<32x256xf32>
    %121 = arith.mulf %118, %120 : vector<32x256xf32>
    %122 = arith.addf %117, %121 : vector<32x256xf32>
    %c239_i32_70 = arith.constant 239 : i32
    %123 = tpu.dynamic_rotate %84 by %c239_i32_70 dim 1 : vector<32x256xf32>, i32 -> vector<32x256xf32>
    %c8_71 = arith.constant 8 : index
    %c32_72 = arith.constant 32 : index
    %c0_73 = arith.constant 0 : index
    %124 = vector.load %arg4[%c8_71, %c32_72, %c0_73] : memref<9x128x256xf32, #tpu.memory_space<vmem>>, vector<1x32x256xf32>
    %125 = vector.shape_cast %124 : vector<1x32x256xf32> to vector<32x256xf32>
    %126 = arith.mulf %123, %125 : vector<32x256xf32>
    %127 = arith.addf %122, %126 : vector<32x256xf32>
    %128 = vector.extract_strided_slice %0 {offsets = [32, 0], sizes = [32, 1], strides = [1, 1]} : vector<64x3xf32> to vector<32x1xf32>
    %129 = vector.broadcast %128 : vector<32x1xf32> to vector<32x256xf32>
    %130 = arith.addf %127, %129 : vector<32x256xf32>
    %cst_74 = arith.constant 0.000000e+00 : f32
    %131 = vector.broadcast %cst_74 : f32 to vector<32x256xf32>
    %132 = arith.maximumf %130, %131 : vector<32x256xf32>
    %133 = vector.extract_strided_slice %0 {offsets = [32, 1], sizes = [32, 1], strides = [1, 1]} : vector<64x3xf32> to vector<32x1xf32>
    %134 = vector.broadcast %133 : vector<32x1xf32> to vector<32x256xf32>
    %135 = arith.mulf %132, %134 : vector<32x256xf32>
    %cst_75 = arith.constant dense<0.000000e+00> : vector<256xf32>
    %136 = vector.multi_reduction <add>, %135, %cst_75 [0] : vector<32x256xf32> to vector<256xf32>
    %137 = vector.shape_cast %136 : vector<256xf32> to vector<1x256xf32>
    %138 = arith.negf %137 : vector<1x256xf32>
    %139 = math.exp %138 : vector<1x256xf32>
    %cst_76 = arith.constant 1.000000e+00 : f32
    %140 = vector.broadcast %cst_76 : f32 to vector<1x256xf32>
    %141 = arith.addf %140, %139 : vector<1x256xf32>
    %142 = arith.divf %140, %141 : vector<1x256xf32>
    %143 = vector.broadcast %142 : vector<1x256xf32> to vector<32x256xf32>
    %144 = arith.mulf %84, %143 : vector<32x256xf32>
    %cst_77 = arith.constant dense<0.000000e+00> : vector<32xf32>
    %145 = vector.multi_reduction <add>, %144, %cst_77 [1] : vector<32x256xf32> to vector<32xf32>
    %146 = vector.shape_cast %145 : vector<32xf32> to vector<32x1xf32>
    %cst_78 = arith.constant 3.906250e-03 : f32
    %147 = vector.broadcast %cst_78 : f32 to vector<32x1xf32>
    %148 = arith.mulf %146, %147 : vector<32x1xf32>
    %c1_79 = arith.constant 1 : index
    %c0_80 = arith.constant 0 : index
    %c0_81 = arith.constant 0 : index
    %149 = vector.load %arg3[%c1_79, %c0_80, %c0_81] : memref<2x32x32xbf16, #tpu.memory_space<vmem>>, vector<1x32x32xbf16>
    %150 = vector.shape_cast %149 : vector<1x32x32xbf16> to vector<32x32xbf16>
    %151 = arith.truncf %148 : vector<32x1xf32> to vector<32x1xbf16>
    %cst_82 = arith.constant dense<0.000000e+00> : vector<32x1xf32>
    %152 = tpu.matmul %150, %151, %cst_82 {dimension_numbers = #tpu.dot_dimension_numbers<[1], [0], [0], [1], [0, 0, 1, 1], [], []>} : vector<32x32xbf16>, vector<32x1xbf16>, vector<32x1xf32> -> vector<32x1xf32>
    %153 = arith.negf %152 : vector<32x1xf32>
    %154 = math.exp %153 : vector<32x1xf32>
    %cst_83 = arith.constant 1.000000e+00 : f32
    %155 = vector.broadcast %cst_83 : f32 to vector<32x1xf32>
    %156 = arith.addf %155, %154 : vector<32x1xf32>
    %157 = arith.divf %155, %156 : vector<32x1xf32>
    %158 = vector.broadcast %157 : vector<32x1xf32> to vector<32x256xf32>
    %159 = arith.mulf %144, %158 : vector<32x256xf32>
    %c0_84 = arith.constant 0 : index
    %c0_85 = arith.constant 0 : index
    %160 = vector.load %arg8[%c0_84, %c0_85] : memref<32x256xf32, #tpu.memory_space<vmem>>, vector<32x256xf32>
    %161 = arith.addf %160, %159 : vector<32x256xf32>
    %c4_86 = arith.constant 4 : index
    %c64 = arith.constant 64 : index
    %c0_87 = arith.constant 0 : index
    %162 = vector.load %arg4[%c4_86, %c64, %c0_87] : memref<9x128x256xf32, #tpu.memory_space<vmem>>, vector<1x32x256xf32>
    %163 = vector.shape_cast %162 : vector<1x32x256xf32> to vector<32x256xf32>
    %164 = arith.mulf %161, %163 : vector<32x256xf32>
    %c17_i32_88 = arith.constant 17 : i32
    %165 = tpu.dynamic_rotate %161 by %c17_i32_88 dim 1 : vector<32x256xf32>, i32 -> vector<32x256xf32>
    %c0_89 = arith.constant 0 : index
    %c64_90 = arith.constant 64 : index
    %c0_91 = arith.constant 0 : index
    %166 = vector.load %arg4[%c0_89, %c64_90, %c0_91] : memref<9x128x256xf32, #tpu.memory_space<vmem>>, vector<1x32x256xf32>
    %167 = vector.shape_cast %166 : vector<1x32x256xf32> to vector<32x256xf32>
    %168 = arith.mulf %165, %167 : vector<32x256xf32>
    %169 = arith.addf %164, %168 : vector<32x256xf32>
    %c16_i32_92 = arith.constant 16 : i32
    %170 = tpu.dynamic_rotate %161 by %c16_i32_92 dim 1 : vector<32x256xf32>, i32 -> vector<32x256xf32>
    %c1_93 = arith.constant 1 : index
    %c64_94 = arith.constant 64 : index
    %c0_95 = arith.constant 0 : index
    %171 = vector.load %arg4[%c1_93, %c64_94, %c0_95] : memref<9x128x256xf32, #tpu.memory_space<vmem>>, vector<1x32x256xf32>
    %172 = vector.shape_cast %171 : vector<1x32x256xf32> to vector<32x256xf32>
    %173 = arith.mulf %170, %172 : vector<32x256xf32>
    %174 = arith.addf %169, %173 : vector<32x256xf32>
    %c15_i32_96 = arith.constant 15 : i32
    %175 = tpu.dynamic_rotate %161 by %c15_i32_96 dim 1 : vector<32x256xf32>, i32 -> vector<32x256xf32>
    %c2_97 = arith.constant 2 : index
    %c64_98 = arith.constant 64 : index
    %c0_99 = arith.constant 0 : index
    %176 = vector.load %arg4[%c2_97, %c64_98, %c0_99] : memref<9x128x256xf32, #tpu.memory_space<vmem>>, vector<1x32x256xf32>
    %177 = vector.shape_cast %176 : vector<1x32x256xf32> to vector<32x256xf32>
    %178 = arith.mulf %175, %177 : vector<32x256xf32>
    %179 = arith.addf %174, %178 : vector<32x256xf32>
    %c1_i32_100 = arith.constant 1 : i32
    %180 = tpu.dynamic_rotate %161 by %c1_i32_100 dim 1 : vector<32x256xf32>, i32 -> vector<32x256xf32>
    %c3_101 = arith.constant 3 : index
    %c64_102 = arith.constant 64 : index
    %c0_103 = arith.constant 0 : index
    %181 = vector.load %arg4[%c3_101, %c64_102, %c0_103] : memref<9x128x256xf32, #tpu.memory_space<vmem>>, vector<1x32x256xf32>
    %182 = vector.shape_cast %181 : vector<1x32x256xf32> to vector<32x256xf32>
    %183 = arith.mulf %180, %182 : vector<32x256xf32>
    %184 = arith.addf %179, %183 : vector<32x256xf32>
    %c255_i32_104 = arith.constant 255 : i32
    %185 = tpu.dynamic_rotate %161 by %c255_i32_104 dim 1 : vector<32x256xf32>, i32 -> vector<32x256xf32>
    %c5_105 = arith.constant 5 : index
    %c64_106 = arith.constant 64 : index
    %c0_107 = arith.constant 0 : index
    %186 = vector.load %arg4[%c5_105, %c64_106, %c0_107] : memref<9x128x256xf32, #tpu.memory_space<vmem>>, vector<1x32x256xf32>
    %187 = vector.shape_cast %186 : vector<1x32x256xf32> to vector<32x256xf32>
    %188 = arith.mulf %185, %187 : vector<32x256xf32>
    %189 = arith.addf %184, %188 : vector<32x256xf32>
    %c241_i32_108 = arith.constant 241 : i32
    %190 = tpu.dynamic_rotate %161 by %c241_i32_108 dim 1 : vector<32x256xf32>, i32 -> vector<32x256xf32>
    %c6_109 = arith.constant 6 : index
    %c64_110 = arith.constant 64 : index
    %c0_111 = arith.constant 0 : index
    %191 = vector.load %arg4[%c6_109, %c64_110, %c0_111] : memref<9x128x256xf32, #tpu.memory_space<vmem>>, vector<1x32x256xf32>
    %192 = vector.shape_cast %191 : vector<1x32x256xf32> to vector<32x256xf32>
    %193 = arith.mulf %190, %192 : vector<32x256xf32>
    %194 = arith.addf %189, %193 : vector<32x256xf32>
    %c240_i32_112 = arith.constant 240 : i32
    %195 = tpu.dynamic_rotate %161 by %c240_i32_112 dim 1 : vector<32x256xf32>, i32 -> vector<32x256xf32>
    %c7_113 = arith.constant 7 : index
    %c64_114 = arith.constant 64 : index
    %c0_115 = arith.constant 0 : index
    %196 = vector.load %arg4[%c7_113, %c64_114, %c0_115] : memref<9x128x256xf32, #tpu.memory_space<vmem>>, vector<1x32x256xf32>
    %197 = vector.shape_cast %196 : vector<1x32x256xf32> to vector<32x256xf32>
    %198 = arith.mulf %195, %197 : vector<32x256xf32>
    %199 = arith.addf %194, %198 : vector<32x256xf32>
    %c239_i32_116 = arith.constant 239 : i32
    %200 = tpu.dynamic_rotate %161 by %c239_i32_116 dim 1 : vector<32x256xf32>, i32 -> vector<32x256xf32>
    %c8_117 = arith.constant 8 : index
    %c64_118 = arith.constant 64 : index
    %c0_119 = arith.constant 0 : index
    %201 = vector.load %arg4[%c8_117, %c64_118, %c0_119] : memref<9x128x256xf32, #tpu.memory_space<vmem>>, vector<1x32x256xf32>
    %202 = vector.shape_cast %201 : vector<1x32x256xf32> to vector<32x256xf32>
    %203 = arith.mulf %200, %202 : vector<32x256xf32>
    %204 = arith.addf %199, %203 : vector<32x256xf32>
    %205 = vector.extract_strided_slice %0 {offsets = [0, 2], sizes = [32, 1], strides = [1, 1]} : vector<64x3xf32> to vector<32x1xf32>
    %206 = vector.broadcast %205 : vector<32x1xf32> to vector<32x256xf32>
    %207 = arith.addf %204, %206 : vector<32x256xf32>
    %c32_120 = arith.constant 32 : index
    %c0_121 = arith.constant 0 : index
    %208 = vector.load %arg7[%c32_120, %c0_121] : memref<64x256xf32, #tpu.memory_space<vmem>>, vector<32x256xf32>
    %209 = arith.mulf %207, %208 : vector<32x256xf32>
    %c4_122 = arith.constant 4 : index
    %c96 = arith.constant 96 : index
    %c0_123 = arith.constant 0 : index
    %210 = vector.load %arg4[%c4_122, %c96, %c0_123] : memref<9x128x256xf32, #tpu.memory_space<vmem>>, vector<1x32x256xf32>
    %211 = vector.shape_cast %210 : vector<1x32x256xf32> to vector<32x256xf32>
    %212 = arith.mulf %209, %211 : vector<32x256xf32>
    %c17_i32_124 = arith.constant 17 : i32
    %213 = tpu.dynamic_rotate %209 by %c17_i32_124 dim 1 : vector<32x256xf32>, i32 -> vector<32x256xf32>
    %c0_125 = arith.constant 0 : index
    %c96_126 = arith.constant 96 : index
    %c0_127 = arith.constant 0 : index
    %214 = vector.load %arg4[%c0_125, %c96_126, %c0_127] : memref<9x128x256xf32, #tpu.memory_space<vmem>>, vector<1x32x256xf32>
    %215 = vector.shape_cast %214 : vector<1x32x256xf32> to vector<32x256xf32>
    %216 = arith.mulf %213, %215 : vector<32x256xf32>
    %217 = arith.addf %212, %216 : vector<32x256xf32>
    %c16_i32_128 = arith.constant 16 : i32
    %218 = tpu.dynamic_rotate %209 by %c16_i32_128 dim 1 : vector<32x256xf32>, i32 -> vector<32x256xf32>
    %c1_129 = arith.constant 1 : index
    %c96_130 = arith.constant 96 : index
    %c0_131 = arith.constant 0 : index
    %219 = vector.load %arg4[%c1_129, %c96_130, %c0_131] : memref<9x128x256xf32, #tpu.memory_space<vmem>>, vector<1x32x256xf32>
    %220 = vector.shape_cast %219 : vector<1x32x256xf32> to vector<32x256xf32>
    %221 = arith.mulf %218, %220 : vector<32x256xf32>
    %222 = arith.addf %217, %221 : vector<32x256xf32>
    %c15_i32_132 = arith.constant 15 : i32
    %223 = tpu.dynamic_rotate %209 by %c15_i32_132 dim 1 : vector<32x256xf32>, i32 -> vector<32x256xf32>
    %c2_133 = arith.constant 2 : index
    %c96_134 = arith.constant 96 : index
    %c0_135 = arith.constant 0 : index
    %224 = vector.load %arg4[%c2_133, %c96_134, %c0_135] : memref<9x128x256xf32, #tpu.memory_space<vmem>>, vector<1x32x256xf32>
    %225 = vector.shape_cast %224 : vector<1x32x256xf32> to vector<32x256xf32>
    %226 = arith.mulf %223, %225 : vector<32x256xf32>
    %227 = arith.addf %222, %226 : vector<32x256xf32>
    %c1_i32_136 = arith.constant 1 : i32
    %228 = tpu.dynamic_rotate %209 by %c1_i32_136 dim 1 : vector<32x256xf32>, i32 -> vector<32x256xf32>
    %c3_137 = arith.constant 3 : index
    %c96_138 = arith.constant 96 : index
    %c0_139 = arith.constant 0 : index
    %229 = vector.load %arg4[%c3_137, %c96_138, %c0_139] : memref<9x128x256xf32, #tpu.memory_space<vmem>>, vector<1x32x256xf32>
    %230 = vector.shape_cast %229 : vector<1x32x256xf32> to vector<32x256xf32>
    %231 = arith.mulf %228, %230 : vector<32x256xf32>
    %232 = arith.addf %227, %231 : vector<32x256xf32>
    %c255_i32_140 = arith.constant 255 : i32
    %233 = tpu.dynamic_rotate %209 by %c255_i32_140 dim 1 : vector<32x256xf32>, i32 -> vector<32x256xf32>
    %c5_141 = arith.constant 5 : index
    %c96_142 = arith.constant 96 : index
    %c0_143 = arith.constant 0 : index
    %234 = vector.load %arg4[%c5_141, %c96_142, %c0_143] : memref<9x128x256xf32, #tpu.memory_space<vmem>>, vector<1x32x256xf32>
    %235 = vector.shape_cast %234 : vector<1x32x256xf32> to vector<32x256xf32>
    %236 = arith.mulf %233, %235 : vector<32x256xf32>
    %237 = arith.addf %232, %236 : vector<32x256xf32>
    %c241_i32_144 = arith.constant 241 : i32
    %238 = tpu.dynamic_rotate %209 by %c241_i32_144 dim 1 : vector<32x256xf32>, i32 -> vector<32x256xf32>
    %c6_145 = arith.constant 6 : index
    %c96_146 = arith.constant 96 : index
    %c0_147 = arith.constant 0 : index
    %239 = vector.load %arg4[%c6_145, %c96_146, %c0_147] : memref<9x128x256xf32, #tpu.memory_space<vmem>>, vector<1x32x256xf32>
    %240 = vector.shape_cast %239 : vector<1x32x256xf32> to vector<32x256xf32>
    %241 = arith.mulf %238, %240 : vector<32x256xf32>
    %242 = arith.addf %237, %241 : vector<32x256xf32>
    %c240_i32_148 = arith.constant 240 : i32
    %243 = tpu.dynamic_rotate %209 by %c240_i32_148 dim 1 : vector<32x256xf32>, i32 -> vector<32x256xf32>
    %c7_149 = arith.constant 7 : index
    %c96_150 = arith.constant 96 : index
    %c0_151 = arith.constant 0 : index
    %244 = vector.load %arg4[%c7_149, %c96_150, %c0_151] : memref<9x128x256xf32, #tpu.memory_space<vmem>>, vector<1x32x256xf32>
    %245 = vector.shape_cast %244 : vector<1x32x256xf32> to vector<32x256xf32>
    %246 = arith.mulf %243, %245 : vector<32x256xf32>
    %247 = arith.addf %242, %246 : vector<32x256xf32>
    %c239_i32_152 = arith.constant 239 : i32
    %248 = tpu.dynamic_rotate %209 by %c239_i32_152 dim 1 : vector<32x256xf32>, i32 -> vector<32x256xf32>
    %c8_153 = arith.constant 8 : index
    %c96_154 = arith.constant 96 : index
    %c0_155 = arith.constant 0 : index
    %249 = vector.load %arg4[%c8_153, %c96_154, %c0_155] : memref<9x128x256xf32, #tpu.memory_space<vmem>>, vector<1x32x256xf32>
    %250 = vector.shape_cast %249 : vector<1x32x256xf32> to vector<32x256xf32>
    %251 = arith.mulf %248, %250 : vector<32x256xf32>
    %252 = arith.addf %247, %251 : vector<32x256xf32>
    %253 = vector.extract_strided_slice %0 {offsets = [32, 2], sizes = [32, 1], strides = [1, 1]} : vector<64x3xf32> to vector<32x1xf32>
    %254 = vector.broadcast %253 : vector<32x1xf32> to vector<32x256xf32>
    %255 = arith.addf %252, %254 : vector<32x256xf32>
    %c0_156 = arith.constant 0 : index
    %c0_157 = arith.constant 0 : index
    %256 = vector.load %arg6[%c0_156, %c0_157] : memref<32x256xf32, #tpu.memory_space<vmem>>, vector<32x256xf32>
    tpu.vector_store %arg6[%c0_156, %c0_157], %255 {strides = array<i32>} : memref<32x256xf32, #tpu.memory_space<vmem>>, vector<32x256xf32>,
    return
  }
  func.func @transform_0(%arg0: i32) -> (i32, i32) {
    %c0_i32 = arith.constant 0 : i32
    %c0_i32_0 = arith.constant 0 : i32
    return %c0_i32, %arg0 : i32, i32
  }
  func.func @transform_1(%arg0: i32) -> (i32, i32) {
    %c0_i32 = arith.constant 0 : i32
    %c0_i32_0 = arith.constant 0 : i32
    %c0_i32_1 = arith.constant 0 : i32
    return %c0_i32, %c0_i32_0 : i32, i32
  }
  func.func @transform_2(%arg0: i32) -> (i32, i32, i32) {
    %c0_i32 = arith.constant 0 : i32
    %c0_i32_0 = arith.constant 0 : i32
    %c0_i32_1 = arith.constant 0 : i32
    %c0_i32_2 = arith.constant 0 : i32
    return %c0_i32, %c0_i32_0, %c0_i32_1 : i32, i32, i32
  }
  func.func @transform_3(%arg0: i32) -> (i32, i32, i32) {
    %c0_i32 = arith.constant 0 : i32
    %c0_i32_0 = arith.constant 0 : i32
    %c0_i32_1 = arith.constant 0 : i32
    %c0_i32_2 = arith.constant 0 : i32
    return %c0_i32, %c0_i32_0, %c0_i32_1 : i32, i32, i32
  }
  func.func @transform_4(%arg0: i32) -> (i32, i32) {
    %c0_i32 = arith.constant 0 : i32
    %c0_i32_0 = arith.constant 0 : i32
    %c0_i32_1 = arith.constant 0 : i32
    return %c0_i32, %c0_i32_0 : i32, i32
  }
  func.func @transform_5(%arg0: i32) -> (i32, i32) {
    %c0_i32 = arith.constant 0 : i32
    %c0_i32_0 = arith.constant 0 : i32
    return %c0_i32, %arg0 : i32, i32
  }
}

</mosaic_0001>

<bundles_post_ra>
// kernel: tpu_custom_call.1
= control target key start
LH: loop header
LB: loop body
LE: loop exit
PB: predicated region body
PF: predicated region fallthrough
CT: control target
= control target key end

     0   :  { %s5622_s0 = inlined_call_operand.hbm [shape: f32[32,512], index: 0, kind: input, shape index: {}]   ;;  %s5623_s1 = inlined_call_operand.vmem [shape: bf16[96,32], index: 1, kind: input, shape index: {}]   ;;  %s5624_s2 = inlined_call_operand.hbm [shape: bf16[2,32,32], index: 2, kind: input, shape index: {}]   ;;  %s5625_s3 = inlined_call_operand.hbm [shape: f32[9,128,256], index: 3, kind: input, shape index: {}]   ;;  %s5626_s4 = inlined_call_operand.vmem [shape: f32[64,3], index: 4, kind: input, shape index: {}]   ;;  %s5627_s5 = inlined_call_operand.hbm [shape: f32[32,512], index: 5, kind: output, shape index: {}]  }
   0x1   :  { %5741 = sst [smem:[#allocation98_spill]] %s5624_s2 }
   0x2   :  { %10 = vsyncpa [#allocation5], 0 }
   0x3   :  { %12 = vsyncpa [#allocation5 + $0x1], 0 }
   0x4   :  { %13 = vsyncpa [#allocation8], 0 }
   0x5   :  { %14 = vsyncpa [#allocation6], 0 }
   0x6   :  { %16 = vsyncpa [#allocation6 + $0x1], 0  ;;  %s3220_s18 = smov 0   ;;  %s3222_s19 = smov 0  }
   0x7   :  { %s3224_s20 = smov 0   ;;  %s3226_s21 = smov 0  }
   0x8 LB: > { %s3241_s22 = sadd.s32 4294967295, %s3166_s21   ;;  %s2768_s23 = sadd.s32 4294967294, %s3166_s21   ;;  %s3166_s21 = sphi %s3226_s21, %s5979_s21   ;;  %s3162_s20 = sphi %s3224_s20, %s5978_s20   ;;  %s3158_s19 = sphi %s3222_s19, %s5977_s19   ;;  %s3154_s18 = sphi %s3220_s18, %s5976_s18  }
   0x9   : > { %s3245_s24 = sadd.s32 1, %s3166_s21   ;;  %s29_s25 = sadd.s32 1, %s3162_s20 }
   0xa   : > { %s26_s26 = ssub.s32 %s3166_s21, %s3245_s24  ;;  %p36_p0 = scmp.ne.s32.totalorder %s3162_s20, %s3158_s19 }
   0xb   : > { %p27_p1 = scmp.eq.s32.totalorder %s26_s26, 0  ;;  %p37_p2 = scmp.eq.s32.totalorder %s3166_s21, 0 }
   0xc   : > { %p42_p3 = scmp.ne.s32.totalorder %s3158_s19, %s3154_s18  ;;  %p5628_p4 = scmp.eq.s32.totalorder %s3241_s22, 0 }
   0xd   : > { %s3257_s27 = scalar_select %p27_p1, %s3162_s20, %s29_s25  }
   0xe   : > { %p3259_p5 = por %p37_p2, %p36_p0  ;;  %p3265_p6 = por %p5628_p4, %p42_p3 }
   0xf   : > { %5742 = sst [smem:[#allocation14_spill]] %s3257_s27  ;;  %p150_p7 = scmp.eq.s32.totalorder %s3241_s22, 1 }
  0x10   : > { %s5743_s28 = scalar_select %p3259_p5, 1, 0 }
  0x11   : > { %s5744_s29 = scalar_select %p3265_p6, 1, 0 }
  0x12   : > { %p156_p8 = scmp.eq.s32.totalorder %s2768_s23, 1  ;;  %p2769_p9 = scmp.ge.s32.totalorder %s3166_s21, 1 }
  0x13   : > { %p163_p10 = scmp.lt.s32.totalorder %s3166_s21, 3  ;;  %p3272_p11 = por %p150_p7, %p36_p0 }
  0x14   : > { %p3276_p12 = por %p156_p8, %p42_p3  ;;  %s3168_s8 = smov [#allocation7]  }
  0x15   : > { %s5745_s30 = scalar_select %p3272_p11, 1, 0 }
  0x16   : > { %s5746_s6 = scalar_select %p3276_p12, 1, 0 }
  0x17   : > { %p3280_p13 = pnand %p2769_p9, %p163_p10  ;;  %s178_s9 = sshll.u32 %s3168_s8, 4  ;;  %s179_s9 = int_to_ptr.vmem [resolvable:$true] %s178_s9 }
  0x18   : > { %s3169_s11 = smov [#allocation9]   ;;  %s5749_s2 = sld [smem:[#allocation98_spill]] }
  0x19   : > { %s5747_s7 = scalar_select %p3280_p13, 1, 0 }
  0x1a   : > { %p2860_p1 = pneg %p3280_p13  ;;  %s191_s12 = sshll.u32 %s3169_s11, 4  ;;  %s192_s12 = int_to_ptr.vmem [resolvable:$true] %s191_s12 }
  0x1c   : > { %p3288_p2 = pnand %p2860_p1, %p5628_p4 }
  0x1e   : > { %s3010_s15 = scalar_lea.hbm %s5749_s2, 512  ;;  %p3012_p8 = pneg %p3288_p2 }
  0x1f   : > { %p3011_p7 = scmp.ne.s32.totalorder %s5749_s2, %s3010_s15  ;;  %p3017_p1 = scmp.lt.u32.totalorder %s3010_s15, %s5749_s2 }
  0x21   : > { %p3013_p9 = pnand %p3012_p8, %p3011_p7 }
  0x23   : > { %p3014_p10 = pneg %p3013_p9 }
  0x25   : > { %p3019_p0 = pnand %p3017_p1, %p3014_p10 }
  0x27   : > { %3022 = shalt.err (!%p3019_p0)
}
  0x28   : > { %s3023_s26 = scalar_lea.vmem %s179_s9, 512  ;;  %p3031_p11 = scmp.lt.s32.totalorder %s179_s9, %s179_s9 }
  0x29   : > { %p3024_p4 = scmp.ne.s32.totalorder %s179_s9, %s3023_s26  ;;  %p3032_p6 = scmp.lt.s32.totalorder %s3023_s26, %s3023_s26 }
  0x2b   : > { %p3026_p3 = pnand %p3024_p4, %p3012_p8  ;;  %p3033_p13 = por %p3032_p6, %p3031_p11 }
  0x2d   : > { %p3027_p12 = pneg %p3026_p3 }
  0x2f   : > { %p3034_p5 = pnand %p3033_p13, %p3027_p12 }
  0x31   : > { %3037 = shalt.err (!%p3034_p5)
}
  0x32   : > { %s3170_s8 = smov 64   ;;  %s3171_s11 = smov 4  }
  0x33   : > { %2863 = dma.hbm_to_vmem [thread:$0]  (!%p3288_p2), %s5749_s2, 512, %s179_s9, [#allocation8], %s3170_s8, %s3170_s8, %s3171_s11  }
  0x34   : > { %p5750_p0 = scmp.ne.s32.totalorder %s5743_s28, 0  ;;  %p5751_p4 = scmp.lt.s32.totalorder %s3166_s21, 2 }
  0x35   : > { %s208_s16 = sand.u32 1, %s3162_s20   ;;  %s3038_s25 = scalar_lea.hbm %s5625_s3, 36864 }
  0x36   : > { %p3320_p3 = pnand %p5751_p4, %p5750_p0  ;;  %p3039_p5 = scmp.ne.s32.totalorder %s5625_s3, %s3038_s25 }
  0x37   : > { %p3045_p12 = scmp.lt.u32.totalorder %s3038_s25, %s5625_s3 }
  0x38   : > { %s5752_s15 = scalar_select %p3320_p3, 1, 0 }
  0x39   : > { %p3041_p6 = pnand %p3039_p5, %p3012_p8 }
  0x3b   : > { %p3042_p11 = pneg %p3041_p6 }
  0x3d   : > { %p3047_p13 = pnand %p3045_p12, %p3042_p11 }
  0x3f   : > { %3050 = shalt.err (!%p3047_p13)
}
  0x40   : > { %s3051_s8 = scalar_lea.vmem %s192_s12, 36864  ;;  %p3059_p1 = scmp.lt.s32.totalorder %s192_s12, %s192_s12 }
  0x41   : > { %p3052_p7 = scmp.ne.s32.totalorder %s192_s12, %s3051_s8  ;;  %p3060_p0 = scmp.lt.s32.totalorder %s3051_s8, %s3051_s8 }
  0x43   : > { %p3054_p9 = pnand %p3052_p7, %p3012_p8  ;;  %p3061_p4 = por %p3060_p0, %p3059_p1 }
  0x45   : > { %p3055_p10 = pneg %p3054_p9 }
  0x47   : > { %p3062_p3 = pnand %p3061_p4, %p3055_p10 }
  0x49   : > { %3065 = shalt.err (!%p3062_p3)
}
  0x4a   : > { %s3172_s27 = smov 256   ;;  %s3173_s11 = smov 16  }
  0x4b   : > { %2866 = dma.hbm_to_vmem [thread:$0]  (!%p3288_p2), %s5625_s3, 36864, %s192_s12, [#allocation8], %s3172_s27, %s3172_s27, %s3173_s11  }
  0x4c   : > { %s2773_s17 = sshll.u32 %s208_s16, 6  ;;  %s2818_s23 = sshll.u32 %s3166_s21, 8 }
  0x4d   : > { %s3352_s28 = scalar_lea.hbm %s5622_s0, %s2818_s23  ;;  %s212_s9 = scalar_lea.vmem [#allocation4], %s2773_s17 }
  0x4e   : > { %s219_s10 = sshll.u32 %s212_s9, 4  ;;  %s3356_s8 = scalar_lea.sflag [#allocation5], %s208_s16  ;;  %s3354_s10 = int_to_ptr.vmem [resolvable:$true] %s219_s10 }
  0x4f   : > { %s3066_s2 = scalar_lea.hbm %s3352_s28, 1024  ;;  %p5753_p2 = scmp.ne.s32.totalorder %s5752_s15, 0 }
  0x50   : > { %p3067_p8 = scmp.ne.s32.totalorder %s3352_s28, %s3066_s2  ;;  %s3071_s14 = scalar_lea.hbm %s5622_s0, 2048 }
  0x51   : > { %p3068_p3 = pneg %p5753_p2  ;;  %p3072_p11 = scmp.lt.u32.totalorder %s3352_s28, %s5622_s0 }
  0x52   : > { %p3073_p12 = scmp.lt.u32.totalorder %s3071_s14, %s3066_s2  ;;  %p3075_p7 = scmp.lt.u32.totalorder %s3066_s2, %s3352_s28 }
  0x53   : > { %p3069_p5 = pnand %p3068_p3, %p3067_p8 }
  0x54   : > { %p3074_p13 = por %p3073_p12, %p3072_p11 }
  0x55   : > { %p3070_p6 = pneg %p3069_p5 }
  0x56   : > { %p3076_p9 = por %p3075_p7, %p3074_p13 }
  0x58   : > { %p3077_p10 = pnand %p3076_p9, %p3070_p6 }
  0x5a   : > { %3080 = shalt.err (!%p3077_p10)
}
  0x5b   : > { %s3081_s16 = scalar_lea.vmem %s3354_s10, 1024  ;;  %s3174_s17 = smov [#allocation4]  }
  0x5c   : > { %p3082_p1 = scmp.ne.s32.totalorder %s3354_s10, %s3081_s16  ;;  %s3086_s26 = sshll.u32 %s3174_s17, 4  ;;  %s3087_s26 = int_to_ptr.vmem [resolvable:$false] %s3086_s26 }
  0x5d   : > { %s3088_s9 = scalar_lea.vmem %s3087_s26, 2048  ;;  %p3089_p8 = scmp.lt.s32.totalorder %s3354_s10, %s3087_s26 }
  0x5e   : > { %p3084_p0 = pnand %p3082_p1, %p3068_p3  ;;  %p3090_p5 = scmp.lt.s32.totalorder %s3088_s9, %s3081_s16 }
  0x60   : > { %p3085_p4 = pneg %p3084_p0  ;;  %p3091_p11 = por %p3090_p5, %p3089_p8 }
  0x62   : > { %p3092_p12 = pnand %p3091_p11, %p3085_p4 }
  0x64   : > { %3095 = shalt.err (!%p3092_p12)
}
  0x65   : > { %s3175_s2 = smov 512   ;;  %p5754_p3 = scmp.ne.s32.totalorder %s5747_s7, 0 }
  0x66   : > { %2870 = dma.hbm_to_vmem [thread:$0]  (!%p5753_p2), %s3352_s28, 1024, %s3354_s10, %s3356_s8, %s3175_s2, %s3172_s27, %s3173_s11  }
  0x67   : > { %231 = sbr.rel (%p5754_p3) target bundleno = 1776 (0x6f0), region = 40 }
  0x6e   : > { %s3389_s12 = sand.u32 1, %s3158_s19   ;;  %p5755_p6 = scmp.ne.s32.totalorder %s5744_s29, 0 }
  0x6f   : > { %s5734_s13 = sshll.u32 %s3389_s12, 6  ;;  %s234_s14 = scalar_lea.sflag [#allocation5], %s3389_s12 }
  0x70   : > { %s237_s15 = scalar_lea.vmem [#allocation4], %s5734_s13 }
  0x71   : > { %3141 = dma.done.wait (%p5755_p6), %s234_s14, 1024  }
  0x72   : > { %3143 = vsyncadd (%p5755_p6), %s234_s14, 4294966272  ;;  %p5756_p2 = scmp.eq.s32.totalorder %s3241_s22, 0 }
  0x74   : > { %3145 = dma.done.wait (%p5756_p2), [#allocation8], 37376   ;;  %p5757_p13 = pmov %p5756_p2 }
  0x75   : > { %v5633_v0 = vmov 0   ;;  %v284_v1 = vld [vmem:[%s237_s15 + $0x8] sm:$0xff]  ;;  %v286_v2 = vld [vmem:[%s237_s15 + $0x18] sm:$0xff]  ;;  %v283_v3 = vld [vmem:[%s237_s15] sm:$0xff]  ;;  %vm337_vm0 = vcmask 261120   ;;  %v5635_v19 = vmov 1  }
  0x76   : > { %3147 = vsyncadd (%p5757_p13), [#allocation8], 4294929920  ;;  %388 = vmatprep.mubr.bf16.mxu0 %v5633_v0  ;;  %2934 = vset.pattern.permute.xlu1 %v5633_v0  ;;  %v292_v4 = vpack.c.bf16 %v286_v2, %v284_v1  ;;  %v285_v5 = vld [vmem:[%s237_s15 + $0x10] sm:$0xff]  ;;  %v288_v6 = vld [vmem:[%s237_s15 + $0x28] sm:$0xff]  ;;  %s3178_s28 = smov 15   ;;  %s3179_s10 = smov 17  }
  0x77   : > { %2933 = vset.pattern.permute.xlu0 %v5633_v0  ;;  %428 = vmatprep.mubr.bf16.mxu1 %v5633_v0  ;;  %v290_v7 = vld [vmem:[%s237_s15 + $0x38] sm:$0xff]  ;;  %v291_v8 = vpack.c.bf16 %v285_v5, %v283_v3  ;;  %v287_v10 = vld [vmem:[%s237_s15 + $0x20] sm:$0xff]  ;;  %v289_v11 = vld [vmem:[%s237_s15 + $0x30] sm:$0xff]  ;;  %s5735_s8 = smov 111   ;;  %s3181_s23 = smov 16  }
  0x78   : > { %v294_v9 = vpack.c.bf16 %v290_v7, %v288_v6  ;;  %356 = vmatprep.subr.bf16.mxu0 %v292_v4  ;;  %2844 = vmatprep.subr.bf16.mxu1 %v292_v4  ;;  %v293_v12 = vpack.c.bf16 %v289_v11, %v287_v10  ;;  %v3410_v13 = vld [vmem:[%s5626_s4 + $0x8] sm:$0xff]  ;;  %v2944_v14 = vld [vmem:[%s5623_s1] sm:$0xff]   ;;  %v3419_v15 = vld [vmem:[%s5626_s4 + $0x10] sm:$0xff]  ;;  %s3182_s25 = smov 1   ;;  %s3183_s16 = smov 127  }
  0x79   : > { %357 = vmatpush1.bf16.msra.mxu0 %v291_v8  ;;  %2846 = vmatpush1.bf16.msra.mxu1 %v291_v8  ;;  %v275_v16 = vld [vmem:[%s5626_s4] sm:$0xff]  ;;  %v278_v17 = vld [vmem:[%s5626_s4 + $0x18] sm:$0xff]  ;;  %v2945_v20 = vld [vmem:[%s5623_s1 + $0x8] sm:$0xff]   ;;  %s3184_s17 = smov 113   ;;  %s3185_s26 = smov 112  }
  0x7a   : > { %358 = vmatprep.subr.bf16.mxu0 %v294_v9  ;;  %2845 = vmatprep.subr.bf16.mxu1 %v294_v9  ;;  %v3433_v18 = vld [vmem:[%s5626_s4 + $0x20] sm:$0xff]  ;;  %v3445_v21 = vld [vmem:[%s5626_s4 + $0x28] sm:$0xff]  ;;  %v2946_v22 = vld [vmem:[%s5623_s1 + $0x10] sm:$0xff]   ;;  %s5964_s13 = smov 111   ;;  %p5972_p9 = scmp.ne.s32.totalorder %s5745_s30, 0 }
  0x7b   : > { %890 = vperm.xlu1 %2934, %v3410_v13   ;;  %885 = vperm.xlu0 %2933, %v275_v16   ;;  %v2947_v23 = vld [vmem:[%s5623_s1 + $0x18] sm:$0xff]   ;;  %s3187_s11 = smov [#allocation10]  }
  0x7c   : > { %s3100_s9 = sshll.u32 %s3187_s11, 4  ;;  %s3101_s9 = int_to_ptr.vmem [resolvable:$false] %s3100_s9 }
  0x7d   : > { %359 = vmatpush1.bf16.msra.mxu0 %v293_v12  ;;  %2847 = vmatpush1.bf16.msra.mxu1 %v293_v12  ;;  %s3102_s2 = scalar_lea.vmem %s3101_s9, 2048 }
  0x7f   : > { %895 = vperm.xlu1 %2934, %v3419_v15   ;;  %900 = vperm.xlu0 %2933, %v278_v17  }
  0x80   : > { %2787 = vmatmul.mubr.msk.bf16.vlgmr.msra.gmra.mrb[0].mxu0 %vm337_vm0, %v2944_v14 }
  0x81   : > { %398 = vmatprep.mubr.bf16.mxu0 %v5633_v0 }
  0x83   : > { %2935 = vset.pattern.permute.xlu1 %v5635_v19  ;;  %1538 = vperm.xlu0 %2933, %v3433_v18  }
  0x84   : > { %920 = vperm.xlu1 %2935, %v275_v16  }
  0x88   : > { %2788 = vmatmul.mubr.msk.bf16.gmra.mrb[4].mxu0 %vm337_vm0, %v2945_v20  ;;  %932 = vperm.xlu1 %2935, %v278_v17  }
  0x89   : > { %408 = vmatprep.mubr.bf16.mxu0 %v5633_v0 }
  0x8c   : > { %2936 = vset.pattern.permute.xlu1 %v5633_v0 }
  0x8d   : > { %1543 = vperm.xlu1 %2936, %v3445_v21  }
  0x90   : > { %2789 = vmatmul.mubr.msk.bf16.gmra.mrb[8].mxu0 %vm337_vm0, %v2946_v22 }
  0x91   : > { %418 = vmatprep.mubr.bf16.mxu0 %v5633_v0 }
  0x98   : > { %2790 = vmatmul.mubr.msk.bf16.gmra.mrb[12].mxu0 %vm337_vm0, %v2947_v23 }
  0xfa   : > { %v3578_v40 = vpop.permute.xlu1 %890  ;;  %v3596_v43 = vpop.permute.xlu0 %885 }
  0xfb   : > { %5774 = vst [vmem:[#allocation31_spill] sm:$0xff] %v3578_v40  ;;  %5777 = vst [vmem:[#allocation34_spill] sm:$0xff] %v3596_v43 }
  0xfe   : > { %v3584_v41 = vpop.permute.xlu1 %895  ;;  %v3604_v45 = vpop.permute.xlu0 %900 }
  0xff   : > { %5775 = vst [vmem:[#allocation32_spill] sm:$0xff] %v3584_v41  ;;  %5779 = vst [vmem:[#allocation36_spill] sm:$0xff] %v3604_v45 }
 0x102   : > { %v3616_v47 = vpop.permute.xlu0 %1538 }
 0x103   : > { %v3594_v42 = vpop.permute.xlu1 %920  ;;  %5781 = vst [vmem:[#allocation38_spill] sm:$0xff] %v3616_v47 }
 0x104   : > { %5776 = vst [vmem:[#allocation33_spill] sm:$0xff] %v3594_v42 }
 0x107   : > { %v3602_v44 = vpop.permute.xlu1 %932 }
 0x108   : > { %5778 = vst [vmem:[#allocation35_spill] sm:$0xff] %v3602_v44 }
 0x10c   : > { %v3614_v46 = vpop.permute.xlu1 %1543 }
 0x10d   : > { %5780 = vst [vmem:[#allocation37_spill] sm:$0xff] %v3614_v46 }
 0x153   : > { %v3458_v24 = vpop.f32.mrb[0].mxu0 }
 0x154   : > { %5758 = vst [vmem:[#allocation15_spill] sm:$0xff] %v3458_v24  ;;  %v3460_v25 = vpop.f32.mrb[1].mxu0  ;;  %583 = vrot.lane.b32.xlu1 %v3458_v24, %s3178_s28  ;;  %482 = vrot.lane.b32.xlu0 %v3458_v24, %s3179_s10 }
 0x155   : > { %5759 = vst [vmem:[#allocation16_spill] sm:$0xff] %v3460_v25  ;;  %v3466_v26 = vpop.f32.mrb[2].mxu0 }
 0x156   : > { %5760 = vst [vmem:[#allocation17_spill] sm:$0xff] %v3466_v26  ;;  %v3468_v27 = vpop.f32.mrb[3].mxu0 }
 0x157   : > { %5761 = vst [vmem:[#allocation18_spill] sm:$0xff] %v3468_v27 }
 0x158   : > { %833 = vrot.lane.b32.xlu1 %v3458_v24, %s5735_s8  ;;  %533 = vrot.lane.b32.xlu0 %v3458_v24, %s3181_s23 }
 0x15b   : > { %v3474_v28 = vpop.f32.mrb[4].mxu0 }
 0x15c   : > { %5762 = vst [vmem:[#allocation19_spill] sm:$0xff] %v3474_v28  ;;  %591 = vrot.lane.b32.xlu1 %v3460_v25, %s3178_s28  ;;  %633 = vrot.lane.b32.xlu0 %v3458_v24, %s3182_s25  ;;  %v3480_v29 = vpop.f32.mrb[5].mxu0 }
 0x15d   : > { %5763 = vst [vmem:[#allocation20_spill] sm:$0xff] %v3480_v29  ;;  %v3482_v30 = vpop.f32.mrb[6].mxu0 }
 0x15e   : > { %5764 = vst [vmem:[#allocation21_spill] sm:$0xff] %v3482_v30  ;;  %v3484_v31 = vpop.f32.mrb[7].mxu0 }
 0x15f   : > { %5765 = vst [vmem:[#allocation22_spill] sm:$0xff] %v3484_v31 }
 0x160   : > { %841 = vrot.lane.b32.xlu1 %v3460_v25, %s5735_s8  ;;  %683 = vrot.lane.b32.xlu0 %v3458_v24, %s3183_s16 }
 0x163   : > { %v3490_v32 = vpop.f32.mrb[8].mxu0 }
 0x164   : > { %5766 = vst [vmem:[#allocation23_spill] sm:$0xff] %v3490_v32  ;;  %535 = vrot.lane.b32.xlu1 %v3466_v26, %s3181_s23  ;;  %733 = vrot.lane.b32.xlu0 %v3458_v24, %s3184_s17  ;;  %v3496_v33 = vpop.f32.mrb[9].mxu0 }
 0x165   : > { %5767 = vst [vmem:[#allocation24_spill] sm:$0xff] %v3496_v33  ;;  %v3498_v34 = vpop.f32.mrb[10].mxu0 }
 0x166   : > { %5768 = vst [vmem:[#allocation25_spill] sm:$0xff] %v3498_v34  ;;  %v3500_v35 = vpop.f32.mrb[11].mxu0 }
 0x167   : > { %5769 = vst [vmem:[#allocation26_spill] sm:$0xff] %v3500_v35 }
 0x168   : > { %635 = vrot.lane.b32.xlu1 %v3466_v26, %s3182_s25  ;;  %783 = vrot.lane.b32.xlu0 %v3458_v24, %s3185_s26 }
 0x16b   : > { %v3538_v36 = vpop.f32.mrb[12].mxu0 }
 0x16c   : > { %685 = vrot.lane.b32.xlu1 %v3466_v26, %s3183_s16  ;;  %490 = vrot.lane.b32.xlu0 %v3460_v25, %s3179_s10  ;;  %5770 = vst [vmem:[#allocation27_spill] sm:$0xff] %v3538_v36  ;;  %v3540_v37 = vpop.f32.mrb[13].mxu0 }
 0x16d   : > { %5771 = vst [vmem:[#allocation28_spill] sm:$0xff] %v3540_v37  ;;  %v3542_v38 = vpop.f32.mrb[14].mxu0 }
 0x16e   : > { %5772 = vst [vmem:[#allocation29_spill] sm:$0xff] %v3542_v38  ;;  %v3548_v39 = vpop.f32.mrb[15].mxu0 }
 0x16f   : > { %5773 = vst [vmem:[#allocation30_spill] sm:$0xff] %v3548_v39 }
 0x170   : > { %735 = vrot.lane.b32.xlu1 %v3466_v26, %s3184_s17  ;;  %541 = vrot.lane.b32.xlu0 %v3460_v25, %s3181_s23 }
 0x174   : > { %785 = vrot.lane.b32.xlu1 %v3466_v26, %s3185_s26  ;;  %641 = vrot.lane.b32.xlu0 %v3460_v25, %s3182_s25 }
 0x178   : > { %492 = vrot.lane.b32.xlu1 %v3468_v27, %s3179_s10  ;;  %691 = vrot.lane.b32.xlu0 %v3460_v25, %s3183_s16 }
 0x17c   : > { %543 = vrot.lane.b32.xlu1 %v3468_v27, %s3181_s23  ;;  %741 = vrot.lane.b32.xlu0 %v3460_v25, %s3184_s17 }
 0x180   : > { %643 = vrot.lane.b32.xlu1 %v3468_v27, %s3182_s25  ;;  %791 = vrot.lane.b32.xlu0 %v3460_v25, %s3185_s26 }
 0x184   : > { %693 = vrot.lane.b32.xlu1 %v3468_v27, %s3183_s16  ;;  %484 = vrot.lane.b32.xlu0 %v3466_v26, %s3179_s10 }
 0x188   : > { %743 = vrot.lane.b32.xlu1 %v3468_v27, %s3184_s17  ;;  %585 = vrot.lane.b32.xlu0 %v3466_v26, %s3178_s28 }
 0x18c   : > { %793 = vrot.lane.b32.xlu1 %v3468_v27, %s3185_s26  ;;  %835 = vrot.lane.b32.xlu0 %v3466_v26, %s5735_s8 }
 0x190   : > { %486 = vrot.lane.b32.xlu1 %v3474_v28, %s3179_s10  ;;  %593 = vrot.lane.b32.xlu0 %v3468_v27, %s3178_s28 }
 0x194   : > { %787 = vrot.lane.b32.xlu1 %v3474_v28, %s3185_s26  ;;  %843 = vrot.lane.b32.xlu0 %v3468_v27, %s5735_s8 }
 0x198   : > { %595 = vrot.lane.b32.xlu1 %v3480_v29, %s3178_s28  ;;  %537 = vrot.lane.b32.xlu0 %v3474_v28, %s3181_s23 }
 0x19c   : > { %645 = vrot.lane.b32.xlu1 %v3480_v29, %s3182_s25  ;;  %587 = vrot.lane.b32.xlu0 %v3474_v28, %s3178_s28 }
 0x1a0   : > { %695 = vrot.lane.b32.xlu1 %v3480_v29, %s3183_s16  ;;  %637 = vrot.lane.b32.xlu0 %v3474_v28, %s3182_s25 }
 0x1a4   : > { %745 = vrot.lane.b32.xlu1 %v3480_v29, %s3184_s17  ;;  %687 = vrot.lane.b32.xlu0 %v3474_v28, %s3183_s16 }
 0x1a8   : > { %845 = vrot.lane.b32.xlu1 %v3480_v29, %s5735_s8  ;;  %737 = vrot.lane.b32.xlu0 %v3474_v28, %s3184_s17 }
 0x1ac   : > { %488 = vrot.lane.b32.xlu1 %v3482_v30, %s3179_s10  ;;  %837 = vrot.lane.b32.xlu0 %v3474_v28, %s5735_s8 }
 0x1b0   : > { %539 = vrot.lane.b32.xlu1 %v3482_v30, %s3181_s23  ;;  %494 = vrot.lane.b32.xlu0 %v3480_v29, %s3179_s10 }
 0x1b4   : > { %739 = vrot.lane.b32.xlu1 %v3482_v30, %s3184_s17  ;;  %545 = vrot.lane.b32.xlu0 %v3480_v29, %s3181_s23 }
 0x1b8   : > { %496 = vrot.lane.b32.xlu1 %v3484_v31, %s3179_s10  ;;  %795 = vrot.lane.b32.xlu0 %v3480_v29, %s3185_s26 }
 0x1bc   : > { %547 = vrot.lane.b32.xlu1 %v3484_v31, %s3181_s23  ;;  %589 = vrot.lane.b32.xlu0 %v3482_v30, %s3178_s28 }
 0x1c0   : > { %597 = vrot.lane.b32.xlu1 %v3484_v31, %s3178_s28  ;;  %639 = vrot.lane.b32.xlu0 %v3482_v30, %s3182_s25 }
 0x1c4   : > { %647 = vrot.lane.b32.xlu1 %v3484_v31, %s3182_s25  ;;  %689 = vrot.lane.b32.xlu0 %v3482_v30, %s3183_s16 }
 0x1c6   : > { %v3622_v48 = vpop.permute.xlu1 %583  ;;  %v3624_v49 = vpop.permute.xlu0 %482 }
 0x1c8   : > { %697 = vrot.lane.b32.xlu1 %v3484_v31, %s3183_s16  ;;  %789 = vrot.lane.b32.xlu0 %v3482_v30, %s3185_s26 }
 0x1ca   : > { %v3630_v50 = vpop.permute.xlu1 %833  ;;  %v3632_v51 = vpop.permute.xlu0 %533 }
 0x1cc   : > { %797 = vrot.lane.b32.xlu1 %v3484_v31, %s3185_s26  ;;  %839 = vrot.lane.b32.xlu0 %v3482_v30, %s5735_s8 }
 0x1ce   : > { %v3638_v52 = vpop.permute.xlu1 %591  ;;  %v3640_v53 = vpop.permute.xlu0 %633 }
 0x1d0   : > { %847 = vrot.lane.b32.xlu1 %v3484_v31, %s5735_s8  ;;  %747 = vrot.lane.b32.xlu0 %v3484_v31, %s3184_s17 }
 0x1d2   : > { %v3646_v54 = vpop.permute.xlu1 %841  ;;  %v3648_v55 = vpop.permute.xlu0 %683 }
 0x1d4   : > { %1248 = vrot.lane.b32.xlu1 %v3490_v32, %s3178_s28  ;;  %1152 = vrot.lane.b32.xlu0 %v3490_v32, %s3179_s10 }
 0x1d6   : > { %v3654_v56 = vpop.permute.xlu1 %535  ;;  %v3656_v57 = vpop.permute.xlu0 %733 }
 0x1d8   : > { %1392 = vrot.lane.b32.xlu1 %v3490_v32, %s3184_s17  ;;  %1200 = vrot.lane.b32.xlu0 %v3490_v32, %s3181_s23 }
 0x1da   : > { %v3662_v58 = vpop.permute.xlu1 %635  ;;  %v3664_v59 = vpop.permute.xlu0 %783 }
 0x1dc   : > { %1256 = vrot.lane.b32.xlu1 %v3496_v33, %s3178_s28  ;;  %1296 = vrot.lane.b32.xlu0 %v3490_v32, %s3182_s25 }
 0x1de   : > { %v3670_v60 = vpop.permute.xlu1 %685  ;;  %v3672_v61 = vpop.permute.xlu0 %490 }
 0x1e0   : > { %1400 = vrot.lane.b32.xlu1 %v3496_v33, %s3184_s17  ;;  %1344 = vrot.lane.b32.xlu0 %v3490_v32, %s3183_s16 }
 0x1e2   : > { %v3678_v62 = vpop.permute.xlu1 %735  ;;  %v3680_v63 = vpop.permute.xlu0 %541 }
 0x1e3   : > { %5782 = vst [vmem:[#allocation39_spill] sm:$0xff] %v3678_v62 }
 0x1e4   : > { %1154 = vrot.lane.b32.xlu1 %v3498_v34, %s3179_s10  ;;  %1440 = vrot.lane.b32.xlu0 %v3490_v32, %s3185_s26 }
 0x1e6   : > { %v3686_v1 = vpop.permute.xlu1 %785  ;;  %v3688_v2 = vpop.permute.xlu0 %641 }
 0x1e7   : > { %5783 = vst [vmem:[#allocation40_spill] sm:$0xff] %v3686_v1 }
 0x1e8   : > { %1202 = vrot.lane.b32.xlu1 %v3498_v34, %s3181_s23  ;;  %1160 = vrot.lane.b32.xlu0 %v3496_v33, %s3179_s10 }
 0x1ea   : > { %v3694_v3 = vpop.permute.xlu1 %492  ;;  %v3696_v4 = vpop.permute.xlu0 %691 }
 0x1ec   : > { %1298 = vrot.lane.b32.xlu1 %v3498_v34, %s3182_s25  ;;  %1208 = vrot.lane.b32.xlu0 %v3496_v33, %s3181_s23 }
 0x1ee   : > { %v3702_v5 = vpop.permute.xlu1 %543  ;;  %v3704_v6 = vpop.permute.xlu0 %741 }
 0x1f0   : > { %1346 = vrot.lane.b32.xlu1 %v3498_v34, %s3183_s16  ;;  %1304 = vrot.lane.b32.xlu0 %v3496_v33, %s3182_s25 }
 0x1f2   : > { %v3710_v7 = vpop.permute.xlu1 %643  ;;  %v3712_v8 = vpop.permute.xlu0 %791 }
 0x1f4   : > { %1442 = vrot.lane.b32.xlu1 %v3498_v34, %s3185_s26  ;;  %1352 = vrot.lane.b32.xlu0 %v3496_v33, %s3183_s16 }
 0x1f6   : > { %v3718_v9 = vpop.permute.xlu1 %693  ;;  %v3720_v10 = vpop.permute.xlu0 %484 }
 0x1f8   : > { %1162 = vrot.lane.b32.xlu1 %v3500_v35, %s3179_s10  ;;  %1448 = vrot.lane.b32.xlu0 %v3496_v33, %s3185_s26 }
 0x1fa   : > { %v3726_v11 = vpop.permute.xlu1 %743  ;;  %v3728_v12 = vpop.permute.xlu0 %585 }
 0x1fb   : > { %5784 = vst [vmem:[#allocation41_spill] sm:$0xff] %v3726_v11 }
 0x1fc   : > { %1210 = vrot.lane.b32.xlu1 %v3500_v35, %s3181_s23  ;;  %1250 = vrot.lane.b32.xlu0 %v3498_v34, %s3178_s28 }
 0x1fe   : > { %v3734_v14 = vpop.permute.xlu1 %793  ;;  %v3736_v16 = vpop.permute.xlu0 %835 }
 0x1ff   : > { %5785 = vst [vmem:[#allocation42_spill] sm:$0xff] %v3734_v14  ;;  %5786 = vst [vmem:[#allocation43_spill] sm:$0xff] %v3736_v16 }
 0x200   : > { %1306 = vrot.lane.b32.xlu1 %v3500_v35, %s3182_s25  ;;  %1394 = vrot.lane.b32.xlu0 %v3498_v34, %s3184_s17 }
 0x202   : > { %v3742_v17 = vpop.permute.xlu1 %486  ;;  %v3744_v20 = vpop.permute.xlu0 %593 }
 0x204   : > { %1354 = vrot.lane.b32.xlu1 %v3500_v35, %s3183_s16  ;;  %1258 = vrot.lane.b32.xlu0 %v3500_v35, %s3178_s28 }
 0x206   : > { %v3750_v22 = vpop.permute.xlu1 %787  ;;  %v3752_v23 = vpop.permute.xlu0 %843 }
 0x207   : > { %5787 = vst [vmem:[#allocation44_spill] sm:$0xff] %v3750_v22  ;;  %5788 = vst [vmem:[#allocation45_spill] sm:$0xff] %v3752_v23  ;;  %v5823_v23 = vmov 1  }
 0x208   : > { %1450 = vrot.lane.b32.xlu1 %v3500_v35, %s3185_s26  ;;  %1402 = vrot.lane.b32.xlu0 %v3500_v35, %s3184_s17 }
 0x20a   : > { %v3758_v0 = vpop.permute.xlu1 %595  ;;  %v3760_v19 = vpop.permute.xlu0 %537 }
 0x20b   : > { %5789 = vst [vmem:[#allocation46_spill] sm:$0xff] %v3758_v0  ;;  %5790 = vst [vmem:[#allocation47_spill] sm:$0xff] %v3760_v19  ;;  %v609_v19 = vld [vmem:[#allocation9 + $0x200] sm:$0xff] }
 0x20c   : > { %1204 = vrot.lane.b32.xlu1 %v3538_v36, %s3181_s23  ;;  %1156 = vrot.lane.b32.xlu0 %v3538_v36, %s3179_s10 }
 0x20e   : > { %v3766_v46 = vpop.permute.xlu1 %645  ;;  %v3768_v47 = vpop.permute.xlu0 %587 }
 0x20f   : > { %5791 = vst [vmem:[#allocation48_spill] sm:$0xff] %v3766_v46  ;;  %5792 = vst [vmem:[#allocation49_spill] sm:$0xff] %v3768_v47 }
 0x210   : > { %1348 = vrot.lane.b32.xlu1 %v3538_v36, %s3183_s16  ;;  %1252 = vrot.lane.b32.xlu0 %v3538_v36, %s3178_s28 }
 0x212   : > { %v3774_v44 = vpop.permute.xlu1 %695  ;;  %v3776_v45 = vpop.permute.xlu0 %637 }
 0x213   : > { %5793 = vst [vmem:[#allocation50_spill] sm:$0xff] %v3774_v44  ;;  %5794 = vst [vmem:[#allocation51_spill] sm:$0xff] %v3776_v45 }
 0x214   : > { %1444 = vrot.lane.b32.xlu1 %v3538_v36, %s3185_s26  ;;  %1300 = vrot.lane.b32.xlu0 %v3538_v36, %s3182_s25 }
 0x216   : > { %v3782_v41 = vpop.permute.xlu1 %745  ;;  %v3784_v42 = vpop.permute.xlu0 %687 }
 0x217   : > { %5795 = vst [vmem:[#allocation52_spill] sm:$0xff] %v3782_v41  ;;  %5796 = vst [vmem:[#allocation53_spill] sm:$0xff] %v3784_v42 }
 0x218   : > { %1164 = vrot.lane.b32.xlu1 %v3540_v37, %s3179_s10  ;;  %1396 = vrot.lane.b32.xlu0 %v3538_v36, %s3184_s17 }
 0x21a   : > { %v3790_v40 = vpop.permute.xlu1 %845  ;;  %v3792_v22 = vpop.permute.xlu0 %737 }
 0x21b   : > { %5797 = vst [vmem:[#allocation54_spill] sm:$0xff] %v3790_v40  ;;  %5798 = vst [vmem:[#allocation55_spill] sm:$0xff] %v3792_v22 }
 0x21c   : > { %1260 = vrot.lane.b32.xlu1 %v3540_v37, %s3178_s28  ;;  %1212 = vrot.lane.b32.xlu0 %v3540_v37, %s3181_s23 }
 0x21e   : > { %v3798_v44 = vpop.permute.xlu1 %488  ;;  %v3800_v41 = vpop.permute.xlu0 %837 }
 0x21f   : > { %5799 = vst [vmem:[#allocation56_spill] sm:$0xff] %v3798_v44  ;;  %5800 = vst [vmem:[#allocation57_spill] sm:$0xff] %v3800_v41 }
 0x220   : > { %1308 = vrot.lane.b32.xlu1 %v3540_v37, %s3182_s25  ;;  %1356 = vrot.lane.b32.xlu0 %v3540_v37, %s3183_s16 }
 0x222   : > { %v3806_v42 = vpop.permute.xlu1 %539  ;;  %v3808_v40 = vpop.permute.xlu0 %494 }
 0x223   : > { %5801 = vst [vmem:[#allocation58_spill] sm:$0xff] %v3806_v42 }
 0x224   : > { %1404 = vrot.lane.b32.xlu1 %v3540_v37, %s3184_s17  ;;  %1452 = vrot.lane.b32.xlu0 %v3540_v37, %s3185_s26 }
 0x226   : > { %v3814_v22 = vpop.permute.xlu1 %739  ;;  %v3816_v45 = vpop.permute.xlu0 %545 }
 0x227   : > { %5802 = vst [vmem:[#allocation59_spill] sm:$0xff] %v3814_v22 }
 0x228   : > { %1158 = vrot.lane.b32.xlu1 %v3542_v38, %s3179_s10  ;;  %1206 = vrot.lane.b32.xlu0 %v3542_v38, %s3181_s23 }
 0x22a   : > { %v3822_v41 = vpop.permute.xlu1 %496  ;;  %v3824_v42 = vpop.permute.xlu0 %795 }
 0x22b   : > { %5803 = vst [vmem:[#allocation60_spill] sm:$0xff] %v3822_v41  ;;  %5804 = vst [vmem:[#allocation61_spill] sm:$0xff] %v3824_v42 }
 0x22c   : > { %1254 = vrot.lane.b32.xlu1 %v3542_v38, %s3178_s28  ;;  %1350 = vrot.lane.b32.xlu0 %v3542_v38, %s3183_s16 }
 0x22e   : > { %v3830_v46 = vpop.permute.xlu1 %547  ;;  %v3832_v22 = vpop.permute.xlu0 %589 }
 0x22f   : > { %5805 = vst [vmem:[#allocation62_spill] sm:$0xff] %v3830_v46  ;;  %5806 = vst [vmem:[#allocation63_spill] sm:$0xff] %v3832_v22 }
 0x230   : > { %1302 = vrot.lane.b32.xlu1 %v3542_v38, %s3182_s25  ;;  %1166 = vrot.lane.b32.xlu0 %v3548_v39, %s3179_s10 }
 0x232   : > { %v3838_v44 = vpop.permute.xlu1 %597  ;;  %v3840_v41 = vpop.permute.xlu0 %639 }
 0x233   : > { %5807 = vst [vmem:[#allocation64_spill] sm:$0xff] %v3838_v44  ;;  %5808 = vst [vmem:[#allocation65_spill] sm:$0xff] %v3840_v41 }
 0x234   : > { %1398 = vrot.lane.b32.xlu1 %v3542_v38, %s3184_s17  ;;  %1310 = vrot.lane.b32.xlu0 %v3548_v39, %s3182_s25 }
 0x236   : > { %v3846_v42 = vpop.permute.xlu1 %647  ;;  %v3848_v46 = vpop.permute.xlu0 %689 }
 0x237   : > { %5809 = vst [vmem:[#allocation66_spill] sm:$0xff] %v3846_v42  ;;  %5810 = vst [vmem:[#allocation67_spill] sm:$0xff] %v3848_v46 }
 0x238   : > { %1214 = vrot.lane.b32.xlu1 %v3548_v39, %s3181_s23  ;;  %1490 = vrot.lane.b32.xlu0 %v3498_v34, %s5735_s8 }
 0x23a   : > { %v3854_v22 = vpop.permute.xlu1 %697  ;;  %v3856_v44 = vpop.permute.xlu0 %789 }
 0x23b   : > { %5811 = vst [vmem:[#allocation68_spill] sm:$0xff] %v3854_v22  ;;  %5812 = vst [vmem:[#allocation69_spill] sm:$0xff] %v3856_v44 }
 0x23c   : > { %1262 = vrot.lane.b32.xlu1 %v3548_v39, %s3178_s28  ;;  %1498 = vrot.lane.b32.xlu0 %v3500_v35, %s5735_s8 }
 0x23e   : > { %v3862_v41 = vpop.permute.xlu1 %797  ;;  %v3864_v42 = vpop.permute.xlu0 %839 }
 0x23f   : > { %5813 = vst [vmem:[#allocation70_spill] sm:$0xff] %v3862_v41  ;;  %5814 = vst [vmem:[#allocation71_spill] sm:$0xff] %v3864_v42  ;;  %v281_v42 = vld [vmem:[%s5626_s4 + $0x30] sm:$0xff] }
 0x240   : > { %1358 = vrot.lane.b32.xlu1 %v3548_v39, %s3183_s16  ;;  %1406 = vrot.lane.b32.xlu0 %v3548_v39, %s3184_s17 }
 0x242   : > { %v3870_v46 = vpop.permute.xlu1 %847  ;;  %v3872_v22 = vpop.permute.xlu0 %747 }
 0x243   : > { %5815 = vst [vmem:[#allocation72_spill] sm:$0xff] %v3870_v46  ;;  %5816 = vst [vmem:[#allocation73_spill] sm:$0xff] %v3872_v22 }
 0x244   : > { %1488 = vrot.lane.b32.xlu1 %v3490_v32, %s5735_s8  ;;  %1446 = vrot.lane.b32.xlu0 %v3542_v38, %s3185_s26 }
 0x246   : > { %v3878_v44 = vpop.permute.xlu1 %1248  ;;  %v3880_v41 = vpop.permute.xlu0 %1152 }
 0x247   : > { %5817 = vst [vmem:[#allocation74_spill] sm:$0xff] %v3878_v44  ;;  %5818 = vst [vmem:[#allocation75_spill] sm:$0xff] %v3880_v41  ;;  %v282_v44 = vld [vmem:[%s5626_s4 + $0x38] sm:$0xff] }
 0x248   : > { %1496 = vrot.lane.b32.xlu1 %v3496_v33, %s5735_s8  ;;  %1492 = vrot.lane.b32.xlu0 %v3538_v36, %s5735_s8 }
 0x24a   : > { %v3889_v46 = vpop.permute.xlu1 %1392  ;;  %v3891_v22 = vpop.permute.xlu0 %1200 }
 0x24b   : > { %5819 = vst [vmem:[#allocation76_spill] sm:$0xff] %v3889_v46  ;;  %5820 = vst [vmem:[#allocation77_spill] sm:$0xff] %v3891_v22 }
 0x24c   : > { %1548 = vperm.xlu1 %2936, %v281_v42   ;;  %1553 = vperm.xlu0 %2933, %v282_v44  }
 0x24e   : > { %v3896_v41 = vpop.permute.xlu1 %1256  ;;  %v3898_v16 = vpop.permute.xlu0 %1296 }
 0x24f   : > { %5821 = vst [vmem:[#allocation78_spill] sm:$0xff] %v3896_v41  ;;  %5822 = vst [vmem:[#allocation79_spill] sm:$0xff] %v3898_v16 }
 0x250   : > { %1454 = vrot.lane.b32.xlu1 %v3548_v39, %s3185_s26  ;;  %2937 = vset.pattern.permute.xlu0 %v5823_v23 }
 0x251   : > { %2938 = vset.pattern.permute.xlu1 %v5823_v23  ;;  %924 = vperm.xlu0 %2937, %v3410_v13  }
 0x252   : > { %v3905_v46 = vpop.permute.xlu1 %1400  ;;  %v3907_v22 = vpop.permute.xlu0 %1344 }
 0x253   : > { %5824 = vst [vmem:[#allocation80_spill] sm:$0xff] %v3905_v46  ;;  %5825 = vst [vmem:[#allocation81_spill] sm:$0xff] %v3907_v22  ;;  %v498_v46 = vlaneseq }
 0x254   : > { %1500 = vrot.lane.b32.xlu1 %v3540_v37, %s5735_s8 }
 0x255   : > { %928 = vperm.xlu0 %2937, %v3419_v15  }
 0x256   : > { %v3912_v41 = vpop.permute.xlu1 %1154  ;;  %v3914_v16 = vpop.permute.xlu0 %1440 }
 0x257   : > { %5826 = vst [vmem:[#allocation82_spill] sm:$0xff] %v3912_v41  ;;  %5827 = vst [vmem:[#allocation83_spill] sm:$0xff] %v3914_v16  ;;  %v3928_v41 = vand.u32 127, %v498_v46  ;;  %v509_v16 = vld [vmem:[#allocation9] sm:$0xff] }
 0x258   : > { %1573 = vperm.xlu1 %2938, %v3433_v18  }
 0x259   : > { %1577 = vperm.xlu0 %2937, %v3445_v21   ;;  %vm500_vm1 = vcmp.lt.s32.totalorder %v3928_v41, 17  ;;  %vm549_vm2 = vcmp.lt.s32.totalorder %v3928_v41, 16  ;;  %vm599_vm3 = vcmp.lt.s32.totalorder %v3928_v41, 15  ;;  %vm649_vm4 = vcmp.lt.s32.totalorder %v3928_v41, 1 }
 0x25a   : > { %v3918_v23 = vpop.permute.xlu1 %1202  ;;  %v3920_v13 = vpop.permute.xlu0 %1160  ;;  %v501_v46 = vsel %vm500_vm1, %v3624_v49, %v3672_v61  ;;  %vm699_vm5 = vcmp.lt.s32.totalorder %v3928_v41, 127  ;;  %vm749_vm6 = vcmp.lt.s32.totalorder %v3928_v41, 113  ;;  %vm799_vm7 = vcmp.lt.s32.totalorder %v3928_v41, 112 }
 0x25b   : > { %5828 = vst [vmem:[#allocation84_spill] sm:$0xff] %v3918_v23  ;;  %5829 = vst [vmem:[#allocation85_spill] sm:$0xff] %v3920_v13  ;;  %v466_v23 = vld [vmem:[#allocation9 + $0x400] sm:$0xff]  ;;  %vm849_vm8 = vcmp.lt.s32.totalorder %v3928_v41, 111 }
 0x25c   : > { %1494 = vrot.lane.b32.xlu1 %v3542_v38, %s5735_s8  ;;  %v560_v38 = vld [vmem:[#allocation9 + $0x108] sm:$0xff] }
 0x25d   : > { %1581 = vperm.xlu0 %2937, %v281_v42   ;;  %v510_v42 = vld [vmem:[#allocation9 + $0x8] sm:$0xff] }
 0x25e   : > { %v3924_v22 = vpop.permute.xlu1 %1298  ;;  %v3926_v15 = vpop.permute.xlu0 %1208 }
 0x25f   : > { %5830 = vst [vmem:[#allocation86_spill] sm:$0xff] %v3924_v22  ;;  %5831 = vst [vmem:[#allocation87_spill] sm:$0xff] %v3926_v15  ;;  %v505_v22 = vsel %vm500_vm1, %v3672_v61, %v3624_v49  ;;  %v554_v15 = vsel %vm549_vm2, %v3680_v63, %v3632_v51  ;;  %v518_v49 = vmul.f32 %v510_v42, %v501_v46  ;;  %v710_v46 = vld [vmem:[#allocation9 + $0x508] sm:$0xff] }
 0x260   : > { %1502 = vrot.lane.b32.xlu1 %v3548_v39, %s5735_s8  ;;  %v517_v47 = vmul.f32 %v509_v16, %v505_v22  ;;  %v474_v61 = vmul.f32 %v466_v23, %v3458_v24  ;;  %v604_v16 = vsel %vm599_vm3, %v3638_v52, %v3622_v48  ;;  %v650_v42 = vsel %vm649_vm4, %v3640_v53, %v3688_v2 }
 0x262   : > { %v3933_v18 = vpop.permute.xlu1 %1346  ;;  %v3935_v21 = vpop.permute.xlu0 %1304  ;;  %v525_v62 = vadd.f32 %v517_v47, %v474_v61  ;;  %v617_v47 = vmul.f32 %v609_v19, %v604_v16  ;;  %v760_v61 = vld [vmem:[#allocation9 + $0x608] sm:$0xff] }
 0x263   : > { %5832 = vst [vmem:[#allocation88_spill] sm:$0xff] %v3933_v18  ;;  %5833 = vst [vmem:[#allocation89_spill] sm:$0xff] %v3935_v21  ;;  %v467_v18 = vld [vmem:[#allocation9 + $0x408] sm:$0xff]  ;;  %v559_v21 = vld [vmem:[#allocation9 + $0x100] sm:$0xff] }
 0x264   : > { %1585 = vperm.xlu1 %2938, %v282_v44   ;;  %v550_v44 = vsel %vm549_vm2, %v3632_v51, %v3680_v63  ;;  %v567_v0 = vmul.f32 %v559_v21, %v554_v15  ;;  %v610_v51 = vld [vmem:[#allocation9 + $0x208] sm:$0xff]  ;;  %v600_v63 = vsel %vm599_vm3, %v3622_v48, %v3638_v52 }
 0x265   : > { %v568_v1 = vmul.f32 %v560_v38, %v550_v44  ;;  %v618_v15 = vmul.f32 %v610_v51, %v600_v63  ;;  %v660_v21 = vld [vmem:[#allocation9 + $0x308] sm:$0xff]  ;;  %v700_v44 = vsel %vm699_vm5, %v3648_v55, %v3696_v4  ;;  %v750_v51 = vsel %vm749_vm6, %v3656_v57, %v3704_v6 }
 0x266   : > { %v3946_v39 = vpop.permute.xlu1 %1442  ;;  %v3956_v13 = vpop.permute.xlu0 %1352  ;;  %v575_v38 = vadd.f32 %v567_v0, %v525_v62  ;;  %v654_v0 = vsel %vm649_vm4, %v3688_v2, %v3640_v53  ;;  %v704_v53 = vsel %vm699_vm5, %v3696_v4, %v3648_v55  ;;  %v754_v63 = vsel %vm749_vm6, %v3704_v6, %v3656_v57  ;;  %v469_v55 = vld [vmem:[#allocation9 + $0x418] sm:$0xff]  ;;  %v470_v6 = vld [vmem:[#allocation9 + $0x420] sm:$0xff] }
 0x267   : > { %5834 = vst [vmem:[#allocation90_spill] sm:$0xff] %v3946_v39  ;;  %v475_v39 = vmul.f32 %v467_v18, %v3460_v25  ;;  %v659_v18 = vld [vmem:[#allocation9 + $0x300] sm:$0xff]  ;;  %v804_v57 = vsel %vm799_vm7, %v3712_v8, %v3664_v59 }
 0x268   : > { %v625_v48 = vadd.f32 %v617_v47, %v575_v38  ;;  %v667_v19 = vmul.f32 %v659_v18, %v654_v0  ;;  %v718_v38 = vmul.f32 %v710_v46, %v704_v53  ;;  %v809_v18 = vld [vmem:[#allocation9 + $0x700] sm:$0xff]  ;;  %v768_v46 = vmul.f32 %v760_v61, %v754_v63  ;;  %v472_v53 = vld [vmem:[#allocation9 + $0x430] sm:$0xff] }
 0x269   : > { %v526_v11 = vadd.f32 %v518_v49, %v475_v39  ;;  %v759_v49 = vld [vmem:[#allocation9 + $0x600] sm:$0xff] }
 0x26a   : > { %v3961_v14 = vpop.permute.xlu1 %1162  ;;  %v3963_v43 = vpop.permute.xlu0 %1448  ;;  %v675_v47 = vadd.f32 %v667_v19, %v625_v48  ;;  %v512_v48 = vld [vmem:[#allocation9 + $0x18] sm:$0xff]  ;;  %v506_v19 = vsel %vm500_vm1, %v3694_v3, %v3720_v10 }
 0x26b   : > { %5835 = vst [vmem:[#allocation91_spill] sm:$0xff] %v3963_v43  ;;  %v576_v22 = vadd.f32 %v568_v1, %v526_v11  ;;  %v668_v1 = vmul.f32 %v660_v21, %v650_v42  ;;  %v709_v11 = vld [vmem:[#allocation9 + $0x500] sm:$0xff]  ;;  %v810_v21 = vld [vmem:[#allocation9 + $0x708] sm:$0xff]  ;;  %v800_v42 = vsel %vm799_vm7, %v3664_v59, %v3712_v8  ;;  %v477_v8 = vmul.f32 %v469_v55, %v3468_v27 }
 0x26c   : > { %v717_v16 = vmul.f32 %v709_v11, %v700_v44  ;;  %v767_v11 = vmul.f32 %v759_v49, %v750_v51  ;;  %v511_v44 = vld [vmem:[#allocation9 + $0x10] sm:$0xff]  ;;  %v473_v49 = vld [vmem:[#allocation9 + $0x438] sm:$0xff]  ;;  %v817_v63 = vmul.f32 %v809_v18, %v800_v42  ;;  %v818_v25 = vmul.f32 %v810_v21, %v804_v57  ;;  %v860_v55 = vld [vmem:[#allocation9 + $0x808] sm:$0xff] }
 0x26d   : > { %v626_v52 = vadd.f32 %v618_v15, %v576_v22  ;;  %v468_v22 = vld [vmem:[#allocation9 + $0x410] sm:$0xff]  ;;  %v850_v18 = vsel %vm849_vm8, %v3630_v50, %v3646_v54  ;;  %v854_v21 = vsel %vm849_vm8, %v3646_v54, %v3630_v50  ;;  %v551_v57 = vsel %vm549_vm2, %v3654_v56, %v3702_v5 }
 0x26e   : > { %v3974_v23 = vpop.permute.xlu1 %1210  ;;  %v3977_v39 = vpop.permute.xlu0 %1250  ;;  %v476_v59 = vmul.f32 %v468_v22, %v3466_v26  ;;  %v725_v61 = vadd.f32 %v717_v16, %v675_v47  ;;  %v4043_v16 = vmul.f32 %v472_v53, %v3482_v30  ;;  %v1136_v47 = vld [vmem:[#allocation9 + $0x440] sm:$0xff]  ;;  %v561_v42 = vld [vmem:[#allocation9 + $0x110] sm:$0xff]  ;;  %v601_v50 = vsel %vm599_vm3, %v3728_v12, %v3744_v20 }
 0x26f   : > { %v676_v15 = vadd.f32 %v668_v1, %v626_v52  ;;  %v502_v52 = vsel %vm500_vm1, %v3720_v10, %v3694_v3  ;;  %v471_v1 = vld [vmem:[#allocation9 + $0x428] sm:$0xff]  ;;  %v4035_v3 = vmul.f32 %v470_v6, %v3474_v28  ;;  %v555_v6 = vsel %vm549_vm2, %v3702_v5, %v3654_v56 }
 0x270   : > { %v520_v43 = vmul.f32 %v512_v48, %v502_v52  ;;  %v4038_v10 = vmul.f32 %v471_v1, %v3480_v29  ;;  %v775_v27 = vadd.f32 %v767_v11, %v725_v61  ;;  %v1138_v11 = vld [vmem:[#allocation9 + $0x450] sm:$0xff]  ;;  %v612_v1 = vld [vmem:[#allocation9 + $0x218] sm:$0xff]  ;;  %v605_v54 = vsel %vm599_vm3, %v3744_v20, %v3728_v12 }
 0x271   : > { %v726_v51 = vadd.f32 %v718_v38, %v676_v15  ;;  %v4046_v38 = vmul.f32 %v473_v49, %v3484_v31  ;;  %v1137_v15 = vld [vmem:[#allocation9 + $0x448] sm:$0xff]  ;;  %v4075_v49 = vmul.f32 %v1136_v47, %v3490_v32  ;;  %v868_v61 = vmul.f32 %v860_v55, %v854_v21  ;;  %v661_v47 = vld [vmem:[#allocation9 + $0x310] sm:$0xff]  ;;  %v566_v31 = vld [vmem:[#allocation9 + $0x138] sm:$0xff] }
 0x272   : > { %v3988_v62 = vpop.permute.xlu1 %1306  ;;  %v3998_v2 = vpop.permute.xlu0 %1394  ;;  %v825_v48 = vadd.f32 %v817_v63, %v775_v27  ;;  %v528_v5 = vadd.f32 %v520_v43, %v477_v8  ;;  %v569_v12 = vmul.f32 %v561_v42, %v555_v6  ;;  %v620_v43 = vmul.f32 %v612_v1, %v601_v50  ;;  %v1141_v8 = vld [vmem:[#allocation9 + $0x468] sm:$0xff]  ;;  %v662_v42 = vld [vmem:[#allocation9 + $0x318] sm:$0xff] }
 0x273   : > { %5836 = vst [vmem:[#allocation92_spill] sm:$0xff] %v3998_v2  ;;  %v859_v2 = vld [vmem:[#allocation9 + $0x800] sm:$0xff]  ;;  %v776_v26 = vadd.f32 %v768_v46, %v726_v51  ;;  %v1139_v46 = vld [vmem:[#allocation9 + $0x458] sm:$0xff]  ;;  %v4083_v51 = vmul.f32 %v1138_v11, %v3498_v34  ;;  %v4120_v50 = vmul.f32 %v1141_v8, %v3540_v37  ;;  %v565_v34 = vld [vmem:[#allocation9 + $0x130] sm:$0xff] }
 0x274   : > { %v867_v27 = vmul.f32 %v859_v2, %v850_v18  ;;  %v4086_v63 = vmul.f32 %v1139_v46, %v3500_v35  ;;  %v655_v2 = vsel %vm649_vm4, %v3710_v7, %v3662_v58  ;;  %v513_v11 = vld [vmem:[#allocation9 + $0x20] sm:$0xff]  ;;  %v514_v46 = vld [vmem:[#allocation9 + $0x28] sm:$0xff]  ;;  %v5862_v29 = vld [vmem:[#allocation62_spill] sm:$0xff] }
 0x275   : > { %v826_v52 = vadd.f32 %v818_v25, %v776_v26  ;;  %v4078_v25 = vmul.f32 %v1137_v15, %v3496_v33  ;;  %v651_v15 = vsel %vm649_vm4, %v3662_v58, %v3710_v7  ;;  %v711_v7 = vld [vmem:[#allocation9 + $0x510] sm:$0xff] }
 0x276   : > { %v4009_v4 = vpop.permute.xlu1 %1354  ;;  %v4019_v0 = vpop.permute.xlu0 %1258  ;;  %v875_v55 = vadd.f32 %v867_v27, %v825_v48  ;;  %v701_v48 = vsel %vm699_vm5, %v3670_v60, %v3718_v9  ;;  %v5842_v27 = vld [vmem:[#allocation47_spill] sm:$0xff] }
 0x277   : > { %5837 = vst [vmem:[#allocation93_spill] sm:$0xff] %v4009_v4  ;;  %v519_v4 = vmul.f32 %v511_v44, %v506_v19  ;;  %v562_v44 = vld [vmem:[#allocation9 + $0x118] sm:$0xff]  ;;  %v611_v19 = vld [vmem:[#allocation9 + $0x210] sm:$0xff]  ;;  %v876_v18 = vadd.f32 %v868_v61, %v826_v52  ;;  %v705_v52 = vsel %vm699_vm5, %v3718_v9, %v3670_v60  ;;  %v552_v61 = vsel %vm549_vm2, %v5842_v27, %v3816_v45 }
 0x278   : > { %v570_v20 = vmul.f32 %v562_v44, %v551_v57  ;;  %v503_v44 = vsel %vm500_vm1, %v3742_v17, %v3808_v40  ;;  %v556_v60 = vsel %vm549_vm2, %v3816_v45, %v5842_v27  ;;  %v669_v9 = vmul.f32 %v661_v47, %v655_v2  ;;  %v5847_v45 = vld [vmem:[#allocation34_spill] sm:$0xff] }
 0x279   : > { %v527_v56 = vadd.f32 %v519_v4, %v476_v59  ;;  %v619_v4 = vmul.f32 %v611_v19, %v605_v54  ;;  %v1140_v59 = vld [vmem:[#allocation9 + $0x460] sm:$0xff]  ;;  %v507_v19 = vsel %vm500_vm1, %v3808_v40, %v3742_v17  ;;  %v712_v40 = vld [vmem:[#allocation9 + $0x518] sm:$0xff]  ;;  %v4143_v47 = vadd.f32 %v5847_v45, %v875_v55 }
 0x27a   : > { %v4032_v24 = vpop.permute.xlu1 %1450  ;;  %v4040_v22 = vpop.permute.xlu0 %1402  ;;  %v578_v6 = vadd.f32 %v570_v20, %v528_v5  ;;  %v4117_v1 = vmul.f32 %v1140_v59, %v3538_v36  ;;  %v564_v5 = vld [vmem:[#allocation9 + $0x128] sm:$0xff]  ;;  %v521_v20 = vmul.f32 %v513_v11, %v507_v19  ;;  %v522_v59 = vmul.f32 %v514_v46, %v503_v44  ;;  %v811_v44 = vld [vmem:[#allocation9 + $0x710] sm:$0xff]  ;;  %v812_v19 = vld [vmem:[#allocation9 + $0x718] sm:$0xff] }
 0x27b   : > { %5838 = vst [vmem:[#allocation94_spill] sm:$0xff] %v4032_v24  ;;  %5839 = vst [vmem:[#allocation95_spill] sm:$0xff] %v4040_v22  ;;  %v577_v57 = vadd.f32 %v569_v12, %v527_v56  ;;  %v563_v56 = vld [vmem:[#allocation9 + $0x120] sm:$0xff]  ;;  %v670_v12 = vmul.f32 %v662_v42, %v651_v15  ;;  %v4146_v15 = vadd.f32 %v5847_v45, %v876_v18  ;;  %v5848_v27 = vld [vmem:[#allocation42_spill] sm:$0xff] }
 0x27c   : > { %v628_v54 = vadd.f32 %v620_v43, %v578_v6  ;;  %v762_v43 = vld [vmem:[#allocation9 + $0x618] sm:$0xff]  ;;  %v5845_v6 = vld [vmem:[#allocation39_spill] sm:$0xff]  ;;  %v719_v2 = vmul.f32 %v711_v7, %v701_v48  ;;  %v720_v42 = vmul.f32 %v712_v40, %v705_v52  ;;  %v571_v11 = vmul.f32 %v563_v56, %v556_v60  ;;  %v5849_v36 = vld [vmem:[#allocation40_spill] sm:$0xff] }
 0x27d   : > { %v627_v17 = vadd.f32 %v619_v4, %v577_v57  ;;  %v761_v4 = vld [vmem:[#allocation9 + $0x610] sm:$0xff]  ;;  %v572_v46 = vmul.f32 %v564_v5, %v552_v61  ;;  %v801_v32 = vsel %vm799_vm7, %v5849_v36, %v5848_v27  ;;  %v805_v55 = vsel %vm799_vm7, %v5848_v27, %v5849_v36  ;;  %v613_v40 = vld [vmem:[#allocation9 + $0x220] sm:$0xff]  ;;  %v614_v56 = vld [vmem:[#allocation9 + $0x228] sm:$0xff] }
 0x27e   : > { %v4072_v53 = vpop.permute.xlu1 %1204  ;;  %v4080_v26 = vpop.permute.xlu0 %1156  ;;  %v5844_v57 = vld [vmem:[#allocation41_spill] sm:$0xff]  ;;  %v529_v7 = vadd.f32 %v521_v20, %v4035_v3  ;;  %v530_v48 = vadd.f32 %v522_v59, %v4038_v10  ;;  %v5850_v5 = vld [vmem:[#allocation46_spill] sm:$0xff]  ;;  %v4172_v10 = vmul.f32 %v811_v44, %v801_v32 }
 0x27f   : > { %v751_v37 = vsel %vm749_vm6, %v5845_v6, %v5844_v57  ;;  %v755_v33 = vsel %vm749_vm6, %v5844_v57, %v5845_v6  ;;  %v677_v57 = vadd.f32 %v669_v9, %v627_v17  ;;  %v678_v6 = vadd.f32 %v670_v12, %v628_v54  ;;  %v5851_v61 = vld [vmem:[#allocation49_spill] sm:$0xff] }
 0x280   : > { %v769_v18 = vmul.f32 %v761_v4, %v751_v37  ;;  %v770_v45 = vmul.f32 %v762_v43, %v755_v33  ;;  %v602_v60 = vsel %vm599_vm3, %v5851_v61, %v5850_v5  ;;  %v606_v36 = vsel %vm599_vm3, %v5850_v5, %v5851_v61  ;;  %v5853_v59 = vld [vmem:[#allocation45_spill] sm:$0xff]  ;;  %v5854_v4 = vld [vmem:[#allocation43_spill] sm:$0xff] }
 0x281   : > { %v4174_v17 = vmul.f32 %v812_v19, %v805_v55  ;;  %v579_v54 = vadd.f32 %v571_v11, %v529_v7  ;;  %v580_v9 = vadd.f32 %v572_v46, %v530_v48  ;;  %v727_v12 = vadd.f32 %v719_v2, %v677_v57  ;;  %v515_v19 = vld [vmem:[#allocation9 + $0x30] sm:$0xff]  ;;  %v516_v55 = vld [vmem:[#allocation9 + $0x38] sm:$0xff]  ;;  %v5855_v11 = vld [vmem:[#allocation60_spill] sm:$0xff] }
 0x282   : > { %v4096_v21 = vpop.permute.xlu1 %1348  ;;  %v4106_v58 = vpop.permute.xlu0 %1252  ;;  %v728_v20 = vadd.f32 %v720_v42, %v678_v6  ;;  %v4180_v43 = vsel %vm849_vm8, %v5854_v4, %v5853_v59  ;;  %v4186_v27 = vsel %vm849_vm8, %v5853_v59, %v5854_v4  ;;  %v621_v32 = vmul.f32 %v613_v40, %v606_v36  ;;  %v5856_v46 = vld [vmem:[#allocation56_spill] sm:$0xff]  ;;  %v663_v6 = vld [vmem:[#allocation9 + $0x320] sm:$0xff]  ;;  %v5861_v36 = vld [vmem:[#allocation53_spill] sm:$0xff] }
 0x283   : > { %5840 = vst [vmem:[#allocation96_spill] sm:$0xff] %v4096_v21  ;;  %5841 = vst [vmem:[#allocation97_spill] sm:$0xff] %v4106_v58  ;;  %v622_v44 = vmul.f32 %v614_v56, %v602_v60  ;;  %v504_v2 = vsel %vm500_vm1, %v5856_v46, %v5855_v11  ;;  %v508_v42 = vsel %vm500_vm1, %v5855_v11, %v5856_v46  ;;  %v664_v7 = vld [vmem:[#allocation9 + $0x328] sm:$0xff]  ;;  %v5859_v5 = vld [vmem:[#allocation51_spill] sm:$0xff] }
 0x284   : > { %v5858_v48 = vld [vmem:[#allocation48_spill] sm:$0xff]  ;;  %v713_v61 = vld [vmem:[#allocation9 + $0x520] sm:$0xff]  ;;  %v5860_v60 = vld [vmem:[#allocation50_spill] sm:$0xff]  ;;  %v629_v3 = vadd.f32 %v621_v32, %v579_v54  ;;  %v4224_v28 = vadd.f32 %v769_v18, %v727_v12 }
 0x285   : > { %v652_v40 = vsel %vm649_vm4, %v5859_v5, %v5858_v48  ;;  %v656_v56 = vsel %vm649_vm4, %v5858_v48, %v5859_v5  ;;  %v702_v59 = vsel %vm699_vm5, %v5861_v36, %v5860_v60  ;;  %v706_v4 = vsel %vm699_vm5, %v5860_v60, %v5861_v36  ;;  %v714_v46 = vld [vmem:[#allocation9 + $0x528] sm:$0xff]  ;;  %v5863_v48 = vld [vmem:[#allocation58_spill] sm:$0xff]  ;;  %v615_v32 = vld [vmem:[#allocation9 + $0x230] sm:$0xff] }
 0x286   : > { %v4130_v8 = vpop.permute.xlu1 %1444  ;;  %v4140_v35 = vpop.permute.xlu0 %1300  ;;  %v630_v33 = vadd.f32 %v622_v44, %v580_v9  ;;  %v553_v5 = vsel %vm549_vm2, %v5863_v48, %v5862_v29  ;;  %v557_v30 = vsel %vm549_vm2, %v5862_v29, %v5863_v48  ;;  %v4226_v60 = vadd.f32 %v770_v45, %v728_v20  ;;  %v616_v44 = vld [vmem:[#allocation9 + $0x238] sm:$0xff]  ;;  %v5865_v21 = vld [vmem:[#allocation63_spill] sm:$0xff] }
 0x287   : > { %5843 = vst [vmem:[#allocation47_spill] sm:$0xff] %v4130_v8  ;;  %5846 = vst [vmem:[#allocation41_spill] sm:$0xff] %v4140_v35  ;;  %v523_v36 = vmul.f32 %v515_v19, %v508_v42  ;;  %v524_v8 = vmul.f32 %v516_v55, %v504_v2  ;;  %v671_v54 = vmul.f32 %v663_v6, %v656_v56  ;;  %v665_v6 = vld [vmem:[#allocation9 + $0x330] sm:$0xff] }
 0x288   : > { %v672_v9 = vmul.f32 %v664_v7, %v652_v40  ;;  %v721_v45 = vmul.f32 %v713_v61, %v702_v59  ;;  %v722_v12 = vmul.f32 %v714_v46, %v706_v4  ;;  %v573_v20 = vmul.f32 %v565_v34, %v557_v30  ;;  %v666_v7 = vld [vmem:[#allocation9 + $0x338] sm:$0xff]  ;;  %v5869_v56 = vld [vmem:[#allocation65_spill] sm:$0xff] }
 0x289   : > { %v574_v19 = vmul.f32 %v566_v31, %v553_v5  ;;  %v679_v2 = vadd.f32 %v671_v54, %v629_v3  ;;  %v5868_v40 = vld [vmem:[#allocation66_spill] sm:$0xff]  ;;  %v532_v30 = vadd.f32 %v524_v8, %v4046_v38  ;;  %v5870_v3 = vld [vmem:[#allocation52_spill] sm:$0xff]  ;;  %v715_v4 = vld [vmem:[#allocation9 + $0x530] sm:$0xff] }
 0x28a   : > { %v4158_v52 = vpop.permute.xlu1 %1164  ;;  %v4168_v37 = vpop.permute.xlu0 %1396  ;;  %v680_v42 = vadd.f32 %v672_v9, %v630_v33  ;;  %v653_v48 = vsel %vm649_vm4, %v5869_v56, %v5868_v40  ;;  %v5871_v33 = vld [vmem:[#allocation55_spill] sm:$0xff]  ;;  %v716_v46 = vld [vmem:[#allocation9 + $0x538] sm:$0xff]  ;;  %v5872_v5 = vld [vmem:[#allocation68_spill] sm:$0xff] }
 0x28b   : > { %5852 = vst [vmem:[#allocation39_spill] sm:$0xff] %v4168_v37  ;;  %v5864_v37 = vld [vmem:[#allocation64_spill] sm:$0xff]  ;;  %v752_v61 = vsel %vm749_vm6, %v5871_v33, %v5870_v3  ;;  %v756_v59 = vsel %vm749_vm6, %v5870_v3, %v5871_v33  ;;  %v5873_v54 = vld [vmem:[#allocation67_spill] sm:$0xff]  ;;  %v765_v33 = vld [vmem:[#allocation9 + $0x630] sm:$0xff] }
 0x28c   : > { %v603_v22 = vsel %vm599_vm3, %v5865_v21, %v5864_v37  ;;  %v607_v29 = vsel %vm599_vm3, %v5864_v37, %v5865_v21  ;;  %v657_v21 = vsel %vm649_vm4, %v5868_v40, %v5869_v56  ;;  %v531_v37 = vadd.f32 %v523_v36, %v4043_v16  ;;  %v763_v8 = vld [vmem:[#allocation9 + $0x620] sm:$0xff]  ;;  %v764_v36 = vld [vmem:[#allocation9 + $0x628] sm:$0xff]  ;;  %v5876_v35 = vld [vmem:[#allocation73_spill] sm:$0xff] }
 0x28d   : > { %v623_v31 = vmul.f32 %v615_v32, %v607_v29  ;;  %v624_v34 = vmul.f32 %v616_v44, %v603_v22  ;;  %v703_v16 = vsel %vm699_vm5, %v5873_v54, %v5872_v5  ;;  %v707_v22 = vsel %vm699_vm5, %v5872_v5, %v5873_v54 }
 0x28e   : > { %v4196_v57 = vpop.permute.xlu1 %1260  ;;  %v4214_v11 = vpop.permute.xlu0 %1212  ;;  %v581_v9 = vadd.f32 %v573_v20, %v531_v37  ;;  %v582_v32 = vadd.f32 %v574_v19, %v532_v30  ;;  %v673_v44 = vmul.f32 %v665_v6, %v657_v21  ;;  %v674_v29 = vmul.f32 %v666_v7, %v653_v48  ;;  %v861_v20 = vld [vmem:[#allocation9 + $0x810] sm:$0xff]  ;;  %v862_v19 = vld [vmem:[#allocation9 + $0x818] sm:$0xff] }
 0x28f   : > { %5857 = vst [vmem:[#allocation34_spill] sm:$0xff] %v4196_v57  ;;  %v729_v56 = vadd.f32 %v721_v45, %v679_v2  ;;  %v730_v3 = vadd.f32 %v722_v12, %v680_v42  ;;  %v723_v48 = vmul.f32 %v715_v4, %v703_v16  ;;  %v724_v21 = vmul.f32 %v716_v46, %v707_v22  ;;  %v5878_v2 = vld [vmem:[#allocation61_spill] sm:$0xff]  ;;  %v5879_v42 = vld [vmem:[#allocation44_spill] sm:$0xff] }
 0x290   : > { %v631_v6 = vadd.f32 %v623_v31, %v581_v9  ;;  %v632_v7 = vadd.f32 %v624_v34, %v582_v32  ;;  %v771_v45 = vmul.f32 %v763_v8, %v752_v61  ;;  %v772_v12 = vmul.f32 %v764_v36, %v756_v59 }
 0x291   : > { %v802_v37 = vsel %vm799_vm7, %v5879_v42, %v5878_v2  ;;  %v806_v30 = vsel %vm799_vm7, %v5878_v2, %v5879_v42  ;;  %v869_v59 = vmul.f32 %v861_v20, %v4180_v43  ;;  %v870_v16 = vmul.f32 %v862_v19, %v4186_v27  ;;  %v5886_v20 = vld [vmem:[#allocation75_spill] sm:$0xff] }
 0x292   : > { %v4236_v18 = vpop.permute.xlu1 %1308  ;;  %v4238_v55 = vpop.permute.xlu0 %1356  ;;  %v681_v31 = vadd.f32 %v673_v44, %v631_v6  ;;  %v682_v34 = vadd.f32 %v674_v29, %v632_v7  ;;  %v779_v22 = vadd.f32 %v771_v45, %v729_v56  ;;  %v780_v8 = vadd.f32 %v772_v12, %v730_v3  ;;  %v1177_v56 = vld [vmem:[#allocation9 + $0x48] sm:$0xff]  ;;  %v5885_v3 = vld [vmem:[#allocation85_spill] sm:$0xff]  ;;  %v5888_v45 = vld [vmem:[#allocation54_spill] sm:$0xff] }
 0x293   : > { %5866 = vst [vmem:[#allocation42_spill] sm:$0xff] %v4236_v18  ;;  %5867 = vst [vmem:[#allocation40_spill] sm:$0xff] %v4238_v55  ;;  %v766_v55 = vld [vmem:[#allocation9 + $0x638] sm:$0xff]  ;;  %v5877_v18 = vld [vmem:[#allocation59_spill] sm:$0xff]  ;;  %v827_v36 = vadd.f32 %v4172_v10, %v4224_v28  ;;  %v828_v9 = vadd.f32 %v4174_v17, %v4226_v60  ;;  %v1168_v19 = vsel %vm500_vm1, %v5886_v20, %v5885_v3 }
 0x294   : > { %v753_v24 = vsel %vm749_vm6, %v5877_v18, %v5876_v35  ;;  %v757_v5 = vsel %vm749_vm6, %v5876_v35, %v5877_v18  ;;  %v813_v35 = vld [vmem:[#allocation9 + $0x720] sm:$0xff]  ;;  %v814_v18 = vld [vmem:[#allocation9 + $0x728] sm:$0xff]  ;;  %v731_v32 = vadd.f32 %v723_v48, %v681_v31  ;;  %v732_v2 = vadd.f32 %v724_v21, %v682_v34  ;;  %v5889_v12 = vld [vmem:[#allocation57_spill] sm:$0xff] }
 0x295   : > { %v773_v4 = vmul.f32 %v765_v33, %v753_v24  ;;  %v774_v46 = vmul.f32 %v766_v55, %v757_v5  ;;  %v821_v44 = vmul.f32 %v813_v35, %v802_v37  ;;  %v822_v29 = vmul.f32 %v814_v18, %v806_v30  ;;  %v815_v24 = vld [vmem:[#allocation9 + $0x730] sm:$0xff]  ;;  %v816_v55 = vld [vmem:[#allocation9 + $0x738] sm:$0xff]  ;;  %v1176_v60 = vld [vmem:[#allocation9 + $0x40] sm:$0xff] }
 0x296   : > { %v4266_v38 = vpop.permute.xlu1 %1404  ;;  %v4268_v40 = vpop.permute.xlu0 %1452  ;;  %v5882_v33 = vld [vmem:[#allocation70_spill] sm:$0xff]  ;;  %v5883_v5 = vld [vmem:[#allocation69_spill] sm:$0xff]  ;;  %v1172_v6 = vsel %vm500_vm1, %v5885_v3, %v5886_v20  ;;  %v863_v48 = vld [vmem:[#allocation9 + $0x820] sm:$0xff]  ;;  %v852_v42 = vsel %vm849_vm8, %v5889_v12, %v5888_v45  ;;  %v856_v37 = vsel %vm849_vm8, %v5888_v45, %v5889_v12 }
 0x297   : > { %5874 = vst [vmem:[#allocation46_spill] sm:$0xff] %v4266_v38  ;;  %5875 = vst [vmem:[#allocation49_spill] sm:$0xff] %v4268_v40  ;;  %v803_v43 = vsel %vm799_vm7, %v5883_v5, %v5882_v33  ;;  %v807_v27 = vsel %vm799_vm7, %v5882_v33, %v5883_v5  ;;  %v781_v10 = vadd.f32 %v773_v4, %v731_v32  ;;  %v864_v21 = vld [vmem:[#allocation9 + $0x828] sm:$0xff]  ;;  %v1224_v34 = vld [vmem:[#allocation9 + $0x140] sm:$0xff] }
 0x298   : > { %v782_v17 = vadd.f32 %v774_v46, %v732_v2  ;;  %v829_v30 = vadd.f32 %v821_v44, %v779_v22  ;;  %v830_v35 = vadd.f32 %v822_v29, %v780_v8  ;;  %v823_v18 = vmul.f32 %v815_v24, %v803_v43  ;;  %v1225_v4 = vld [vmem:[#allocation9 + $0x148] sm:$0xff]  ;;  %v5890_v46 = vld [vmem:[#allocation87_spill] sm:$0xff]  ;;  %v5891_v32 = vld [vmem:[#allocation77_spill] sm:$0xff] }
 0x299   : > { %v824_v31 = vmul.f32 %v816_v55, %v807_v27  ;;  %v1216_v2 = vsel %vm549_vm2, %v5891_v32, %v5890_v46  ;;  %v1220_v33 = vsel %vm549_vm2, %v5890_v46, %v5891_v32  ;;  %v865_v5 = vld [vmem:[#allocation9 + $0x830] sm:$0xff]  ;;  %v866_v3 = vld [vmem:[#allocation9 + $0x838] sm:$0xff]  ;;  %v5892_v20 = vld [vmem:[#allocation72_spill] sm:$0xff]  ;;  %v1184_v44 = vmul.f32 %v1176_v60, %v1172_v6 }
 0x29a   : > { %v4286_v54 = vpop.permute.xlu1 %1158  ;;  %v4288_v61 = vpop.permute.xlu0 %1206  ;;  %v5893_v45 = vld [vmem:[#allocation71_spill] sm:$0xff]  ;;  %v1185_v29 = vmul.f32 %v1177_v56, %v1168_v19  ;;  %v871_v55 = vmul.f32 %v863_v48, %v852_v42  ;;  %v872_v43 = vmul.f32 %v864_v21, %v856_v37  ;;  %v831_v27 = vadd.f32 %v823_v18, %v781_v10  ;;  %v1142_v46 = vld [vmem:[#allocation9 + $0x470] sm:$0xff]  ;;  %v1143_v32 = vld [vmem:[#allocation9 + $0x478] sm:$0xff] }
 0x29b   : > { %5880 = vst [vmem:[#allocation45_spill] sm:$0xff] %v4286_v54  ;;  %5881 = vst [vmem:[#allocation43_spill] sm:$0xff] %v4288_v61  ;;  %v853_v22 = vsel %vm849_vm8, %v5893_v45, %v5892_v20  ;;  %v857_v8 = vsel %vm849_vm8, %v5892_v20, %v5893_v45  ;;  %v832_v12 = vadd.f32 %v824_v31, %v782_v17  ;;  %v5894_v19 = vld [vmem:[#allocation29_spill] sm:$0xff]  ;;  %v5895_v10 = vld [vmem:[#allocation30_spill] sm:$0xff] }
 0x29c   : > { %v878_v40 = vadd.f32 %v870_v16, %v828_v9  ;;  %v1233_v61 = vmul.f32 %v1225_v4, %v1216_v2  ;;  %v873_v54 = vmul.f32 %v865_v5, %v853_v22  ;;  %v874_v58 = vmul.f32 %v866_v3, %v857_v8  ;;  %v1272_v9 = vld [vmem:[#allocation9 + $0x240] sm:$0xff]  ;;  %v1273_v48 = vld [vmem:[#allocation9 + $0x248] sm:$0xff]  ;;  %v5896_v21 = vld [vmem:[#allocation78_spill] sm:$0xff] }
 0x29d   : > { %v879_v57 = vadd.f32 %v871_v55, %v829_v30  ;;  %v880_v20 = vadd.f32 %v872_v43, %v830_v35  ;;  %v1192_v60 = vadd.f32 %v1184_v44, %v4075_v49  ;;  %v1193_v56 = vadd.f32 %v1185_v29, %v4078_v25  ;;  %v5897_v42 = vld [vmem:[#allocation74_spill] sm:$0xff]  ;;  %v5898_v35 = vld [vmem:[#allocation31_spill] sm:$0xff]  ;;  %v5900_v31 = vld [vmem:[#allocation33_spill] sm:$0xff] }
 0x29e   : > { %v4304_v28 = vpop.permute.xlu1 %1254  ;;  %v4314_v7 = vpop.permute.xlu0 %1350  ;;  %v4347_v6 = vmul.f32 %v1142_v46, %v5894_v19  ;;  %v4350_v17 = vmul.f32 %v1143_v32, %v5895_v10  ;;  %v881_v16 = vadd.f32 %v873_v54, %v831_v27  ;;  %v1264_v37 = vsel %vm599_vm3, %v5897_v42, %v5896_v21  ;;  %v1321_v3 = vld [vmem:[#allocation9 + $0x348] sm:$0xff]  ;;  %v5903_v45 = vld [vmem:[#allocation89_spill] sm:$0xff]  ;;  %v1179_v44 = vld [vmem:[#allocation9 + $0x58] sm:$0xff] }
 0x29f   : > { %5884 = vst [vmem:[#allocation60_spill] sm:$0xff] %v4304_v28  ;;  %5887 = vst [vmem:[#allocation56_spill] sm:$0xff] %v4314_v7  ;;  %v877_v7 = vadd.f32 %v869_v59, %v827_v36  ;;  %v1232_v28 = vmul.f32 %v1224_v34, %v1220_v33  ;;  %v882_v36 = vadd.f32 %v874_v58, %v832_v12  ;;  %v5899_v58 = vmax.f32 %v4143_v47, 0.0  ;;  %v5902_v33 = vld [vmem:[#allocation32_spill] sm:$0xff]  ;;  %v5904_v47 = vld [vmem:[#allocation79_spill] sm:$0xff] }
 0x2a0   : > { %v1268_v49 = vsel %vm599_vm3, %v5896_v21, %v5897_v42  ;;  %v1241_v30 = vadd.f32 %v1233_v61, %v1193_v56  ;;  %v4366_v54 = vadd.f32 %v5898_v35, %v878_v40  ;;  %v5901_v4 = vmax.f32 %v4146_v15, 0.0  ;;  %v1320_v40 = vld [vmem:[#allocation9 + $0x340] sm:$0xff]  ;;  %v5905_v29 = vld [vmem:[#allocation82_spill] sm:$0xff]  ;;  %v5906_v27 = vld [vmem:[#allocation36_spill] sm:$0xff] }
 0x2a1   : > { %v1240_v25 = vadd.f32 %v1232_v28, %v1192_v60  ;;  %v4363_v18 = vadd.f32 %v5898_v35, %v877_v7  ;;  %v4371_v34 = vmul.f32 %v5900_v31, %v5899_v58  ;;  %v4379_v5 = vadd.f32 %v5902_v33, %v879_v57  ;;  %v1178_v57 = vld [vmem:[#allocation9 + $0x50] sm:$0xff]  ;;  %v1368_v42 = vld [vmem:[#allocation9 + $0x540] sm:$0xff]  ;;  %v1227_v35 = vld [vmem:[#allocation9 + $0x158] sm:$0xff] }
 0x2a2   : > { %v4340_v24 = vpop.permute.xlu1 %1302  ;;  %v4342_v38 = vpop.permute.xlu0 %1166  ;;  %v4376_v2 = vmul.f32 %v5900_v31, %v5901_v4  ;;  %v4382_v61 = vadd.f32 %v5902_v33, %v880_v20  ;;  %v1280_v28 = vmul.f32 %v1272_v9, %v1268_v49  ;;  %v1281_v7 = vmul.f32 %v1273_v48, %v1264_v37  ;;  %v1369_v37 = vld [vmem:[#allocation9 + $0x548] sm:$0xff]  ;;  %v1180_v33 = vld [vmem:[#allocation9 + $0x60] sm:$0xff] }
 0x2a3   : > { %v1312_v22 = vsel %vm649_vm4, %v5904_v47, %v5903_v45  ;;  %v1316_v15 = vsel %vm649_vm4, %v5903_v45, %v5904_v47  ;;  %v1169_v55 = vsel %vm500_vm1, %v5905_v29, %v3961_v14  ;;  %v1173_v43 = vsel %vm500_vm1, %v3961_v14, %v5905_v29  ;;  %v5907_v14 = vld [vmem:[#allocation81_spill] sm:$0xff]  ;;  %v5908_v58 = vld [vmem:[#allocation84_spill] sm:$0xff]  ;;  %v1275_v47 = vld [vmem:[#allocation9 + $0x258] sm:$0xff] }
 0x2a4   : > { %v4403_v12 = vadd.f32 %v5906_v27, %v881_v16  ;;  %v4406_v46 = vadd.f32 %v5906_v27, %v882_v36  ;;  %v1288_v32 = vadd.f32 %v1280_v28, %v1240_v25  ;;  %v1289_v20 = vadd.f32 %v1281_v7, %v1241_v30  ;;  %v1226_v30 = vld [vmem:[#allocation9 + $0x150] sm:$0xff]  ;;  %v5909_v29 = vld [vmem:[#allocation80_spill] sm:$0xff] }
 0x2a5   : > { %v1328_v48 = vmul.f32 %v1320_v40, %v1316_v15  ;;  %v1329_v21 = vmul.f32 %v1321_v3, %v1312_v22  ;;  %v1360_v16 = vsel %vm699_vm5, %v5907_v14, %v3956_v13  ;;  %v1364_v36 = vsel %vm699_vm5, %v3956_v13, %v5907_v14  ;;  %v1274_v45 = vld [vmem:[#allocation9 + $0x250] sm:$0xff]  ;;  %v1181_v9 = vld [vmem:[#allocation9 + $0x68] sm:$0xff] }
 0x2a6   : > { %v4352_v59 = vpop.permute.xlu1 %1398  ;;  %v4392_v8 = vpop.permute.xlu0 %1310  ;;  %v1186_v49 = vmul.f32 %v1178_v57, %v1173_v43  ;;  %v1187_v25 = vmul.f32 %v1179_v44, %v1169_v55  ;;  %v1217_v31 = vsel %vm549_vm2, %v5908_v58, %v3974_v23  ;;  %v1221_v4 = vsel %vm549_vm2, %v3974_v23, %v5908_v58  ;;  %v1416_v57 = vld [vmem:[#allocation9 + $0x640] sm:$0xff]  ;;  %v1417_v44 = vld [vmem:[#allocation9 + $0x648] sm:$0xff] }
 0x2a7   : > { %v1376_v40 = vmul.f32 %v1368_v42, %v1360_v16  ;;  %v1377_v3 = vmul.f32 %v1369_v37, %v1364_v36  ;;  %v1265_v22 = vsel %vm599_vm3, %v3977_v39, %v4019_v0  ;;  %v1269_v23 = vsel %vm599_vm3, %v4019_v0, %v3977_v39  ;;  %v5910_v55 = vld [vmem:[#allocation76_spill] sm:$0xff] }
 0x2a8   : > { %v1408_v43 = vsel %vm749_vm6, %v5910_v55, %v5909_v29  ;;  %v1412_v27 = vsel %vm749_vm6, %v5909_v29, %v5910_v55  ;;  %v1234_v42 = vmul.f32 %v1226_v30, %v1221_v4  ;;  %v1235_v37 = vmul.f32 %v1227_v35, %v1217_v31  ;;  %v1229_v30 = vld [vmem:[#allocation9 + $0x168] sm:$0xff]  ;;  %v1322_v4 = vld [vmem:[#allocation9 + $0x350] sm:$0xff] }
 0x2a9   : > { %v1336_v14 = vadd.f32 %v1328_v48, %v1288_v32  ;;  %v1337_v16 = vadd.f32 %v1329_v21, %v1289_v20  ;;  %v1194_v39 = vadd.f32 %v1186_v49, %v4083_v51  ;;  %v1195_v0 = vadd.f32 %v1187_v25, %v4086_v63  ;;  %v1228_v25 = vld [vmem:[#allocation9 + $0x160] sm:$0xff] }
 0x2aa   : > { %v4408_v60 = vpop.permute.xlu1 %1214  ;;  %v4440_v15 = vpop.permute.xlu0 %1490  ;;  %v1282_v58 = vmul.f32 %v1274_v45, %v1269_v23  ;;  %v1283_v28 = vmul.f32 %v1275_v47, %v1265_v22  ;;  %v1170_v56 = vsel %vm500_vm1, %v4080_v26, %v4158_v52  ;;  %v1174_v32 = vsel %vm500_vm1, %v4158_v52, %v4080_v26  ;;  %v1323_v26 = vld [vmem:[#allocation9 + $0x358] sm:$0xff]  ;;  %v1464_v23 = vld [vmem:[#allocation9 + $0x740] sm:$0xff] }
 0x2ab   : > { %v1424_v20 = vmul.f32 %v1416_v57, %v1408_v43  ;;  %v1425_v51 = vmul.f32 %v1417_v44, %v1412_v27  ;;  %v1384_v48 = vadd.f32 %v1376_v40, %v1336_v14  ;;  %v1385_v63 = vadd.f32 %v1377_v3, %v1337_v16  ;;  %v5911_v52 = vld [vmem:[#allocation86_spill] sm:$0xff]  ;;  %v1465_v57 = vld [vmem:[#allocation9 + $0x748] sm:$0xff]  ;;  %v5912_v44 = vld [vmem:[#allocation91_spill] sm:$0xff] }
 0x2ac   : > { %v1242_v21 = vadd.f32 %v1234_v42, %v1194_v39  ;;  %v1243_v49 = vadd.f32 %v1235_v37, %v1195_v0  ;;  %v1218_v35 = vsel %vm549_vm2, %v4072_v53, %v4214_v11  ;;  %v1222_v31 = vsel %vm549_vm2, %v4214_v11, %v4072_v53  ;;  %v5913_v53 = vld [vmem:[#allocation83_spill] sm:$0xff]  ;;  %v1370_v14 = vld [vmem:[#allocation9 + $0x550] sm:$0xff]  ;;  %v1371_v16 = vld [vmem:[#allocation9 + $0x558] sm:$0xff] }
 0x2ad   : > { %v1313_v40 = vsel %vm649_vm4, %v5911_v52, %v3988_v62  ;;  %v1317_v3 = vsel %vm649_vm4, %v3988_v62, %v5911_v52  ;;  %v1188_v45 = vmul.f32 %v1180_v33, %v1174_v32  ;;  %v1189_v47 = vmul.f32 %v1181_v9, %v1170_v56  ;;  %v5914_v39 = vld [vmem:[#allocation93_spill] sm:$0xff]  ;;  %v5915_v0 = vld [vmem:[#allocation88_spill] sm:$0xff] }
 0x2ae   : > { %v4452_v36 = vpop.permute.xlu1 %1262  ;;  %v4478_v22 = vpop.permute.xlu0 %1498  ;;  %v1456_v11 = vsel %vm799_vm7, %v5913_v53, %v5912_v44  ;;  %v1460_v29 = vsel %vm799_vm7, %v5912_v44, %v5913_v53  ;;  %v1290_v55 = vadd.f32 %v1282_v58, %v1242_v21  ;;  %v1291_v43 = vadd.f32 %v1283_v28, %v1243_v49  ;;  %v1276_v49 = vld [vmem:[#allocation9 + $0x260] sm:$0xff]  ;;  %v1325_v53 = vld [vmem:[#allocation9 + $0x368] sm:$0xff] }
 0x2af   : > { %v1432_v27 = vadd.f32 %v1424_v20, %v1384_v48  ;;  %v1433_v62 = vadd.f32 %v1425_v51, %v1385_v63  ;;  %v1236_v33 = vmul.f32 %v1228_v25, %v1222_v31  ;;  %v1237_v56 = vmul.f32 %v1229_v30, %v1218_v35  ;;  %v1277_v25 = vld [vmem:[#allocation9 + $0x268] sm:$0xff]  ;;  %v5916_v30 = vld [vmem:[#allocation34_spill] sm:$0xff]  ;;  %v5917_v35 = vld [vmem:[#allocation97_spill] sm:$0xff] }
 0x2b0   : > { %v1330_v42 = vmul.f32 %v1322_v4, %v1317_v3  ;;  %v1331_v37 = vmul.f32 %v1323_v26, %v1313_v40  ;;  %v1361_v32 = vsel %vm699_vm5, %v5915_v0, %v5914_v39  ;;  %v1365_v28 = vsel %vm699_vm5, %v5914_v39, %v5915_v0  ;;  %v1324_v44 = vld [vmem:[#allocation9 + $0x360] sm:$0xff] }
 0x2b1   : > { %v1472_v58 = vmul.f32 %v1464_v23, %v1456_v11  ;;  %v1473_v20 = vmul.f32 %v1465_v57, %v1460_v29  ;;  %v1196_v51 = vadd.f32 %v1188_v45, %v4117_v1  ;;  %v1197_v48 = vadd.f32 %v1189_v47, %v4120_v50  ;;  %v1466_v50 = vld [vmem:[#allocation9 + $0x750] sm:$0xff]  ;;  %v5918_v45 = vld [vmem:[#allocation94_spill] sm:$0xff] }
 0x2b2   : > { %v4488_v9 = vpop.permute.xlu1 %1358  ;;  %v1338_v63 = vadd.f32 %v1330_v42, %v1290_v55  ;;  %v1339_v21 = vadd.f32 %v1331_v37, %v1291_v43  ;;  %v1266_v31 = vsel %vm599_vm3, %v5917_v35, %v5916_v30  ;;  %v1270_v4 = vsel %vm599_vm3, %v5916_v30, %v5917_v35  ;;  %v4508_v3 = vpop.permute.xlu0 %1406  ;;  %v5919_v47 = vld [vmem:[#allocation90_spill] sm:$0xff]  ;;  %v5921_v29 = vld [vmem:[#allocation41_spill] sm:$0xff]  ;;  %v5922_v37 = vld [vmem:[#allocation95_spill] sm:$0xff] }
 0x2b3   : > { %v1378_v26 = vmul.f32 %v1370_v14, %v1361_v32  ;;  %v1379_v52 = vmul.f32 %v1371_v16, %v1365_v28  ;;  %v1244_v40 = vadd.f32 %v1236_v33, %v1196_v51  ;;  %v1245_v1 = vadd.f32 %v1237_v56, %v1197_v48  ;;  %v5920_v11 = vld [vmem:[#allocation42_spill] sm:$0xff]  ;;  %v1418_v56 = vld [vmem:[#allocation9 + $0x650] sm:$0xff]  ;;  %v5923_v14 = vld [vmem:[#allocation92_spill] sm:$0xff] }
 0x2b4   : > { %v1457_v23 = vsel %vm799_vm7, %v5919_v47, %v5918_v45  ;;  %v1461_v57 = vsel %vm799_vm7, %v5918_v45, %v5919_v47  ;;  %v1314_v55 = vsel %vm649_vm4, %v5921_v29, %v5920_v11  ;;  %v1318_v43 = vsel %vm649_vm4, %v5920_v11, %v5921_v29  ;;  %v1467_v33 = vld [vmem:[#allocation9 + $0x758] sm:$0xff] }
 0x2b5   : > { %v1419_v42 = vld [vmem:[#allocation9 + $0x658] sm:$0xff]  ;;  %v1409_v16 = vsel %vm749_vm6, %v5923_v14, %v5922_v37  ;;  %v1413_v39 = vsel %vm749_vm6, %v5922_v37, %v5923_v14  ;;  %v1284_v0 = vmul.f32 %v1276_v49, %v1270_v4  ;;  %v1285_v32 = vmul.f32 %v1277_v25, %v1266_v31  ;;  %v1372_v37 = vld [vmem:[#allocation9 + $0x560] sm:$0xff]  ;;  %v1373_v49 = vld [vmem:[#allocation9 + $0x568] sm:$0xff] }
 0x2b6   : > { %v1489_v28 = vpop.permute.xlu1 %1488  ;;  %v4534_v51 = vadd.f32 %v1472_v58, %v1432_v27  ;;  %v4536_v48 = vadd.f32 %v1473_v20, %v1433_v62  ;;  %v1386_v30 = vadd.f32 %v1378_v26, %v1338_v63  ;;  %v1387_v35 = vadd.f32 %v1379_v52, %v1339_v21  ;;  %v5924_v25 = vld [vmem:[#allocation40_spill] sm:$0xff]  ;;  %v1182_v58 = vld [vmem:[#allocation9 + $0x70] sm:$0xff]  ;;  %v1183_v20 = vld [vmem:[#allocation9 + $0x78] sm:$0xff]  ;;  %v4558_v26 = vpop.permute.xlu0 %1446 }
 0x2b7   : > { %v1292_v45 = vadd.f32 %v1284_v0, %v1244_v40  ;;  %v1293_v47 = vadd.f32 %v1285_v32, %v1245_v1  ;;  %v1332_v11 = vmul.f32 %v1324_v44, %v1318_v43  ;;  %v1333_v29 = vmul.f32 %v1325_v53, %v1314_v55  ;;  %v5925_v31 = vld [vmem:[#allocation96_spill] sm:$0xff]  ;;  %v5926_v63 = vld [vmem:[#allocation45_spill] sm:$0xff]  ;;  %v1420_v1 = vld [vmem:[#allocation9 + $0x660] sm:$0xff] }
 0x2b8   : > { %v4538_v7 = vmul.f32 %v1466_v50, %v1457_v23  ;;  %v4540_v13 = vmul.f32 %v1467_v33, %v1461_v57  ;;  %v1426_v10 = vmul.f32 %v1418_v56, %v1409_v16  ;;  %v1427_v19 = vmul.f32 %v1419_v42, %v1413_v39  ;;  %v1421_v50 = vld [vmem:[#allocation9 + $0x668] sm:$0xff]  ;;  %v5927_v23 = vld [vmem:[#allocation46_spill] sm:$0xff]  ;;  %v5928_v57 = vld [vmem:[#allocation39_spill] sm:$0xff] }
 0x2b9   : > { %v1362_v27 = vsel %vm699_vm5, %v5925_v31, %v5924_v25  ;;  %v1366_v62 = vsel %vm699_vm5, %v5924_v25, %v5925_v31  ;;  %v1171_v21 = vsel %vm500_vm1, %v5926_v63, %v4342_v38  ;;  %v1175_v4 = vsel %vm500_vm1, %v4342_v38, %v5926_v63  ;;  %v1230_v33 = vld [vmem:[#allocation9 + $0x170] sm:$0xff]  ;;  %v1231_v38 = vld [vmem:[#allocation9 + $0x178] sm:$0xff]  ;;  %v5929_v56 = vld [vmem:[#allocation43_spill] sm:$0xff] }
 0x2ba   : > { %v1434_v52 = vadd.f32 %v1426_v10, %v1386_v30  ;;  %v1435_v40 = vadd.f32 %v1427_v19, %v1387_v35  ;;  %v1410_v44 = vsel %vm749_vm6, %v5928_v57, %v5927_v23  ;;  %v1414_v53 = vsel %vm749_vm6, %v5927_v23, %v5928_v57  ;;  %v1497_v42 = vpop.permute.xlu1 %1496  ;;  %v1278_v35 = vld [vmem:[#allocation9 + $0x270] sm:$0xff]  ;;  %v1515_v63 = vld [vmem:[#allocation9 + $0x858] sm:$0xff] }
 0x2bb   : > { %v1340_v55 = vadd.f32 %v1332_v11, %v1292_v45  ;;  %v1341_v43 = vadd.f32 %v1333_v29, %v1293_v47  ;;  %v1219_v19 = vsel %vm549_vm2, %v5929_v56, %v4408_v60  ;;  %v1223_v10 = vsel %vm549_vm2, %v4408_v60, %v5929_v56  ;;  %v1279_v45 = vld [vmem:[#allocation9 + $0x278] sm:$0xff]  ;;  %v5930_v47 = vld [vmem:[#allocation60_spill] sm:$0xff]  ;;  %v5931_v57 = vld [vmem:[#allocation49_spill] sm:$0xff] }
 0x2bc   : > { %v1380_v14 = vmul.f32 %v1372_v37, %v1362_v27  ;;  %v1381_v16 = vmul.f32 %v1373_v49, %v1366_v62  ;;  %v1190_v39 = vmul.f32 %v1182_v58, %v1175_v4  ;;  %v1191_v0 = vmul.f32 %v1183_v20, %v1171_v21  ;;  %v1512_v37 = vld [vmem:[#allocation9 + $0x840] sm:$0xff]  ;;  %v1513_v49 = vld [vmem:[#allocation9 + $0x848] sm:$0xff]  ;;  %v1514_v20 = vld [vmem:[#allocation9 + $0x850] sm:$0xff]  ;;  %v1493_v4 = vpop.permute.xlu0 %1492 }
 0x2bd   : > { %v1428_v32 = vmul.f32 %v1420_v1, %v1410_v44  ;;  %v1429_v30 = vmul.f32 %v1421_v50, %v1414_v53  ;;  %v1267_v11 = vsel %vm599_vm3, %v5930_v47, %v4452_v36  ;;  %v1271_v29 = vsel %vm599_vm3, %v4452_v36, %v5930_v47  ;;  %v5932_v44 = vld [vmem:[#allocation47_spill] sm:$0xff] }
 0x2be   : > { %v1238_v60 = vmul.f32 %v1230_v33, %v1223_v10  ;;  %v1239_v25 = vmul.f32 %v1231_v38, %v1219_v19  ;;  %v1504_v31 = vsel %vm849_vm8, %v1489_v28, %v1497_v42  ;;  %v1508_v27 = vsel %vm849_vm8, %v1497_v42, %v1489_v28  ;;  %v1326_v10 = vld [vmem:[#allocation9 + $0x370] sm:$0xff]  ;;  %v1327_v42 = vld [vmem:[#allocation9 + $0x378] sm:$0xff] }
 0x2bf   : > { %v1388_v62 = vadd.f32 %v1380_v14, %v1340_v55  ;;  %v1389_v58 = vadd.f32 %v1381_v16, %v1341_v43  ;;  %v1505_v21 = vsel %vm849_vm8, %v4440_v15, %v4478_v22  ;;  %v1509_v36 = vsel %vm849_vm8, %v4478_v22, %v4440_v15  ;;  %v1468_v15 = vld [vmem:[#allocation9 + $0x760] sm:$0xff]  ;;  %v1469_v22 = vld [vmem:[#allocation9 + $0x768] sm:$0xff] }
 0x2c0   : > { %v1198_v1 = vadd.f32 %v1190_v39, %v4347_v6  ;;  %v1199_v50 = vadd.f32 %v1191_v0, %v4350_v17  ;;  %v1286_v28 = vmul.f32 %v1278_v35, %v1271_v29  ;;  %v1287_v23 = vmul.f32 %v1279_v45, %v1267_v11 }
 0x2c1   : > { %v1458_v53 = vsel %vm799_vm7, %v5932_v44, %v5931_v57  ;;  %v1462_v55 = vsel %vm799_vm7, %v5931_v57, %v5932_v44  ;;  %v1520_v43 = vmul.f32 %v1512_v37, %v1504_v31  ;;  %v1521_v33 = vmul.f32 %v1513_v49, %v1508_v27 }
 0x2c2   : > { %v1246_v38 = vadd.f32 %v1238_v60, %v1198_v1  ;;  %v1247_v6 = vadd.f32 %v1239_v25, %v1199_v50  ;;  %v1522_v56 = vmul.f32 %v1514_v20, %v1505_v21  ;;  %v1523_v17 = vmul.f32 %v1515_v63, %v1509_v36 }
 0x2c3   : > { %v1315_v14 = vsel %vm649_vm4, %v4340_v24, %v4392_v8  ;;  %v1319_v16 = vsel %vm649_vm4, %v4392_v8, %v4340_v24  ;;  %v1482_v39 = vadd.f32 %v4538_v7, %v1434_v52  ;;  %v1483_v0 = vadd.f32 %v4540_v13, %v1435_v40  ;;  %v1374_v7 = vld [vmem:[#allocation9 + $0x570] sm:$0xff]  ;;  %v1375_v52 = vld [vmem:[#allocation9 + $0x578] sm:$0xff]  ;;  %v5933_v13 = vld [vmem:[#allocation56_spill] sm:$0xff] }
 0x2c4   : > { %v1436_v45 = vadd.f32 %v1428_v32, %v1388_v62  ;;  %v1437_v47 = vadd.f32 %v1429_v30, %v1389_v58  ;;  %v1294_v11 = vadd.f32 %v1286_v28, %v1246_v38  ;;  %v1295_v29 = vadd.f32 %v1287_v23, %v1247_v6 }
 0x2c5   : > { %v1476_v60 = vmul.f32 %v1468_v15, %v1458_v53  ;;  %v1477_v25 = vmul.f32 %v1469_v22, %v1462_v55  ;;  %v1528_v37 = vadd.f32 %v1520_v43, %v4534_v51  ;;  %v1529_v49 = vadd.f32 %v1521_v33, %v4536_v48  ;;  %v5935_v48 = vld [vmem:[#allocation35_spill] sm:$0xff]  ;;  %v1517_v53 = vld [vmem:[#allocation9 + $0x868] sm:$0xff]  ;;  %v5940_v22 = vld [vmem:[#allocation37_spill] sm:$0xff] }
 0x2c6   : > { %v1334_v31 = vmul.f32 %v1326_v10, %v1319_v16  ;;  %v1335_v27 = vmul.f32 %v1327_v42, %v1315_v14  ;;  %v1530_v20 = vadd.f32 %v1522_v56, %v1482_v39  ;;  %v1531_v24 = vadd.f32 %v1523_v17, %v1483_v0 }
 0x2c7   : > { %v1363_v40 = vsel %vm699_vm5, %v5933_v13, %v4488_v9  ;;  %v1367_v32 = vsel %vm699_vm5, %v4488_v9, %v5933_v13  ;;  %v5934_v51 = vmax.f32 %v4403_v12, 0.0  ;;  %v5936_v62 = vmax.f32 %v4406_v46, 0.0  ;;  %v1516_v9 = vld [vmem:[#allocation9 + $0x860] sm:$0xff]  ;;  %v5939_v12 = vld [vmem:[#allocation38_spill] sm:$0xff]  ;;  %v1470_v13 = vld [vmem:[#allocation9 + $0x770] sm:$0xff] }
 0x2c8   : > { %v1484_v63 = vadd.f32 %v1476_v60, %v1436_v45  ;;  %v1485_v21 = vadd.f32 %v1477_v25, %v1437_v47  ;;  %v1342_v36 = vadd.f32 %v1334_v31, %v1294_v11  ;;  %v1343_v1 = vadd.f32 %v1335_v27, %v1295_v29 }
 0x2c9   : > { %v941_v30 = vmul.f32 %v5935_v48, %v5934_v51  ;;  %v942_v58 = vmul.f32 %v5935_v48, %v5936_v62  ;;  %v5937_v28 = vmax.f32 %v4363_v18, 0.0  ;;  %v5938_v57 = vmax.f32 %v4366_v54, 0.0 }
 0x2ca   : > { %v1556_v55 = vadd.f32 %v5939_v12, %v1528_v37  ;;  %v1557_v43 = vadd.f32 %v5939_v12, %v1529_v49  ;;  %v1382_v46 = vmul.f32 %v1374_v7, %v1363_v40  ;;  %v1383_v33 = vmul.f32 %v1375_v52, %v1367_v32  ;;  %v1423_v52 = vld [vmem:[#allocation9 + $0x678] sm:$0xff] }
 0x2cb   : > { %v4606_v19 = vpop.permute.xlu1 %1548  ;;  %v4618_v35 = vpop.permute.xlu0 %1553  ;;  %v1558_v38 = vadd.f32 %v5940_v22, %v1530_v20  ;;  %v1559_v6 = vadd.f32 %v5940_v22, %v1531_v24  ;;  %v1411_v10 = vsel %vm749_vm6, %v4352_v59, %v4508_v3  ;;  %v1415_v42 = vsel %vm749_vm6, %v4508_v3, %v4352_v59  ;;  %v1422_v3 = vld [vmem:[#allocation9 + $0x670] sm:$0xff]  ;;  %v1471_v40 = vld [vmem:[#allocation9 + $0x778] sm:$0xff] }
 0x2cc   : > { %v5942_v0 = vmax.f32 %v4382_v61, 0.0  ;;  %v1565_v47 = vmax.f32 %v1557_v43, 0.0 }
 0x2cd   : > { %v1566_v25 = vmax.f32 %v1558_v38, 0.0  ;;  %v1567_v37 = vmax.f32 %v1559_v6, 0.0 }
 0x2cf   : > { %v1455_v8 = vpop.permute.xlu1 %1454 }
 0x2d0   : > { %v925_v50 = vpop.permute.xlu0 %924  ;;  %v1463_v61 = vsel %vm799_vm7, %v1455_v8, %v4558_v26 }
 0x2d1   : > { %v937_v23 = vmul.f32 %v925_v50, %v5937_v28  ;;  %v938_v44 = vmul.f32 %v925_v50, %v5938_v57 }
 0x2d3   : > { %v1501_v15 = vpop.permute.xlu1 %1500  ;;  %v943_v56 = vadd.f32 %v937_v23, %v4371_v34  ;;  %v952_v18 = vadd.f32 %v938_v44, %v4376_v2  ;;  %v5941_v2 = vmax.f32 %v4379_v5, 0.0  ;;  %v1459_v5 = vsel %vm799_vm7, %v4558_v26, %v1455_v8 }
 0x2d4   : > { %v1506_v54 = vsel %vm849_vm8, %v1493_v4, %v1501_v15  ;;  %v1510_v17 = vsel %vm849_vm8, %v1501_v15, %v1493_v4  ;;  %v929_v16 = vpop.permute.xlu0 %928  ;;  %v1564_v4 = vmax.f32 %v1556_v55, 0.0  ;;  %v1478_v12 = vmul.f32 %v1470_v13, %v1459_v5 }
 0x2d5   : > { %v1524_v14 = vmul.f32 %v1516_v9, %v1506_v54  ;;  %v1525_v34 = vmul.f32 %v1517_v53, %v1510_v17  ;;  %v939_v39 = vmul.f32 %v929_v16, %v5941_v2  ;;  %v940_v45 = vmul.f32 %v929_v16, %v5942_v0 }
 0x2d6   : > { %v1430_v9 = vmul.f32 %v1422_v3, %v1411_v10  ;;  %v1431_v53 = vmul.f32 %v1423_v52, %v1415_v42 }
 0x2d7   : > { %v1532_v11 = vadd.f32 %v1524_v14, %v1484_v63  ;;  %v1533_v29 = vadd.f32 %v1525_v34, %v1485_v21  ;;  %v1574_v60 = vpop.permute.xlu1 %1573  ;;  %v944_v49 = vadd.f32 %v943_v56, %v939_v39  ;;  %v953_v31 = vadd.f32 %v952_v18, %v940_v45 }
 0x2d8   : > { %v1588_v27 = vmul.f32 %v1574_v60, %v1564_v4  ;;  %v1589_v59 = vmul.f32 %v1574_v60, %v1565_v47  ;;  %v1578_v20 = vpop.permute.xlu0 %1577  ;;  %v1390_v63 = vadd.f32 %v1382_v46, %v1342_v36  ;;  %v1391_v21 = vadd.f32 %v1383_v33, %v1343_v1  ;;  %v1518_v36 = vld [vmem:[#allocation9 + $0x870] sm:$0xff]  ;;  %v1519_v1 = vld [vmem:[#allocation9 + $0x878] sm:$0xff] }
 0x2d9   : > { %v1560_v24 = vadd.f32 %v4606_v19, %v1532_v11  ;;  %v1561_v7 = vadd.f32 %v4606_v19, %v1533_v29  ;;  %v945_v32 = vadd.f32 %v944_v49, %v941_v30  ;;  %v954_v51 = vadd.f32 %v953_v31, %v942_v58 }
 0x2da   : > { %v1590_v48 = vmul.f32 %v1578_v20, %v1566_v25  ;;  %v1591_v62 = vmul.f32 %v1578_v20, %v1567_v37  ;;  %v1479_v19 = vmul.f32 %v1471_v40, %v1463_v61  ;;  %v1438_v22 = vadd.f32 %v1430_v9, %v1390_v63  ;;  %v5943_v9 = vld [vmem:[#allocation17_spill] sm:$0xff] }
 0x2db   : > { %v1495_v50 = vpop.permute.xlu1 %1494  ;;  %v1568_v28 = vmax.f32 %v1560_v24, 0.0  ;;  %v1569_v23 = vmax.f32 %v1561_v7, 0.0  ;;  %v946_v57 = vrot.slane %v945_v32, 4  ;;  %v955_v44 = vrot.slane %v954_v51, 4 }
 0x2dc   : > { %v1596_v26 = vadd.f32 %v1590_v48, %v1588_v27  ;;  %v1605_v8 = vadd.f32 %v1591_v62, %v1589_v59  ;;  %v1582_v55 = vpop.permute.xlu0 %1581  ;;  %v1439_v38 = vadd.f32 %v1431_v53, %v1391_v21  ;;  %v1486_v54 = vadd.f32 %v1478_v12, %v1438_v22  ;;  %v5944_v12 = vld [vmem:[#allocation15_spill] sm:$0xff] }
 0x2dd   : > { %v947_v43 = vadd.f32 %v946_v57, %v945_v32  ;;  %v956_v15 = vadd.f32 %v955_v44, %v954_v51  ;;  %v1592_v30 = vmul.f32 %v1582_v55, %v1568_v28  ;;  %v1593_v58 = vmul.f32 %v1582_v55, %v1569_v23  ;;  %v5945_v55 = vld [vmem:[#allocation19_spill] sm:$0xff] }
 0x2de   : > { %v1487_v17 = vadd.f32 %v1479_v19, %v1439_v38  ;;  %v5948_v38 = vld [vmem:[#allocation16_spill] sm:$0xff] }
 0x2df   : > { %v1503_v46 = vpop.permute.xlu1 %1502  ;;  %v948_v33 = vrot.slane %v947_v43, 2  ;;  %v957_v6 = vrot.slane %v956_v15, 2  ;;  %v1597_v56 = vadd.f32 %v1596_v26, %v1592_v30  ;;  %v1606_v18 = vadd.f32 %v1605_v8, %v1593_v58  ;;  %v5947_v58 = vld [vmem:[#allocation18_spill] sm:$0xff] }
 0x2e0   : > { %v1507_v10 = vsel %vm849_vm8, %v1495_v50, %v1503_v46  ;;  %v1511_v42 = vsel %vm849_vm8, %v1503_v46, %v1495_v50 }
 0x2e1   : > { %v949_v14 = vadd.f32 %v948_v33, %v947_v43  ;;  %v958_v34 = vadd.f32 %v957_v6, %v956_v15  ;;  %v1526_v16 = vmul.f32 %v1518_v36, %v1507_v10  ;;  %v1527_v2 = vmul.f32 %v1519_v1, %v1511_v42  ;;  %v5946_v15 = vld [vmem:[#allocation21_spill] sm:$0xff]  ;;  %v5949_v1 = vld [vmem:[#allocation20_spill] sm:$0xff]  ;;  %v5950_v33 = vld [vmem:[#allocation22_spill] sm:$0xff] }
 0x2e3   : > { %v950_v39 = vrot.slane %v949_v14, 1  ;;  %v959_v0 = vrot.slane %v958_v34, 1  ;;  %v1534_v45 = vadd.f32 %v1526_v16, %v1486_v54  ;;  %v1535_v4 = vadd.f32 %v1527_v2, %v1487_v17  ;;  %v1586_v27 = vpop.permute.xlu1 %1585  ;;  %v2948_v16 = vld [vmem:[%s5623_s1 + $0x20] sm:$0xff]  }
 0x2e4   : > { %2791 = vmatmul.mubr.msk.bf16.vlgmr.msra.gmra.mrb[0].mxu1 %vm337_vm0, %v2948_v16 }
 0x2e5   : > { %v951_v47 = vadd.f32 %v950_v39, %v949_v14  ;;  %v960_v11 = vadd.f32 %v959_v0, %v958_v34  ;;  %v1562_v29 = vadd.f32 %v4618_v35, %v1534_v45  ;;  %v1563_v60 = vadd.f32 %v4618_v35, %v1535_v4  ;;  %v5951_v0 = vld [vmem:[#allocation25_spill] sm:$0xff]  ;;  %v5952_v4 = vld [vmem:[#allocation23_spill] sm:$0xff] }
 0x2e7   : > { %v2793_v25 = vmul.f32 -1.442695, %v951_v47  ;;  %v2794_v37 = vmul.f32 -1.442695, %v960_v11  ;;  %v1570_v49 = vmax.f32 %v1562_v29, 0.0  ;;  %v1571_v31 = vmax.f32 %v1563_v60, 0.0 }
 0x2e8   : > { %v5953_v11 = vld [vmem:[#allocation29_spill] sm:$0xff]  ;;  %v5954_v60 = vld [vmem:[#allocation27_spill] sm:$0xff] }
 0x2e9   : > { %2954 = vpow2.f32 %v2793_v25  ;;  %v1594_v59 = vmul.f32 %v1586_v27, %v1570_v49  ;;  %v1595_v3 = vmul.f32 %v1586_v27, %v1571_v31  ;;  %v5956_v31 = vld [vmem:[#allocation24_spill] sm:$0xff] }
 0x2ea   : > { %2956 = vpow2.f32 %v2794_v37  ;;  %v5955_v37 = vld [vmem:[#allocation26_spill] sm:$0xff] }
 0x2eb   : > { %v1598_v5 = vadd.f32 %v1597_v56, %v1594_v59  ;;  %v1607_v61 = vadd.f32 %v1606_v18, %v1595_v3  ;;  %v5957_v59 = vld [vmem:[#allocation30_spill] sm:$0xff] }
 0x2ed   : > { %v1599_v20 = vrot.slane %v1598_v5, 4  ;;  %v1608_v24 = vrot.slane %v1607_v61, 4 }
 0x2ef   : > { %v1600_v7 = vadd.f32 %v1599_v20, %v1598_v5  ;;  %v1609_v52 = vadd.f32 %v1608_v24, %v1607_v61  ;;  %v5958_v5 = vld [vmem:[#allocation28_spill] sm:$0xff]  ;;  %v5959_v20 = vmov 0  }
 0x2f0   : > { %438 = vmatprep.mubr.bf16.mxu1 %v5959_v20 }
 0x2f1   : > { %v1601_v13 = vrot.slane %v1600_v7, 2  ;;  %v1610_v40 = vrot.slane %v1609_v52, 2 }
 0x2f3   : > { %v2955_v32 = vpop.eup %2954  ;;  %v1602_v51 = vadd.f32 %v1601_v13, %v1600_v7  ;;  %v1611_v35 = vadd.f32 %v1610_v40, %v1609_v52  ;;  %v2949_v52 = vld [vmem:[%s5623_s1 + $0x28] sm:$0xff]  }
 0x2f4   : > { %v2957_v48 = vpop.eup %2956  ;;  %v967_v62 = vadd.f32 1.0, %v2955_v32  ;;  %2792 = vmatmul.mubr.msk.bf16.gmra.mrb[4].mxu1 %vm337_vm0, %v2949_v52  ;;  %v2950_v32 = vld [vmem:[#allocation7] sm:$0xff]  }
 0x2f5   : > { %v968_v63 = vadd.f32 1.0, %v2957_v48  ;;  %v1603_v21 = vrot.slane %v1602_v51, 1  ;;  %v1612_v50 = vrot.slane %v1611_v35, 1  ;;  %2832 = vmatprep.mubr.msk.bf16.mxu1 %vm337_vm0, %v2950_v32 }
 0x2f6   : > { %2958 = vrcp.f32 %v967_v62 }
 0x2f7   : > { %2960 = vrcp.f32 %v968_v63  ;;  %v1604_v28 = vadd.f32 %v1603_v21, %v1602_v51  ;;  %v1613_v23 = vadd.f32 %v1612_v50, %v1611_v35 }
 0x2f9   : > { %v2803_v57 = vmul.f32 -1.442695, %v1604_v28  ;;  %v2804_v44 = vmul.f32 -1.442695, %v1613_v23 }
 0x2fb   : > { %2962 = vpow2.f32 %v2803_v57 }
 0x2fc   : > { %2964 = vpow2.f32 %v2804_v44  ;;  %v2951_v44 = vld [vmem:[#allocation7 + $0x8] sm:$0xff]  }
 0x300   : > { %v2959_v26 = vpop.eup %2958 }
 0x301   : > { %v2961_v8 = vpop.eup %2960  ;;  %v4677_v53 = vmul.f32 %v2959_v26, %v5943_v9  ;;  %v4680_v19 = vmul.f32 %v2959_v26, %v5944_v12  ;;  %v4683_v43 = vmul.f32 %v2959_v26, %v5945_v55  ;;  %v4686_v30 = vmul.f32 %v2959_v26, %v5946_v15  ;;  %v2952_v26 = vld [vmem:[#allocation7 + $0x10] sm:$0xff]  }
 0x302   : > { %v4689_v22 = vmul.f32 %v2961_v8, %v5947_v58  ;;  %v4692_v36 = vmul.f32 %v2961_v8, %v5948_v38  ;;  %v4695_v46 = vmul.f32 %v2961_v8, %v5949_v1  ;;  %v4698_v6 = vmul.f32 %v2961_v8, %v5950_v33 }
 0x304   : > { %v984_v56 = vadd.f32 %v4689_v22, %v4677_v53  ;;  %v981_v18 = vadd.f32 %v4692_v36, %v4680_v19  ;;  %v987_v14 = vadd.f32 %v4695_v46, %v4683_v43  ;;  %v990_v34 = vadd.f32 %v4698_v6, %v4686_v30 }
 0x305   : > { %v2963_v54 = vpop.eup %2962 }
 0x306   : > { %v2965_v17 = vpop.eup %2964  ;;  %v1620_v10 = vadd.f32 1.0, %v2963_v54  ;;  %985 = vadd.xlane.f32.xlu1 %v984_v56  ;;  %982 = vadd.xlane.f32.xlu0 %v981_v18  ;;  %v2953_v18 = vld [vmem:[#allocation7 + $0x18] sm:$0xff]  }
 0x307   : > { %v1621_v42 = vadd.f32 1.0, %v2965_v17 }
 0x308   : > { %2966 = vrcp.f32 %v1620_v10 }
 0x309   : > { %2968 = vrcp.f32 %v1621_v42 }
 0x30a   : > { %988 = vadd.xlane.f32.xlu0 %v987_v14 }
 0x30e   : > { %991 = vadd.xlane.f32.xlu0 %v990_v34 }
 0x312   : > { %v2967_v2 = vpop.eup %2966 }
 0x313   : > { %v2969_v39 = vpop.eup %2968  ;;  %v4712_v45 = vmul.f32 %v2967_v2, %v5951_v0  ;;  %v4715_v47 = vmul.f32 %v2967_v2, %v5952_v4  ;;  %v4718_v29 = vmul.f32 %v2967_v2, %v5953_v11  ;;  %v4721_v25 = vmul.f32 %v2967_v2, %v5954_v60  ;;  %v3002_v0 = vld [vmem:[%s5626_s4 + $0x8] sm:$0xff]  ;;  %v3003_v4 = vld [vmem:[%s5626_s4] sm:$0xff]  ;;  %v3004_v11 = vld [vmem:[%s5626_s4 + $0x10] sm:$0xff] }
 0x314   : > { %v4725_v49 = vmul.f32 %v2969_v39, %v5955_v37  ;;  %v4728_v27 = vmul.f32 %v2969_v39, %v5956_v31  ;;  %v4731_v3 = vmul.f32 %v2969_v39, %v5957_v59  ;;  %v4734_v61 = vmul.f32 %v2969_v39, %v5958_v5  ;;  %v3005_v60 = vld [vmem:[%s5626_s4 + $0x18] sm:$0xff]  ;;  %v3006_v37 = vld [vmem:[%s5626_s4 + $0x20] sm:$0xff]  ;;  %v3007_v31 = vld [vmem:[%s5626_s4 + $0x28] sm:$0xff] }
 0x315   : > { %v3186_v39 = vmov 2   ;;  %v3008_v59 = vld [vmem:[%s5626_s4 + $0x30] sm:$0xff]  ;;  %v3009_v5 = vld [vmem:[%s5626_s4 + $0x38] sm:$0xff] }
 0x316   : > { %v1637_v24 = vadd.f32 %v4725_v49, %v4712_v45  ;;  %v1634_v7 = vadd.f32 %v4728_v27, %v4715_v47  ;;  %v1643_v13 = vadd.f32 %v4731_v3, %v4718_v29  ;;  %v1640_v40 = vadd.f32 %v4734_v61, %v4721_v25  ;;  %2940 = vset.pattern.permute.xlu1 %v3186_v39 }
 0x317   : > { %2939 = vset.pattern.permute.xlu0 %v3186_v39 }
 0x318   : > { %1638 = vadd.xlane.f32.xlu0 %v1637_v24  ;;  %1635 = vadd.xlane.f32.xlu1 %v1634_v7 }
 0x31c   : > { %1644 = vadd.xlane.f32.xlu0 %v1643_v13  ;;  %1641 = vadd.xlane.f32.xlu1 %v1640_v40 }
 0x32d   : > { %2195 = vperm.xlu1 %2940, %v3002_v0  }
 0x331   : > { %2199 = vperm.xlu1 %2940, %v3004_v11  }
 0x332   : > { %2191 = vperm.xlu0 %2939, %v3003_v4  }
 0x335   : > { %2631 = vperm.xlu1 %2940, %v3006_v37  }
 0x336   : > { %2203 = vperm.xlu0 %2939, %v3005_v60  }
 0x339   : > { %2639 = vperm.xlu1 %2940, %v3008_v59  }
 0x33a   : > { %2635 = vperm.xlu0 %2939, %v3007_v31  }
 0x33d   : > { %2941 = vset.pattern.permute.xlu1 %v5959_v20 }
 0x33e   : > { %2643 = vperm.xlu0 %2939, %v3009_v5  }
 0x342   : > { %2942 = vset.pattern.permute.xlu0 %v5959_v20 }
 0x393   : > { %v986_v51 = vpop.xlane.xlu1 %985  ;;  %v983_v35 = vpop.xlane.xlu0 %982 }
 0x394   : > { %v994_v48 = vmul.f32 0.00390625, %v986_v51  ;;  %v993_v62 = vmul.f32 0.00390625, %v983_v35 }
 0x396   : > { %v1001_v63 = vpack.c.bf16 %v994_v48, %v993_v62 }
 0x397   : > { %v989_v21 = vpop.xlane.xlu0 %988 }
 0x398   : > { %2828 = vmatprep.subr.bf16.mxu1 %v1001_v63  ;;  %v995_v28 = vmul.f32 0.00390625, %v989_v21 }
 0x399   : > { %2829 = vmatpush3.bf16.msra.mxu1 %v1001_v63 }
 0x39b   : > { %v992_v50 = vpop.xlane.xlu0 %991 }
 0x39c   : > { %v996_v23 = vmul.f32 0.00390625, %v992_v50 }
 0x39e   : > { %v1002_v57 = vpack.c.bf16 %v996_v23, %v995_v28 }
 0x3a0   : > { %2830 = vmatprep.subr.bf16.mxu1 %v1002_v57 }
 0x3a1   : > { %2831 = vmatpush3.bf16.msra.mxu1 %v1002_v57 }
 0x3a4   : > { %2833 = vmatmul.mubr.msk.bf16.vlgmr.msra.gmra.mrb[8].mxu1 %vm337_vm0, %v2951_v44 }
 0x3a5   : > { %v1636_v8 = vpop.xlane.xlu1 %1635  ;;  %v1639_v9 = vpop.xlane.xlu0 %1638  ;;  %2840 = vmatprep.mubr.msk.bf16.mxu1 %vm337_vm0, %v2952_v26 }
 0x3a6   : > { %v1646_v12 = vmul.f32 0.00390625, %v1636_v8  ;;  %v1647_v55 = vmul.f32 0.00390625, %v1639_v9 }
 0x3a8   : > { %v1655_v15 = vpack.c.bf16 %v1647_v55, %v1646_v12 }
 0x3a9   : > { %v1642_v58 = vpop.xlane.xlu1 %1641  ;;  %v1645_v38 = vpop.xlane.xlu0 %1644 }
 0x3aa   : > { %v1648_v1 = vmul.f32 0.00390625, %v1642_v58  ;;  %v1649_v33 = vmul.f32 0.00390625, %v1645_v38  ;;  %2836 = vmatprep.subr.bf16.mxu1 %v1655_v15 }
 0x3ab   : > { %2837 = vmatpush3.bf16.msra.mxu1 %v1655_v15 }
 0x3ac   : > { %v1656_v56 = vpack.c.bf16 %v1649_v33, %v1648_v1 }
 0x3ae   : > { %2838 = vmatprep.subr.bf16.mxu1 %v1656_v56 }
 0x3af   : > { %2839 = vmatpush3.bf16.msra.mxu1 %v1656_v56 }
 0x3b2   : > { %2841 = vmatmul.mubr.msk.bf16.vlgmr.msra.gmra.mrb[12].mxu1 %vm337_vm0, %v2953_v18 }
 0x3b7   : > { %v4753_v54 = vpop.f32.mrb[0].mxu1 }
 0x3b8   : > { %v4755_v17 = vpop.f32.mrb[1].mxu1 }
 0x3b9   : > { %v4757_v10 = vpop.f32.mrb[2].mxu1 }
 0x3ba   : > { %v4759_v42 = vpop.f32.mrb[3].mxu1 }
 0x3bb   : > { %5960 = vst [vmem:[#allocation48_spill] sm:$0xff] %v4759_v42  ;;  %v1978_v42 = vld [vmem:[#allocation9 + $0x3a0] sm:$0xff] }
 0x3c7   : > { %v4761_v14 = vpop.f32.mrb[4].mxu1 }
 0x3c8   : > { %v4763_v34 = vpop.f32.mrb[5].mxu1 }
 0x3c9   : > { %v4765_v16 = vpop.f32.mrb[6].mxu1 }
 0x3ca   : > { %v4767_v2 = vpop.f32.mrb[7].mxu1 }
 0x477   : > { %v2834_v24 = vpop.f32.mrb[8].mxu1 }
 0x478   : > { %v2801_v7 = vmul.f32 -1.442695, %v2834_v24  ;;  %v1053_v52 = vpop.f32.mrb[9].mxu1 }
 0x479   : > { %v2799_v13 = vmul.f32 -1.442695, %v1053_v52  ;;  %v2835_v40 = vpop.f32.mrb[10].mxu1  ;;  %v4798_v52 = vpop.permute.xlu1 %2195 }
 0x47a   : > { %2970 = vpow2.f32 %v2801_v7  ;;  %v2802_v32 = vmul.f32 -1.442695, %v2835_v40  ;;  %v1056_v51 = vpop.f32.mrb[11].mxu1 }
 0x47b   : > { %2972 = vpow2.f32 %v2799_v13  ;;  %v2800_v35 = vmul.f32 -1.442695, %v1056_v51 }
 0x47c   : > { %2974 = vpow2.f32 %v2802_v32 }
 0x47d   : > { %2976 = vpow2.f32 %v2800_v35  ;;  %v4800_v13 = vpop.permute.xlu1 %2199 }
 0x484   : > { %v2971_v48 = vpop.eup %2970 }
 0x485   : > { %v2973_v62 = vpop.eup %2972  ;;  %v1082_v63 = vadd.f32 1.0, %v2971_v48  ;;  %v2842_v21 = vpop.f32.mrb[12].mxu1 }
 0x486   : > { %v2975_v50 = vpop.eup %2974  ;;  %v1080_v28 = vadd.f32 1.0, %v2973_v62  ;;  %v1707_v23 = vpop.f32.mrb[13].mxu1  ;;  %v2811_v57 = vmul.f32 -1.442695, %v2842_v21 }
 0x487   : > { %v2977_v20 = vpop.eup %2976  ;;  %2978 = vrcp.f32 %v1082_v63  ;;  %v2843_v44 = vpop.f32.mrb[14].mxu1  ;;  %v2809_v8 = vmul.f32 -1.442695, %v1707_v23  ;;  %v1083_v12 = vadd.f32 1.0, %v2975_v50 }
 0x488   : > { %v1081_v26 = vadd.f32 1.0, %v2977_v20  ;;  %v1710_v9 = vpop.f32.mrb[15].mxu1  ;;  %2980 = vrcp.f32 %v1080_v28  ;;  %v2812_v55 = vmul.f32 -1.442695, %v2843_v44 }
 0x489   : > { %v2810_v15 = vmul.f32 -1.442695, %v1710_v9 }
 0x48a   : > { %2982 = vrcp.f32 %v1081_v26 }
 0x48b   : > { %2984 = vpow2.f32 %v2811_v57 }
 0x48c   : > { %2986 = vpow2.f32 %v2809_v8 }
 0x48d   : > { %2988 = vrcp.f32 %v1083_v12 }
 0x48e   : > { %2990 = vpow2.f32 %v2812_v55 }
 0x48f   : > { %2992 = vpow2.f32 %v2810_v15 }
 0x491   : > { %v2979_v58 = vpop.eup %2978 }
 0x492   : > { %1104 = vperm.xlu1 %2941, %v2979_v58   ;;  %v2981_v38 = vpop.eup %2980 }
 0x494   : > { %v2983_v1 = vpop.eup %2982 }
 0x495   : > { %v2985_v33 = vpop.eup %2984  ;;  %1099 = vperm.xlu0 %2942, %v2983_v1  }
 0x496   : > { %v2987_v56 = vpop.eup %2986  ;;  %v1736_v18 = vadd.f32 1.0, %v2985_v33  ;;  %1094 = vperm.xlu1 %2941, %v2981_v38  }
 0x497   : > { %v2989_v0 = vpop.eup %2988  ;;  %v1734_v4 = vadd.f32 1.0, %v2987_v56 }
 0x498   : > { %2994 = vrcp.f32 %v1736_v18  ;;  %v2991_v11 = vpop.eup %2990 }
 0x499   : > { %2943 = vset.pattern.permute.xlu0 %v3186_v39  ;;  %2996 = vrcp.f32 %v1734_v4  ;;  %v1737_v60 = vadd.f32 1.0, %v2991_v11  ;;  %v2993_v37 = vpop.eup %2992  ;;  %v4802_v39 = vpop.permute.xlu1 %2631 }
 0x49a   : > { %1109 = vperm.xlu1 %2941, %v2989_v0   ;;  %v1735_v31 = vadd.f32 1.0, %v2993_v37  ;;  %5961 = vst [vmem:[#allocation51_spill] sm:$0xff] %v4802_v39 }
 0x49b   : > { %2998 = vrcp.f32 %v1737_v60 }
 0x49c   : > { %3000 = vrcp.f32 %v1735_v31 }
 0x49d   : > { %v4804_v40 = vpop.permute.xlu1 %2639 }
 0x49e   : > { %5962 = vst [vmem:[#allocation50_spill] sm:$0xff] %v4804_v40 }
 0x4a2   : > { %v2995_v59 = vpop.eup %2994 }
 0x4a3   : > { %1758 = vperm.xlu1 %2941, %v2995_v59   ;;  %v2997_v5 = vpop.eup %2996 }
 0x4a5   : > { %v2999_v24 = vpop.eup %2998 }
 0x4a6   : > { %v3001_v7 = vpop.eup %3000 }
 0x4a7   : > { %1748 = vperm.xlu1 %2941, %v2997_v5  }
 0x4ab   : > { %1763 = vperm.xlu1 %2941, %v2999_v24  }
 0x4af   : > { %1753 = vperm.xlu1 %2941, %v3001_v7  }
 0x511   : > { %v1105_v32 = vpop.permute.xlu1 %1104 }
 0x512   : > { %v1116_v62 = vmul.f32 %v1105_v32, %v4683_v43  ;;  %v1117_v23 = vmul.f32 %v1105_v32, %v4695_v46 }
 0x515   : > { %v1095_v51 = vpop.permute.xlu1 %1094 }
 0x516   : > { %v1112_v20 = vmul.f32 %v1095_v51, %v4680_v19  ;;  %v1113_v12 = vmul.f32 %v1095_v51, %v4692_v36 }
 0x519   : > { %v1110_v35 = vpop.permute.xlu1 %1109 }
 0x522   : > { %v1759_v48 = vpop.permute.xlu1 %1758 }
 0x523   : > { %v1770_v63 = vmul.f32 %v1759_v48, %v4721_v25  ;;  %v1771_v21 = vmul.f32 %v1759_v48, %v4734_v61  ;;  %v1118_v25 = vmul.f32 %v1110_v35, %v4686_v30 }
 0x525   : > { %v4809_v50 = vadd.f32 %v1770_v63, %v1116_v62  ;;  %v4816_v44 = vadd.f32 %v1771_v21, %v1117_v23  ;;  %v1834_v62 = vld [vmem:[#allocation9 + $0xa0] sm:$0xff]  ;;  %v1835_v63 = vld [vmem:[#allocation9 + $0xa8] sm:$0xff] }
 0x526   : > { %v1749_v28 = vpop.permute.xlu1 %1748 }
 0x527   : > { %v1766_v57 = vmul.f32 %v1749_v28, %v4715_v47  ;;  %1810 = vrot.lane.b32.xlu0 %v4809_v50, %s3179_s10  ;;  %v1119_v47 = vmul.f32 %v1110_v35, %v4698_v6  ;;  %v4868_v6 = vpop.permute.xlu0 %2191  ;;  %v1767_v8 = vmul.f32 %v1749_v28, %v4728_v27 }
 0x529   : > { %v4818_v26 = vadd.f32 %v1766_v57, %v1112_v20  ;;  %v4898_v55 = vadd.f32 %v1767_v8, %v1113_v12  ;;  %v1794_v57 = vld [vmem:[#allocation9 + $0x4a0] sm:$0xff] }
 0x52a   : > { %v1764_v43 = vpop.permute.xlu1 %1763 }
 0x52b   : > { %v1772_v61 = vmul.f32 %v1764_v43, %v4718_v29  ;;  %1818 = vrot.lane.b32.xlu0 %v4816_v44, %s3179_s10  ;;  %1806 = vrot.lane.b32.xlu1 %v4818_v26, %s3179_s10  ;;  %v1773_v19 = vmul.f32 %v1764_v43, %v4731_v3  ;;  %v4874_v29 = vpop.permute.xlu0 %2203  ;;  %v1795_v43 = vld [vmem:[#allocation9 + $0x4a8] sm:$0xff] }
 0x52d   : > { %v4827_v46 = vadd.f32 %v1772_v61, %v1118_v25  ;;  %v4834_v30 = vadd.f32 %v1773_v19, %v1119_v47  ;;  %v1882_v19 = vld [vmem:[#allocation9 + $0x1a0] sm:$0xff]  ;;  %v1883_v47 = vld [vmem:[#allocation9 + $0x1a8] sm:$0xff] }
 0x52e   : > { %v1754_v15 = vpop.permute.xlu1 %1753 }
 0x52f   : > { %1858 = vrot.lane.b32.xlu0 %v4809_v50, %s3181_s23  ;;  %1812 = vrot.lane.b32.xlu1 %v4827_v46, %s3179_s10  ;;  %v4884_v3 = vpop.permute.xlu0 %2635  ;;  %v1768_v58 = vmul.f32 %v1754_v15, %v4712_v45  ;;  %v1769_v38 = vmul.f32 %v1754_v15, %v4725_v49  ;;  %v1796_v15 = vld [vmem:[#allocation9 + $0x4b0] sm:$0xff] }
 0x530   : > { %5963 = vst [vmem:[#allocation53_spill] sm:$0xff] %v4884_v3 }
 0x533   : > { %1866 = vrot.lane.b32.xlu0 %v4816_v44, %s3181_s23  ;;  %1820 = vrot.lane.b32.xlu1 %v4834_v30, %s3179_s10  ;;  %v4891_v9 = vpop.permute.xlu0 %2643 }
 0x534   : > { %5965 = vst [vmem:[#allocation62_spill] sm:$0xff] %v4891_v9 }
 0x537   : > { %1906 = vrot.lane.b32.xlu0 %v4809_v50, %s3178_s28  ;;  %1860 = vrot.lane.b32.xlu1 %v4827_v46, %s3181_s23  ;;  %v1100_v27 = vpop.permute.xlu0 %1099 }
 0x538   : > { %v1114_v36 = vmul.f32 %v1100_v27, %v4677_v53  ;;  %v1115_v33 = vmul.f32 %v1100_v27, %v4689_v22  ;;  %v1797_v27 = vld [vmem:[#allocation9 + $0x4b8] sm:$0xff] }
 0x539   : > { %v1805_v3 = vmul.f32 %v1797_v27, %v4834_v30  ;;  %v1932_v27 = vld [vmem:[#allocation9 + $0x2b0] sm:$0xff] }
 0x53a   : > { %v4911_v1 = vadd.f32 %v1768_v58, %v1114_v36  ;;  %v4918_v45 = vadd.f32 %v1769_v38, %v1115_v33  ;;  %v1802_v38 = vmul.f32 %v1794_v57, %v4809_v50  ;;  %v1803_v33 = vmul.f32 %v1795_v43, %v4816_v44 }
 0x53b   : > { %1914 = vrot.lane.b32.xlu0 %v4816_v44, %s3178_s28  ;;  %1868 = vrot.lane.b32.xlu1 %v4834_v30, %s3181_s23  ;;  %v1804_v43 = vmul.f32 %v1796_v15, %v4827_v46 }
 0x53f   : > { %1954 = vrot.lane.b32.xlu0 %v4809_v50, %s3182_s25  ;;  %1908 = vrot.lane.b32.xlu1 %v4827_v46, %s3178_s28 }
 0x543   : > { %1962 = vrot.lane.b32.xlu0 %v4816_v44, %s3182_s25  ;;  %1916 = vrot.lane.b32.xlu1 %v4834_v30, %s3178_s28 }
 0x547   : > { %2002 = vrot.lane.b32.xlu0 %v4809_v50, %s3183_s16  ;;  %1956 = vrot.lane.b32.xlu1 %v4827_v46, %s3182_s25 }
 0x54b   : > { %2010 = vrot.lane.b32.xlu0 %v4816_v44, %s3183_s16  ;;  %1964 = vrot.lane.b32.xlu1 %v4834_v30, %s3182_s25 }
 0x54f   : > { %2050 = vrot.lane.b32.xlu0 %v4809_v50, %s3184_s17  ;;  %2004 = vrot.lane.b32.xlu1 %v4827_v46, %s3183_s16 }
 0x553   : > { %2058 = vrot.lane.b32.xlu0 %v4816_v44, %s3184_s17  ;;  %2012 = vrot.lane.b32.xlu1 %v4834_v30, %s3183_s16 }
 0x557   : > { %2098 = vrot.lane.b32.xlu0 %v4809_v50, %s3185_s26  ;;  %2052 = vrot.lane.b32.xlu1 %v4827_v46, %s3184_s17 }
 0x55b   : > { %2106 = vrot.lane.b32.xlu0 %v4816_v44, %s3185_s26  ;;  %2060 = vrot.lane.b32.xlu1 %v4834_v30, %s3184_s17 }
 0x55f   : > { %2146 = vrot.lane.b32.xlu0 %v4809_v50, %s5964_s13  ;;  %2100 = vrot.lane.b32.xlu1 %v4827_v46, %s3185_s26 }
 0x563   : > { %2154 = vrot.lane.b32.xlu0 %v4816_v44, %s5964_s13  ;;  %2108 = vrot.lane.b32.xlu1 %v4834_v30, %s3185_s26 }
 0x567   : > { %1814 = vrot.lane.b32.xlu0 %v4898_v55, %s3179_s10  ;;  %2148 = vrot.lane.b32.xlu1 %v4827_v46, %s5964_s13 }
 0x56b   : > { %1854 = vrot.lane.b32.xlu0 %v4818_v26, %s3181_s23  ;;  %2156 = vrot.lane.b32.xlu1 %v4834_v30, %s5964_s13 }
 0x56f   : > { %1862 = vrot.lane.b32.xlu0 %v4898_v55, %s3181_s23  ;;  %1808 = vrot.lane.b32.xlu1 %v4911_v1, %s3179_s10 }
 0x573   : > { %1902 = vrot.lane.b32.xlu0 %v4818_v26, %s3178_s28  ;;  %1816 = vrot.lane.b32.xlu1 %v4918_v45, %s3179_s10 }
 0x577   : > { %1910 = vrot.lane.b32.xlu0 %v4898_v55, %s3178_s28  ;;  %1856 = vrot.lane.b32.xlu1 %v4911_v1, %s3181_s23 }
 0x57b   : > { %1950 = vrot.lane.b32.xlu0 %v4818_v26, %s3182_s25  ;;  %1864 = vrot.lane.b32.xlu1 %v4918_v45, %s3181_s23 }
 0x57f   : > { %1958 = vrot.lane.b32.xlu0 %v4898_v55, %s3182_s25  ;;  %1904 = vrot.lane.b32.xlu1 %v4911_v1, %s3178_s28 }
 0x583   : > { %1998 = vrot.lane.b32.xlu0 %v4818_v26, %s3183_s16  ;;  %1912 = vrot.lane.b32.xlu1 %v4918_v45, %s3178_s28 }
 0x587   : > { %2006 = vrot.lane.b32.xlu0 %v4898_v55, %s3183_s16  ;;  %1952 = vrot.lane.b32.xlu1 %v4911_v1, %s3182_s25 }
 0x58b   : > { %2046 = vrot.lane.b32.xlu0 %v4818_v26, %s3184_s17  ;;  %1960 = vrot.lane.b32.xlu1 %v4918_v45, %s3182_s25 }
 0x58f   : > { %2054 = vrot.lane.b32.xlu0 %v4898_v55, %s3184_s17  ;;  %2000 = vrot.lane.b32.xlu1 %v4911_v1, %s3183_s16 }
 0x593   : > { %2094 = vrot.lane.b32.xlu0 %v4818_v26, %s3185_s26  ;;  %2008 = vrot.lane.b32.xlu1 %v4918_v45, %s3183_s16 }
 0x597   : > { %2102 = vrot.lane.b32.xlu0 %v4898_v55, %s3185_s26  ;;  %2048 = vrot.lane.b32.xlu1 %v4911_v1, %s3184_s17 }
 0x599   : > { %v1811_v53 = vpop.permute.xlu0 %1810 }
 0x59b   : > { %2142 = vrot.lane.b32.xlu0 %v4818_v26, %s5964_s13  ;;  %2056 = vrot.lane.b32.xlu1 %v4918_v45, %s3184_s17 }
 0x59d   : > { %v4964_v22 = vpop.permute.xlu1 %1806  ;;  %v1819_v49 = vpop.permute.xlu0 %1818 }
 0x59e   : > { %v1824_v21 = vsel %vm500_vm1, %v1811_v53, %v1819_v49  ;;  %v1828_v28 = vsel %vm500_vm1, %v1819_v49, %v1811_v53  ;;  %v1836_v53 = vld [vmem:[#allocation9 + $0xb0] sm:$0xff]  ;;  %v1837_v49 = vld [vmem:[#allocation9 + $0xb8] sm:$0xff] }
 0x59f   : > { %2150 = vrot.lane.b32.xlu0 %v4898_v55, %s5964_s13  ;;  %2096 = vrot.lane.b32.xlu1 %v4911_v1, %s3185_s26  ;;  %v1842_v25 = vmul.f32 %v1834_v62, %v1828_v28  ;;  %v1843_v61 = vmul.f32 %v1835_v63, %v1824_v21 }
 0x5a1   : > { %v1813_v56 = vpop.permute.xlu1 %1812  ;;  %v1859_v18 = vpop.permute.xlu0 %1858  ;;  %v1850_v57 = vadd.f32 %v1842_v25, %v1802_v38  ;;  %v1851_v44 = vadd.f32 %v1843_v61, %v1803_v33 }
 0x5a3   : > { %2104 = vrot.lane.b32.xlu1 %v4918_v45, %s3185_s26 }
 0x5a5   : > { %v1821_v0 = vpop.permute.xlu1 %1820  ;;  %v1867_v4 = vpop.permute.xlu0 %1866 }
 0x5a6   : > { %v1872_v8 = vsel %vm549_vm2, %v1859_v18, %v1867_v4  ;;  %v1876_v12 = vsel %vm549_vm2, %v1867_v4, %v1859_v18  ;;  %v1825_v62 = vsel %vm500_vm1, %v1813_v56, %v1821_v0  ;;  %v1829_v63 = vsel %vm500_vm1, %v1821_v0, %v1813_v56  ;;  %v1930_v18 = vld [vmem:[#allocation9 + $0x2a0] sm:$0xff]  ;;  %v1931_v4 = vld [vmem:[#allocation9 + $0x2a8] sm:$0xff] }
 0x5a7   : > { %2144 = vrot.lane.b32.xlu1 %v4911_v1, %s5964_s13  ;;  %v1890_v21 = vmul.f32 %v1882_v19, %v1876_v12  ;;  %v1891_v28 = vmul.f32 %v1883_v47, %v1872_v8  ;;  %v1844_v40 = vmul.f32 %v1836_v53, %v1829_v63  ;;  %v1845_v39 = vmul.f32 %v1837_v49, %v1825_v62  ;;  %v1979_v56 = vld [vmem:[#allocation9 + $0x3a8] sm:$0xff]  ;;  %v2026_v49 = vld [vmem:[#allocation9 + $0x5a0] sm:$0xff] }
 0x5a8   : > { %v2027_v62 = vld [vmem:[#allocation9 + $0x5a8] sm:$0xff] }
 0x5a9   : > { %v1861_v11 = vpop.permute.xlu1 %1860  ;;  %v1907_v60 = vpop.permute.xlu0 %1906  ;;  %v1898_v12 = vadd.f32 %v1890_v21, %v1850_v57  ;;  %v1899_v15 = vadd.f32 %v1891_v28, %v1851_v44  ;;  %v1853_v63 = vadd.f32 %v1845_v39, %v1805_v3 }
 0x5ab   : > { %2152 = vrot.lane.b32.xlu1 %v4918_v45, %s5964_s13 }
 0x5ad   : > { %v1869_v37 = vpop.permute.xlu1 %1868  ;;  %v1915_v31 = vpop.permute.xlu0 %1914 }
 0x5ae   : > { %v1920_v9 = vsel %vm599_vm3, %v1907_v60, %v1915_v31  ;;  %v1924_v50 = vsel %vm599_vm3, %v1915_v31, %v1907_v60  ;;  %v1884_v60 = vld [vmem:[#allocation9 + $0x1b0] sm:$0xff]  ;;  %v1885_v31 = vld [vmem:[#allocation9 + $0x1b8] sm:$0xff]  ;;  %v1873_v46 = vsel %vm549_vm2, %v1861_v11, %v1869_v37  ;;  %v1877_v30 = vsel %vm549_vm2, %v1869_v37, %v1861_v11 }
 0x5af   : > { %v1938_v25 = vmul.f32 %v1930_v18, %v1924_v50  ;;  %v1939_v61 = vmul.f32 %v1931_v4, %v1920_v9  ;;  %v1852_v37 = vadd.f32 %v1844_v40, %v1804_v43  ;;  %v1892_v21 = vmul.f32 %v1884_v60, %v1877_v30  ;;  %v2075_v50 = vld [vmem:[#allocation9 + $0x6a8] sm:$0xff]  ;;  %v2122_v43 = vld [vmem:[#allocation9 + $0x7a0] sm:$0xff] }
 0x5b0   : > { %v1893_v28 = vmul.f32 %v1885_v31, %v1873_v46  ;;  %v1980_v31 = vld [vmem:[#allocation9 + $0x3b0] sm:$0xff]  ;;  %v1981_v46 = vld [vmem:[#allocation9 + $0x3b8] sm:$0xff] }
 0x5b1   : > { %v1909_v59 = vpop.permute.xlu1 %1908  ;;  %v1955_v5 = vpop.permute.xlu0 %1954 }
 0x5b5   : > { %v1917_v24 = vpop.permute.xlu1 %1916  ;;  %v1963_v7 = vpop.permute.xlu0 %1962 }
 0x5b6   : > { %v1968_v0 = vsel %vm649_vm4, %v1955_v5, %v1963_v7  ;;  %v1972_v19 = vsel %vm649_vm4, %v1963_v7, %v1955_v5  ;;  %v1921_v38 = vsel %vm599_vm3, %v1909_v59, %v1917_v24  ;;  %v1925_v5 = vsel %vm599_vm3, %v1917_v24, %v1909_v59  ;;  %v1933_v7 = vld [vmem:[#allocation9 + $0x2b8] sm:$0xff] }
 0x5b7   : > { %v1986_v33 = vmul.f32 %v1978_v42, %v1972_v19  ;;  %v1987_v53 = vmul.f32 %v1979_v56, %v1968_v0  ;;  %v1946_v59 = vadd.f32 %v1938_v25, %v1898_v12  ;;  %v1947_v24 = vadd.f32 %v1939_v61, %v1899_v15  ;;  %v2074_v42 = vld [vmem:[#allocation9 + $0x6a0] sm:$0xff]  ;;  %v2123_v0 = vld [vmem:[#allocation9 + $0x7a8] sm:$0xff] }
 0x5b8   : > { %v1940_v56 = vmul.f32 %v1932_v27, %v1925_v5  ;;  %v1900_v15 = vadd.f32 %v1892_v21, %v1852_v37  ;;  %v1901_v27 = vadd.f32 %v1893_v28, %v1853_v63  ;;  %v2170_v37 = vld [vmem:[#allocation9 + $0x8a0] sm:$0xff]  ;;  %v2171_v63 = vld [vmem:[#allocation9 + $0x8a8] sm:$0xff] }
 0x5b9   : > { %v4976_v32 = vpop.permute.xlu1 %1956  ;;  %v4978_v51 = vpop.permute.xlu0 %2002  ;;  %v1994_v3 = vadd.f32 %v1986_v33, %v1946_v59 }
 0x5bd   : > { %v4980_v35 = vpop.permute.xlu1 %1964  ;;  %v2011_v48 = vpop.permute.xlu0 %2010 }
 0x5be   : > { %v2016_v11 = vsel %vm699_vm5, %v4978_v51, %v2011_v48  ;;  %v2020_v9 = vsel %vm699_vm5, %v2011_v48, %v4978_v51  ;;  %v1941_v51 = vmul.f32 %v1933_v7, %v1921_v38  ;;  %v1995_v48 = vadd.f32 %v1987_v53, %v1947_v24  ;;  %v2028_v38 = vld [vmem:[#allocation9 + $0x5b0] sm:$0xff] }
 0x5bf   : > { %v2034_v40 = vmul.f32 %v2026_v49, %v2016_v11  ;;  %v2035_v39 = vmul.f32 %v2027_v62, %v2020_v9  ;;  %v1948_v49 = vadd.f32 %v1940_v56, %v1900_v15 }
 0x5c0   : > { %v1949_v62 = vadd.f32 %v1941_v51, %v1901_v27 }
 0x5c1   : > { %v4986_v23 = vpop.permute.xlu1 %2004  ;;  %v4988_v20 = vpop.permute.xlu0 %2050  ;;  %v2042_v33 = vadd.f32 %v2034_v40, %v1994_v3 }
 0x5c5   : > { %v4994_v58 = vpop.permute.xlu1 %2012  ;;  %v2059_v36 = vpop.permute.xlu0 %2058 }
 0x5c6   : > { %v2064_v57 = vsel %vm749_vm6, %v4988_v20, %v2059_v36  ;;  %v2068_v44 = vsel %vm749_vm6, %v2059_v36, %v4988_v20  ;;  %v1969_v20 = vsel %vm649_vm4, %v4976_v32, %v4980_v35  ;;  %v1973_v36 = vsel %vm649_vm4, %v4980_v35, %v4976_v32 }
 0x5c7   : > { %v2082_v30 = vmul.f32 %v2074_v42, %v2064_v57  ;;  %v2083_v25 = vmul.f32 %v2075_v50, %v2068_v44  ;;  %v2017_v5 = vsel %vm699_vm5, %v4986_v23, %v4994_v58  ;;  %v2021_v7 = vsel %vm699_vm5, %v4994_v58, %v4986_v23  ;;  %v2076_v50 = vld [vmem:[#allocation9 + $0x6b0] sm:$0xff]  ;;  %v2077_v57 = vld [vmem:[#allocation9 + $0x6b8] sm:$0xff] }
 0x5c8   : > { %v2043_v32 = vadd.f32 %v2035_v39, %v1995_v48  ;;  %v1988_v11 = vmul.f32 %v1980_v31, %v1973_v36  ;;  %v1989_v9 = vmul.f32 %v1981_v46, %v1969_v20  ;;  %v2036_v21 = vmul.f32 %v2028_v38, %v2017_v5  ;;  %v2172_v5 = vld [vmem:[#allocation9 + $0x8b0] sm:$0xff] }
 0x5c9   : > { %v5012_v47 = vpop.permute.xlu1 %2052  ;;  %v2099_v8 = vpop.permute.xlu0 %2098 }
 0x5ca   : > { %v2091_v59 = vadd.f32 %v2083_v25, %v2043_v32  ;;  %v1996_v48 = vadd.f32 %v1988_v11, %v1948_v49 }
 0x5cc   : > { %v2044_v25 = vadd.f32 %v2036_v21, %v1996_v48 }
 0x5cd   : > { %v2061_v18 = vpop.permute.xlu1 %2060  ;;  %v2107_v4 = vpop.permute.xlu0 %2106 }
 0x5ce   : > { %v2112_v19 = vsel %vm799_vm7, %v2099_v8, %v2107_v4  ;;  %v2116_v60 = vsel %vm799_vm7, %v2107_v4, %v2099_v8  ;;  %v2029_v8 = vld [vmem:[#allocation9 + $0x5b8] sm:$0xff]  ;;  %v2090_v4 = vadd.f32 %v2082_v30, %v2042_v33  ;;  %v2065_v23 = vsel %vm749_vm6, %v5012_v47, %v2061_v18 }
 0x5cf   : > { %v2130_v35 = vmul.f32 %v2122_v43, %v2112_v19  ;;  %v2131_v53 = vmul.f32 %v2123_v0, %v2116_v60  ;;  %v2037_v28 = vmul.f32 %v2029_v8, %v2021_v7  ;;  %v2069_v58 = vsel %vm749_vm6, %v2061_v18, %v5012_v47  ;;  %v2124_v0 = vld [vmem:[#allocation9 + $0x7b0] sm:$0xff]  ;;  %v2125_v19 = vld [vmem:[#allocation9 + $0x7b8] sm:$0xff] }
 0x5d0   : > { %v1997_v43 = vadd.f32 %v1989_v9, %v1949_v62  ;;  %v2084_v18 = vmul.f32 %v2076_v50, %v2065_v23  ;;  %v2085_v31 = vmul.f32 %v2077_v57, %v2069_v58  ;;  %v2173_v7 = vld [vmem:[#allocation9 + $0x8b8] sm:$0xff] }
 0x5d1   : > { %v2101_v61 = vpop.permute.xlu1 %2100  ;;  %v2147_v12 = vpop.permute.xlu0 %2146  ;;  %v2138_v51 = vadd.f32 %v2130_v35, %v2090_v4  ;;  %v2139_v40 = vadd.f32 %v2131_v53, %v2091_v59 }
 0x5d2   : > { %v2092_v33 = vadd.f32 %v2084_v18, %v2044_v25  ;;  %v1791_v18 = vld [vmem:[#allocation9 + $0x488] sm:$0xff] }
 0x5d5   : > { %v2109_v24 = vpop.permute.xlu1 %2108  ;;  %v2155_v42 = vpop.permute.xlu0 %2154 }
 0x5d6   : > { %v2160_v44 = vsel %vm849_vm8, %v2147_v12, %v2155_v42  ;;  %v2164_v56 = vsel %vm849_vm8, %v2155_v42, %v2147_v12  ;;  %v2113_v60 = vsel %vm799_vm7, %v2101_v61, %v2109_v24  ;;  %v2117_v47 = vsel %vm799_vm7, %v2109_v24, %v2101_v61 }
 0x5d7   : > { %v2178_v39 = vmul.f32 %v2170_v37, %v2160_v44  ;;  %v2179_v3 = vmul.f32 %v2171_v63, %v2164_v56  ;;  %v2045_v12 = vadd.f32 %v2037_v28, %v1997_v43  ;;  %v2132_v15 = vmul.f32 %v2124_v0, %v2113_v60  ;;  %v1830_v43 = vld [vmem:[#allocation9 + $0x80] sm:$0xff]  ;;  %v1831_v0 = vld [vmem:[#allocation9 + $0x88] sm:$0xff] }
 0x5d8   : > { %v2133_v27 = vmul.f32 %v2125_v19, %v2117_v47  ;;  %v1790_v47 = vld [vmem:[#allocation9 + $0x480] sm:$0xff] }
 0x5d9   : > { %v2186_v46 = vadd.f32 %v2178_v39, %v2138_v51  ;;  %v2187_v20 = vadd.f32 %v2179_v3, %v2139_v40  ;;  %v2149_v36 = vpop.permute.xlu1 %2148  ;;  %v1815_v30 = vpop.permute.xlu0 %1814  ;;  %v2093_v32 = vadd.f32 %v2085_v31, %v2045_v12  ;;  %v2140_v9 = vadd.f32 %v2132_v15, %v2092_v33  ;;  %v1878_v31 = vld [vmem:[#allocation9 + $0x180] sm:$0xff]  ;;  %v1879_v15 = vld [vmem:[#allocation9 + $0x188] sm:$0xff] }
 0x5da   : > { %v1822_v19 = vsel %vm500_vm1, %v4964_v22, %v1815_v30  ;;  %v1826_v60 = vsel %vm500_vm1, %v1815_v30, %v4964_v22  ;;  %v1793_v30 = vld [vmem:[#allocation9 + $0x498] sm:$0xff]  ;;  %v1926_v33 = vld [vmem:[#allocation9 + $0x280] sm:$0xff] }
 0x5db   : > { %v2210_v38 = vadd.f32 %v4800_v13, %v2186_v46  ;;  %v2211_v8 = vadd.f32 %v4800_v13, %v2187_v20  ;;  %v2141_v13 = vadd.f32 %v2133_v27, %v2093_v32  ;;  %v1838_v25 = vmul.f32 %v1830_v43, %v1826_v60  ;;  %v1832_v27 = vld [vmem:[#allocation9 + $0x90] sm:$0xff] }
 0x5dc   : > { %v1839_v12 = vmul.f32 %v1831_v0, %v1822_v19  ;;  %v2022_v19 = vld [vmem:[#allocation9 + $0x580] sm:$0xff]  ;;  %v1880_v60 = vld [vmem:[#allocation9 + $0x190] sm:$0xff] }
 0x5dd   : > { %v5071_v61 = vmul.f32 %v2210_v38, %v4761_v14  ;;  %v5074_v35 = vmul.f32 %v2211_v8, %v4763_v34  ;;  %v2157_v53 = vpop.permute.xlu1 %2156  ;;  %v1855_v49 = vpop.permute.xlu0 %1854  ;;  %v1798_v8 = vmul.f32 %v1790_v47, %v4818_v26  ;;  %v2023_v47 = vld [vmem:[#allocation9 + $0x588] sm:$0xff] }
 0x5de   : > { %v2161_v62 = vsel %vm849_vm8, %v2149_v36, %v2157_v53  ;;  %v2165_v11 = vsel %vm849_vm8, %v2157_v53, %v2149_v36 }
 0x5df   : > { %v2180_v37 = vmul.f32 %v2172_v5, %v2161_v62  ;;  %v2181_v63 = vmul.f32 %v2173_v7, %v2165_v11  ;;  %2250 = vrot.lane.b32.xlu1 %v5071_v61, %s3179_s10  ;;  %v1799_v5 = vmul.f32 %v1791_v18, %v4898_v55  ;;  %v1801_v62 = vmul.f32 %v1793_v30, %v4918_v45  ;;  %v1927_v11 = vld [vmem:[#allocation9 + $0x288] sm:$0xff]  ;;  %v1974_v55 = vld [vmem:[#allocation9 + $0x380] sm:$0xff] }
 0x5e1   : > { %v2188_v14 = vadd.f32 %v2180_v37, %v2140_v9  ;;  %v2189_v21 = vadd.f32 %v2181_v63, %v2141_v13  ;;  %v5082_v28 = vpop.permute.xlu1 %1808  ;;  %v1863_v34 = vpop.permute.xlu0 %1862  ;;  %v1846_v63 = vadd.f32 %v1838_v25, %v1798_v8  ;;  %v1847_v26 = vadd.f32 %v1839_v12, %v1799_v5 }
 0x5e2   : > { %v1874_v46 = vsel %vm549_vm2, %v1863_v34, %v1855_v49  ;;  %v1870_v22 = vsel %vm549_vm2, %v1855_v49, %v1863_v34  ;;  %v1792_v49 = vld [vmem:[#allocation9 + $0x490] sm:$0xff]  ;;  %v1833_v34 = vld [vmem:[#allocation9 + $0x98] sm:$0xff] }
 0x5e3   : > { %v2212_v4 = vadd.f32 %v4874_v29, %v2188_v14  ;;  %v2213_v59 = vadd.f32 %v4874_v29, %v2189_v21  ;;  %2258 = vrot.lane.b32.xlu1 %v5074_v35, %s3179_s10  ;;  %v1886_v7 = vmul.f32 %v1878_v31, %v1874_v46  ;;  %v1887_v53 = vmul.f32 %v1879_v15, %v1870_v22  ;;  %v2070_v15 = vld [vmem:[#allocation9 + $0x680] sm:$0xff] }
 0x5e4   : > { %v1800_v43 = vmul.f32 %v1792_v49, %v4911_v1  ;;  %v2119_v49 = vld [vmem:[#allocation9 + $0x788] sm:$0xff] }
 0x5e5   : > { %v5089_v24 = vmul.f32 %v2212_v4, %v4765_v16  ;;  %v5092_v42 = vmul.f32 %v2213_v59, %v4767_v2  ;;  %v5094_v50 = vpop.permute.xlu1 %1816  ;;  %v1903_v57 = vpop.permute.xlu0 %1902  ;;  %v1975_v59 = vld [vmem:[#allocation9 + $0x388] sm:$0xff] }
 0x5e6   : > { %v1827_v38 = vsel %vm500_vm1, %v5094_v50, %v5082_v28  ;;  %v1823_v45 = vsel %vm500_vm1, %v5082_v28, %v5094_v50  ;;  %v1895_v50 = vadd.f32 %v1887_v53, %v1847_v26 }
 0x5e7   : > { %2252 = vrot.lane.b32.xlu0 %v5089_v24, %s3179_s10  ;;  %2298 = vrot.lane.b32.xlu1 %v5071_v61, %s3181_s23  ;;  %v1840_v14 = vmul.f32 %v1832_v27, %v1827_v38  ;;  %v1841_v46 = vmul.f32 %v1833_v34, %v1823_v45  ;;  %v2071_v38 = vld [vmem:[#allocation9 + $0x688] sm:$0xff] }
 0x5e9   : > { %v5100_v23 = vpop.permute.xlu1 %1856  ;;  %v1911_v29 = vpop.permute.xlu0 %1910  ;;  %v1848_v25 = vadd.f32 %v1840_v14, %v1800_v43  ;;  %v1928_v14 = vld [vmem:[#allocation9 + $0x290] sm:$0xff]  ;;  %v1849_v34 = vadd.f32 %v1841_v46, %v1801_v62  ;;  %v2166_v43 = vld [vmem:[#allocation9 + $0x880] sm:$0xff] }
 0x5ea   : > { %v1922_v32 = vsel %vm599_vm3, %v1911_v29, %v1903_v57  ;;  %v1918_v9 = vsel %vm599_vm3, %v1903_v57, %v1911_v29  ;;  %v1894_v29 = vadd.f32 %v1886_v7, %v1846_v63  ;;  %v2118_v7 = vld [vmem:[#allocation9 + $0x780] sm:$0xff] }
 0x5eb   : > { %2260 = vrot.lane.b32.xlu0 %v5092_v42, %s3179_s10  ;;  %2306 = vrot.lane.b32.xlu1 %v5074_v35, %s3181_s23  ;;  %v1934_v4 = vmul.f32 %v1926_v33, %v1922_v32  ;;  %v1935_v0 = vmul.f32 %v1927_v11, %v1918_v9  ;;  %v1881_v32 = vld [vmem:[#allocation9 + $0x198] sm:$0xff] }
 0x5ed   : > { %v5106_v16 = vpop.permute.xlu1 %1864  ;;  %v1951_v2 = vpop.permute.xlu0 %1950  ;;  %v1942_v30 = vadd.f32 %v1934_v4, %v1894_v29 }
 0x5ee   : > { %v1871_v53 = vsel %vm549_vm2, %v5100_v23, %v5106_v16 }
 0x5ef   : > { %2300 = vrot.lane.b32.xlu0 %v5089_v24, %s3181_s23  ;;  %2346 = vrot.lane.b32.xlu1 %v5071_v61, %s3178_s28 }
 0x5f1   : > { %v5112_v58 = vpop.permute.xlu1 %1904  ;;  %v1959_v44 = vpop.permute.xlu0 %1958 }
 0x5f2   : > { %v1970_v21 = vsel %vm649_vm4, %v1959_v44, %v1951_v2  ;;  %v1966_v57 = vsel %vm649_vm4, %v1951_v2, %v1959_v44  ;;  %v1875_v2 = vsel %vm549_vm2, %v5106_v16, %v5100_v23 }
 0x5f3   : > { %2308 = vrot.lane.b32.xlu0 %v5092_v42, %s3181_s23  ;;  %2354 = vrot.lane.b32.xlu1 %v5074_v35, %s3178_s28  ;;  %v1982_v44 = vmul.f32 %v1974_v55, %v1970_v21  ;;  %v1983_v12 = vmul.f32 %v1975_v59, %v1966_v57  ;;  %v1929_v55 = vld [vmem:[#allocation9 + $0x298] sm:$0xff] }
 0x5f5   : > { %v5118_v56 = vpop.permute.xlu1 %1912  ;;  %v5120_v51 = vpop.permute.xlu0 %1998 }
 0x5f6   : > { %v1919_v21 = vsel %vm599_vm3, %v5112_v58, %v5118_v56  ;;  %v1923_v23 = vsel %vm599_vm3, %v5118_v56, %v5112_v58 }
 0x5f7   : > { %2348 = vrot.lane.b32.xlu0 %v5089_v24, %s3178_s28  ;;  %2394 = vrot.lane.b32.xlu1 %v5071_v61, %s3182_s25 }
 0x5f9   : > { %v5126_v40 = vpop.permute.xlu1 %1952  ;;  %v2007_v39 = vpop.permute.xlu0 %2006 }
 0x5fa   : > { %v2014_v28 = vsel %vm699_vm5, %v5120_v51, %v2007_v39  ;;  %v2018_v18 = vsel %vm699_vm5, %v2007_v39, %v5120_v51  ;;  %v1943_v51 = vadd.f32 %v1935_v0, %v1895_v50  ;;  %v1888_v39 = vmul.f32 %v1880_v60, %v1875_v2  ;;  %v2167_v0 = vld [vmem:[#allocation9 + $0x888] sm:$0xff]  ;;  %v1976_v50 = vld [vmem:[#allocation9 + $0x390] sm:$0xff]  ;;  %v1977_v2 = vld [vmem:[#allocation9 + $0x398] sm:$0xff] }
 0x5fb   : > { %2356 = vrot.lane.b32.xlu0 %v5092_v42, %s3178_s28  ;;  %2402 = vrot.lane.b32.xlu1 %v5074_v35, %s3182_s25  ;;  %v2030_v27 = vmul.f32 %v2022_v19, %v2014_v28  ;;  %v2031_v5 = vmul.f32 %v2023_v47, %v2018_v18  ;;  %v1936_v19 = vmul.f32 %v1928_v14, %v1923_v23 }
 0x5fc   : > { %v1991_v26 = vadd.f32 %v1983_v12, %v1943_v51  ;;  %v1896_v59 = vadd.f32 %v1888_v39, %v1848_v25  ;;  %v1937_v28 = vmul.f32 %v1929_v55, %v1919_v21 }
 0x5fd   : > { %v5132_v3 = vpop.permute.xlu1 %1960  ;;  %v5134_v48 = vpop.permute.xlu0 %2046 }
 0x5fe   : > { %v2039_v57 = vadd.f32 %v2031_v5, %v1991_v26  ;;  %v1971_v58 = vsel %vm649_vm4, %v5132_v3, %v5126_v40  ;;  %v1944_v5 = vadd.f32 %v1936_v19, %v1896_v59  ;;  %v2121_v26 = vld [vmem:[#allocation9 + $0x798] sm:$0xff] }
 0x5ff   : > { %2396 = vrot.lane.b32.xlu0 %v5089_v24, %s3182_s25  ;;  %2442 = vrot.lane.b32.xlu1 %v5071_v61, %s3183_s16 }
 0x601   : > { %v5148_v20 = vpop.permute.xlu1 %2000  ;;  %v2055_v36 = vpop.permute.xlu0 %2054 }
 0x602   : > { %v2062_v22 = vsel %vm749_vm6, %v5134_v48, %v2055_v36  ;;  %v2066_v8 = vsel %vm749_vm6, %v2055_v36, %v5134_v48  ;;  %v1990_v48 = vadd.f32 %v1982_v44, %v1942_v30  ;;  %v1967_v44 = vsel %vm649_vm4, %v5126_v40, %v5132_v3  ;;  %v2025_v30 = vld [vmem:[#allocation9 + $0x598] sm:$0xff] }
 0x603   : > { %2404 = vrot.lane.b32.xlu0 %v5092_v42, %s3182_s25  ;;  %2450 = vrot.lane.b32.xlu1 %v5074_v35, %s3183_s16  ;;  %v2078_v36 = vmul.f32 %v2070_v15, %v2062_v22  ;;  %v2079_v16 = vmul.f32 %v2071_v38, %v2066_v8  ;;  %v1984_v15 = vmul.f32 %v1976_v50, %v1971_v58  ;;  %v2024_v22 = vld [vmem:[#allocation9 + $0x590] sm:$0xff] }
 0x604   : > { %v2038_v45 = vadd.f32 %v2030_v27, %v1990_v48  ;;  %v1985_v8 = vmul.f32 %v1977_v2, %v1967_v44 }
 0x605   : > { %v5167_v13 = vpop.permute.xlu1 %2008  ;;  %v2095_v37 = vpop.permute.xlu0 %2094  ;;  %v2087_v47 = vadd.f32 %v2079_v16, %v2039_v57  ;;  %v2168_v57 = vld [vmem:[#allocation9 + $0x890] sm:$0xff] }
 0x606   : > { %v2086_v56 = vadd.f32 %v2078_v36, %v2038_v45  ;;  %v2015_v40 = vsel %vm699_vm5, %v5148_v20, %v5167_v13  ;;  %v2019_v3 = vsel %vm699_vm5, %v5167_v13, %v5148_v20 }
 0x607   : > { %2444 = vrot.lane.b32.xlu0 %v5089_v24, %s3183_s16  ;;  %2490 = vrot.lane.b32.xlu1 %v5071_v61, %s3184_s17  ;;  %v2033_v20 = vmul.f32 %v2025_v30, %v2019_v3 }
 0x609   : > { %v5192_v1 = vpop.permute.xlu1 %2048  ;;  %v2103_v31 = vpop.permute.xlu0 %2102 }
 0x60a   : > { %v2110_v33 = vsel %vm799_vm7, %v2095_v37, %v2103_v31  ;;  %v2114_v11 = vsel %vm799_vm7, %v2103_v31, %v2095_v37  ;;  %v1889_v37 = vmul.f32 %v1881_v32, %v1871_v53 }
 0x60b   : > { %2452 = vrot.lane.b32.xlu0 %v5092_v42, %s3183_s16  ;;  %2498 = vrot.lane.b32.xlu1 %v5074_v35, %s3184_s17  ;;  %v2126_v4 = vmul.f32 %v2118_v7, %v2110_v33  ;;  %v2127_v29 = vmul.f32 %v2119_v49, %v2114_v11  ;;  %v2072_v7 = vld [vmem:[#allocation9 + $0x690] sm:$0xff]  ;;  %v2073_v33 = vld [vmem:[#allocation9 + $0x698] sm:$0xff]  ;;  %v2032_v49 = vmul.f32 %v2024_v22, %v2015_v40  ;;  %v2275_v40 = vld [vmem:[#allocation9 + $0xe8] sm:$0xff] }
 0x60c   : > { %v1897_v38 = vadd.f32 %v1889_v37, %v1849_v34  ;;  %v1992_v11 = vadd.f32 %v1984_v15, %v1944_v5  ;;  %v2323_v5 = vld [vmem:[#allocation9 + $0x1e8] sm:$0xff] }
 0x60d   : > { %v2057_v9 = vpop.permute.xlu1 %2056  ;;  %v2143_v63 = vpop.permute.xlu0 %2142  ;;  %v2134_v46 = vadd.f32 %v2126_v4, %v2086_v56  ;;  %v2135_v27 = vadd.f32 %v2127_v29, %v2087_v47  ;;  %v2169_v29 = vld [vmem:[#allocation9 + $0x898] sm:$0xff] }
 0x60e   : > { %v2063_v32 = vsel %vm749_vm6, %v5192_v1, %v2057_v9  ;;  %v2067_v53 = vsel %vm749_vm6, %v2057_v9, %v5192_v1  ;;  %v1945_v36 = vadd.f32 %v1937_v28, %v1897_v38  ;;  %v2040_v45 = vadd.f32 %v2032_v49, %v1992_v11 }
 0x60f   : > { %2492 = vrot.lane.b32.xlu0 %v5089_v24, %s3184_s17  ;;  %2538 = vrot.lane.b32.xlu1 %v5071_v61, %s3185_s26  ;;  %v2080_v9 = vmul.f32 %v2072_v7, %v2063_v32  ;;  %v2081_v21 = vmul.f32 %v2073_v33, %v2067_v53  ;;  %v2276_v7 = vld [vmem:[#allocation9 + $0xf0] sm:$0xff] }
 0x610   : > { %v1993_v1 = vadd.f32 %v1985_v8, %v1945_v36  ;;  %v2235_v8 = vld [vmem:[#allocation9 + $0x4e8] sm:$0xff] }
 0x611   : > { %v2097_v62 = vpop.permute.xlu1 %2096  ;;  %v2151_v60 = vpop.permute.xlu0 %2150  ;;  %v2243_v33 = vmul.f32 %v2235_v8, %v5074_v35 }
 0x612   : > { %v2158_v18 = vsel %vm849_vm8, %v2143_v63, %v2151_v60  ;;  %v2162_v31 = vsel %vm849_vm8, %v2151_v60, %v2143_v63  ;;  %v2120_v63 = vld [vmem:[#allocation9 + $0x790] sm:$0xff]  ;;  %v2041_v4 = vadd.f32 %v2033_v20, %v1993_v1  ;;  %v2277_v20 = vld [vmem:[#allocation9 + $0xf8] sm:$0xff] }
 0x613   : > { %v2174_v25 = vmul.f32 %v2166_v43, %v2158_v18  ;;  %v2175_v12 = vmul.f32 %v2167_v0, %v2162_v31  ;;  %2500 = vrot.lane.b32.xlu0 %v5092_v42, %s3184_s17  ;;  %2546 = vrot.lane.b32.xlu1 %v5074_v35, %s3185_s26  ;;  %v2088_v43 = vadd.f32 %v2080_v9, %v2040_v45  ;;  %v5966_v18 = vld [vmem:[#allocation48_spill] sm:$0xff] }
 0x614   : > { %v2089_v0 = vadd.f32 %v2081_v21, %v2041_v4  ;;  %v2370_v4 = vld [vmem:[#allocation9 + $0x2e0] sm:$0xff] }
 0x615   : > { %v2182_v51 = vadd.f32 %v2174_v25, %v2134_v46  ;;  %v2105_v39 = vpop.permute.xlu1 %2104  ;;  %v2183_v48 = vadd.f32 %v2175_v12, %v2135_v27  ;;  %v2274_v46 = vld [vmem:[#allocation9 + $0xe0] sm:$0xff] }
 0x616   : > { %v2111_v14 = vsel %vm799_vm7, %v2097_v62, %v2105_v39  ;;  %v2115_v55 = vsel %vm799_vm7, %v2105_v39, %v2097_v62 }
 0x617   : > { %v2206_v13 = vadd.f32 %v4868_v6, %v2182_v51  ;;  %2540 = vrot.lane.b32.xlu0 %v5089_v24, %s3185_s26  ;;  %2586 = vrot.lane.b32.xlu1 %v5071_v61, %s5964_s13  ;;  %v2207_v34 = vadd.f32 %v4868_v6, %v2183_v48  ;;  %v2128_v37 = vmul.f32 %v2120_v63, %v2111_v14  ;;  %v2236_v51 = vld [vmem:[#allocation9 + $0x4f0] sm:$0xff] }
 0x618   : > { %v2129_v59 = vmul.f32 %v2121_v26, %v2115_v55  ;;  %v2244_v53 = vmul.f32 %v2236_v51, %v5089_v24 }
 0x619   : > { %v5264_v23 = vmul.f32 %v2206_v13, %v4753_v54  ;;  %v2145_v16 = vpop.permute.xlu1 %2144  ;;  %v5272_v54 = vmul.f32 %v2207_v34, %v4755_v17  ;;  %v2136_v50 = vadd.f32 %v2128_v37, %v2088_v43  ;;  %v2371_v37 = vld [vmem:[#allocation9 + $0x2e8] sm:$0xff] }
 0x61a   : > { %v2137_v58 = vadd.f32 %v2129_v59, %v2089_v0  ;;  %v2324_v59 = vld [vmem:[#allocation9 + $0x1f0] sm:$0xff] }
 0x61b   : > { %2548 = vrot.lane.b32.xlu0 %v5092_v42, %s3185_s26  ;;  %2246 = vrot.lane.b32.xlu1 %v5264_v23, %s3179_s10 }
 0x61d   : > { %v2153_v19 = vpop.permute.xlu1 %2152 }
 0x61e   : > { %v2159_v6 = vsel %vm849_vm8, %v2145_v16, %v2153_v19  ;;  %v2163_v28 = vsel %vm849_vm8, %v2153_v19, %v2145_v16 }
 0x61f   : > { %v2176_v56 = vmul.f32 %v2168_v57, %v2159_v6  ;;  %v2177_v62 = vmul.f32 %v2169_v29, %v2163_v28  ;;  %2588 = vrot.lane.b32.xlu0 %v5089_v24, %s5964_s13  ;;  %2254 = vrot.lane.b32.xlu1 %v5272_v54, %s3179_s10  ;;  %v2237_v24 = vld [vmem:[#allocation9 + $0x4f8] sm:$0xff] }
 0x620   : > { %v2245_v45 = vmul.f32 %v2237_v24, %v5092_v42  ;;  %v2325_v57 = vld [vmem:[#allocation9 + $0x1f8] sm:$0xff] }
 0x621   : > { %v2184_v60 = vadd.f32 %v2176_v56, %v2136_v50  ;;  %v2185_v2 = vadd.f32 %v2177_v62, %v2137_v58 }
 0x623   : > { %v2208_v17 = vadd.f32 %v4798_v52, %v2184_v60  ;;  %2294 = vrot.lane.b32.xlu1 %v5264_v23, %s3181_s23  ;;  %v2209_v44 = vadd.f32 %v4798_v52, %v2185_v2  ;;  %v2234_v52 = vld [vmem:[#allocation9 + $0x4e0] sm:$0xff] }
 0x624   : > { %v2242_v22 = vmul.f32 %v2234_v52, %v5071_v61  ;;  %v2322_v61 = vld [vmem:[#allocation9 + $0x1e0] sm:$0xff] }
 0x625   : > { %v5287_v47 = vmul.f32 %v2208_v17, %v4757_v10  ;;  %v5294_v31 = vmul.f32 %v2209_v44, %v5966_v18 }
 0x627   : > { %2248 = vrot.lane.b32.xlu0 %v5287_v47, %s3179_s10  ;;  %2302 = vrot.lane.b32.xlu1 %v5272_v54, %s3181_s23 }
 0x62b   : > { %2256 = vrot.lane.b32.xlu0 %v5294_v31, %s3179_s10  ;;  %2342 = vrot.lane.b32.xlu1 %v5264_v23, %s3178_s28 }
 0x62f   : > { %2296 = vrot.lane.b32.xlu0 %v5287_v47, %s3181_s23  ;;  %2350 = vrot.lane.b32.xlu1 %v5272_v54, %s3178_s28 }
 0x633   : > { %2304 = vrot.lane.b32.xlu0 %v5294_v31, %s3181_s23  ;;  %2390 = vrot.lane.b32.xlu1 %v5264_v23, %s3182_s25 }
 0x637   : > { %2344 = vrot.lane.b32.xlu0 %v5287_v47, %s3178_s28  ;;  %2398 = vrot.lane.b32.xlu1 %v5272_v54, %s3182_s25 }
 0x63b   : > { %2352 = vrot.lane.b32.xlu0 %v5294_v31, %s3178_s28  ;;  %2438 = vrot.lane.b32.xlu1 %v5264_v23, %s3183_s16  ;;  %s5968_s28 = sshll.u32 %s3389_s12, 6 }
 0x63c   : > { %s5540_s10 = scalar_lea.vmem [#allocation10], %s5968_s28 }
 0x63d   : > { %s2676_s8 = sshll.u32 %s5540_s10, 4  ;;  %s5564_s8 = int_to_ptr.vmem [resolvable:$true] %s2676_s8 }
 0x63e   : > { %s3096_s27 = scalar_lea.vmem %s5564_s8, 1024  ;;  %p3103_p0 = scmp.lt.s32.totalorder %s5564_s8, %s3101_s9 }
 0x63f   : > { %2392 = vrot.lane.b32.xlu0 %v5287_v47, %s3182_s25  ;;  %2446 = vrot.lane.b32.xlu1 %v5272_v54, %s3183_s16  ;;  %p3097_p7 = scmp.ne.s32.totalorder %s5564_s8, %s3096_s27  ;;  %p3104_p4 = scmp.lt.s32.totalorder %s3102_s2, %s3096_s27 }
 0x641   : > { %p3098_p10 = pnand %p3097_p7, %p5972_p9  ;;  %p3105_p8 = por %p3104_p4, %p3103_p0 }
 0x643   : > { %2400 = vrot.lane.b32.xlu0 %v5294_v31, %s3182_s25  ;;  %2486 = vrot.lane.b32.xlu1 %v5264_v23, %s3184_s17  ;;  %s2819_s25 = sshll.u32 %s3241_s22, 8  ;;  %s2663_s22 = scalar_lea.sflag [#allocation6], %s3389_s12 }
 0x644   : > { %p3099_p1 = pneg %p3098_p10 }
 0x646   : > { %p3106_p5 = pnand %p3105_p8, %p3099_p1 }
 0x647   : > { %2440 = vrot.lane.b32.xlu0 %v5287_v47, %s3183_s16  ;;  %2494 = vrot.lane.b32.xlu1 %v5272_v54, %s3184_s17 }
 0x64b   : > { %2448 = vrot.lane.b32.xlu0 %v5294_v31, %s3183_s16  ;;  %2534 = vrot.lane.b32.xlu1 %v5264_v23, %s3185_s26 }
 0x64f   : > { %2488 = vrot.lane.b32.xlu0 %v5287_v47, %s3184_s17  ;;  %2542 = vrot.lane.b32.xlu1 %v5272_v54, %s3185_s26 }
 0x651   : > { %v2251_v10 = vpop.permute.xlu1 %2250 }
 0x653   : > { %2496 = vrot.lane.b32.xlu0 %v5294_v31, %s3184_s17  ;;  %2582 = vrot.lane.b32.xlu1 %v5264_v23, %s5964_s13 }
 0x655   : > { %v2259_v25 = vpop.permute.xlu1 %2258 }
 0x656   : > { %v2264_v12 = vsel %vm500_vm1, %v2251_v10, %v2259_v25  ;;  %v2268_v15 = vsel %vm500_vm1, %v2259_v25, %v2251_v10  ;;  %v2419_v25 = vld [vmem:[#allocation9 + $0x3e8] sm:$0xff] }
 0x657   : > { %v2282_v30 = vmul.f32 %v2274_v46, %v2268_v15  ;;  %2536 = vrot.lane.b32.xlu0 %v5287_v47, %s3185_s26  ;;  %2590 = vrot.lane.b32.xlu1 %v5272_v54, %s5964_s13  ;;  %v2283_v39 = vmul.f32 %v2275_v40, %v2264_v12  ;;  %v2418_v46 = vld [vmem:[#allocation9 + $0x3e0] sm:$0xff]  ;;  %v2372_v12 = vld [vmem:[#allocation9 + $0x2f0] sm:$0xff]  ;;  %v2373_v15 = vld [vmem:[#allocation9 + $0x2f8] sm:$0xff] }
 0x659   : > { %v2290_v3 = vadd.f32 %v2282_v30, %v2242_v22  ;;  %v2299_v27 = vpop.permute.xlu1 %2298  ;;  %v2253_v38 = vpop.permute.xlu0 %2252  ;;  %v2291_v63 = vadd.f32 %v2283_v39, %v2243_v33 }
 0x65b   : > { %2544 = vrot.lane.b32.xlu0 %v5294_v31, %s3185_s26  ;;  %2594 = vrot.lane.b32.xlu1 %v5074_v35, %s5964_s13  ;;  %s5573_s26 = scalar_lea.hbm %s5627_s5, %s2819_s25 }
 0x65d   : > { %v2307_v32 = vpop.permute.xlu1 %2306  ;;  %v2261_v48 = vpop.permute.xlu0 %2260 }
 0x65e   : > { %v2312_v36 = vsel %vm549_vm2, %v2299_v27, %v2307_v32  ;;  %v2316_v49 = vsel %vm549_vm2, %v2307_v32, %v2299_v27  ;;  %v2265_v13 = vsel %vm500_vm1, %v2253_v38, %v2261_v48  ;;  %v2269_v11 = vsel %vm500_vm1, %v2261_v48, %v2253_v38  ;;  %v2466_v48 = vld [vmem:[#allocation9 + $0x5e0] sm:$0xff] }
 0x65f   : > { %v2330_v26 = vmul.f32 %v2322_v61, %v2316_v49  ;;  %v2331_v35 = vmul.f32 %v2323_v5, %v2312_v36  ;;  %v2284_v14 = vmul.f32 %v2276_v7, %v2269_v11  ;;  %2584 = vrot.lane.b32.xlu0 %v5287_v47, %s5964_s13  ;;  %v2285_v9 = vmul.f32 %v2277_v20, %v2265_v13  ;;  %v2467_v36 = vld [vmem:[#allocation9 + $0x5e8] sm:$0xff]  ;;  %v2420_v49 = vld [vmem:[#allocation9 + $0x3f0] sm:$0xff]  ;;  %v2421_v20 = vld [vmem:[#allocation9 + $0x3f8] sm:$0xff] }
 0x661   : > { %v2338_v55 = vadd.f32 %v2330_v26, %v2290_v3  ;;  %v2339_v1 = vadd.f32 %v2331_v35, %v2291_v63  ;;  %v2292_v21 = vadd.f32 %v2284_v14, %v2244_v53  ;;  %v2347_v16 = vpop.permute.xlu1 %2346  ;;  %v2301_v34 = vpop.permute.xlu0 %2300  ;;  %v2293_v29 = vadd.f32 %v2285_v9, %v2245_v45 }
 0x663   : > { %2592 = vrot.lane.b32.xlu0 %v5294_v31, %s5964_s13 }
 0x665   : > { %v2355_v43 = vpop.permute.xlu1 %2354  ;;  %v2309_v0 = vpop.permute.xlu0 %2308 }
 0x666   : > { %v2360_v19 = vsel %vm599_vm3, %v2347_v16, %v2355_v43  ;;  %v2364_v6 = vsel %vm599_vm3, %v2355_v43, %v2347_v16  ;;  %v2313_v28 = vsel %vm549_vm2, %v2301_v34, %v2309_v0  ;;  %v2317_v50 = vsel %vm549_vm2, %v2309_v0, %v2301_v34  ;;  %v2469_v43 = vld [vmem:[#allocation9 + $0x5f8] sm:$0xff] }
 0x667   : > { %v2378_v58 = vmul.f32 %v2370_v4, %v2364_v6  ;;  %v2379_v56 = vmul.f32 %v2371_v37, %v2360_v19  ;;  %v2332_v62 = vmul.f32 %v2324_v59, %v2317_v50  ;;  %v2333_v60 = vmul.f32 %v2325_v57, %v2313_v28  ;;  %2596 = vrot.lane.b32.xlu0 %v5092_v42, %s5964_s13  ;;  %v2514_v59 = vld [vmem:[#allocation9 + $0x6e0] sm:$0xff]  ;;  %v2515_v57 = vld [vmem:[#allocation9 + $0x6e8] sm:$0xff] }
 0x669   : > { %v2386_v2 = vadd.f32 %v2378_v58, %v2338_v55  ;;  %v2387_v17 = vadd.f32 %v2379_v56, %v2339_v1  ;;  %v2340_v44 = vadd.f32 %v2332_v62, %v2292_v21  ;;  %v2341_v18 = vadd.f32 %v2333_v60, %v2293_v29  ;;  %v2395_v10 = vpop.permute.xlu1 %2394  ;;  %v2349_v52 = vpop.permute.xlu0 %2348  ;;  %v2468_v29 = vld [vmem:[#allocation9 + $0x5f0] sm:$0xff] }
 0x66d   : > { %v2403_v22 = vpop.permute.xlu1 %2402  ;;  %v2357_v30 = vpop.permute.xlu0 %2356 }
 0x66e   : > { %v2408_v40 = vsel %vm649_vm4, %v2395_v10, %v2403_v22  ;;  %v2412_v3 = vsel %vm649_vm4, %v2403_v22, %v2395_v10  ;;  %v2361_v42 = vsel %vm599_vm3, %v2349_v52, %v2357_v30  ;;  %v2365_v27 = vsel %vm599_vm3, %v2357_v30, %v2349_v52  ;;  %v2517_v22 = vld [vmem:[#allocation9 + $0x6f8] sm:$0xff] }
 0x66f   : > { %v2426_v38 = vmul.f32 %v2418_v46, %v2412_v3  ;;  %v2427_v8 = vmul.f32 %v2419_v25, %v2408_v40  ;;  %v2380_v51 = vmul.f32 %v2372_v12, %v2365_v27  ;;  %v2381_v39 = vmul.f32 %v2373_v15, %v2361_v42  ;;  %v2562_v25 = vld [vmem:[#allocation9 + $0x7e0] sm:$0xff]  ;;  %v2563_v12 = vld [vmem:[#allocation9 + $0x7e8] sm:$0xff]  ;;  %v2516_v15 = vld [vmem:[#allocation9 + $0x6f0] sm:$0xff] }
 0x671   : > { %v2434_v61 = vadd.f32 %v2426_v38, %v2386_v2  ;;  %v2435_v5 = vadd.f32 %v2427_v8, %v2387_v17  ;;  %v2388_v7 = vadd.f32 %v2380_v51, %v2340_v44  ;;  %v2389_v33 = vadd.f32 %v2381_v39, %v2341_v18  ;;  %v2443_v32 = vpop.permute.xlu1 %2442  ;;  %v2397_v53 = vpop.permute.xlu0 %2396 }
 0x675   : > { %v2451_v13 = vpop.permute.xlu1 %2450  ;;  %v2405_v11 = vpop.permute.xlu0 %2404 }
 0x676   : > { %v2456_v63 = vsel %vm699_vm5, %v2443_v32, %v2451_v13  ;;  %v2460_v26 = vsel %vm699_vm5, %v2451_v13, %v2443_v32  ;;  %v2409_v35 = vsel %vm649_vm4, %v2397_v53, %v2405_v11  ;;  %v2413_v14 = vsel %vm649_vm4, %v2405_v11, %v2397_v53 }
 0x677   : > { %v2474_v24 = vmul.f32 %v2466_v48, %v2456_v63  ;;  %v2475_v55 = vmul.f32 %v2467_v36, %v2460_v26  ;;  %v2428_v1 = vmul.f32 %v2420_v49, %v2413_v14  ;;  %v2429_v9 = vmul.f32 %v2421_v20, %v2409_v35  ;;  %v2564_v36 = vld [vmem:[#allocation9 + $0x7f0] sm:$0xff]  ;;  %v2565_v49 = vld [vmem:[#allocation9 + $0x7f8] sm:$0xff] }
 0x679   : > { %v2482_v21 = vadd.f32 %v2474_v24, %v2434_v61  ;;  %v2483_v16 = vadd.f32 %v2475_v55, %v2435_v5  ;;  %v2436_v34 = vadd.f32 %v2428_v1, %v2388_v7  ;;  %v2437_v45 = vadd.f32 %v2429_v9, %v2389_v33  ;;  %v2491_v4 = vpop.permute.xlu1 %2490  ;;  %v2445_v37 = vpop.permute.xlu0 %2444 }
 0x67d   : > { %v2499_v0 = vpop.permute.xlu1 %2498  ;;  %v2453_v19 = vpop.permute.xlu0 %2452 }
 0x67e   : > { %v2504_v6 = vsel %vm749_vm6, %v2491_v4, %v2499_v0  ;;  %v2508_v28 = vsel %vm749_vm6, %v2499_v0, %v2491_v4  ;;  %v2457_v50 = vsel %vm699_vm5, %v2445_v37, %v2453_v19  ;;  %v2461_v58 = vsel %vm699_vm5, %v2453_v19, %v2445_v37 }
 0x67f   : > { %v2522_v56 = vmul.f32 %v2514_v59, %v2504_v6  ;;  %v2523_v62 = vmul.f32 %v2515_v57, %v2508_v28  ;;  %v2476_v60 = vmul.f32 %v2468_v29, %v2457_v50  ;;  %v2477_v2 = vmul.f32 %v2469_v43, %v2461_v58 }
 0x681   : > { %v2530_v17 = vadd.f32 %v2522_v56, %v2482_v21  ;;  %v2531_v44 = vadd.f32 %v2523_v62, %v2483_v16  ;;  %v2484_v18 = vadd.f32 %v2476_v60, %v2436_v34  ;;  %v2485_v10 = vadd.f32 %v2477_v2, %v2437_v45  ;;  %v2539_v52 = vpop.permute.xlu1 %2538  ;;  %v2493_v46 = vpop.permute.xlu0 %2492  ;;  %v2270_v56 = vld [vmem:[#allocation9 + $0xc0] sm:$0xff]  ;;  %v2271_v62 = vld [vmem:[#allocation9 + $0xc8] sm:$0xff] }
 0x685   : > { %v2547_v30 = vpop.permute.xlu1 %2546  ;;  %v2501_v40 = vpop.permute.xlu0 %2500 }
 0x686   : > { %v2552_v3 = vsel %vm799_vm7, %v2539_v52, %v2547_v30  ;;  %v2556_v42 = vsel %vm799_vm7, %v2547_v30, %v2539_v52  ;;  %v2505_v27 = vsel %vm749_vm6, %v2493_v46, %v2501_v40  ;;  %v2509_v38 = vsel %vm749_vm6, %v2501_v40, %v2493_v46 }
 0x687   : > { %v2570_v8 = vmul.f32 %v2562_v25, %v2552_v3  ;;  %v2571_v51 = vmul.f32 %v2563_v12, %v2556_v42  ;;  %v2524_v39 = vmul.f32 %v2516_v15, %v2505_v27  ;;  %v2525_v61 = vmul.f32 %v2517_v22, %v2509_v38  ;;  %v2366_v27 = vld [vmem:[#allocation9 + $0x2c0] sm:$0xff]  ;;  %v2367_v38 = vld [vmem:[#allocation9 + $0x2c8] sm:$0xff] }
 0x689   : > { %v5410_v5 = vadd.f32 %v2570_v8, %v2530_v17  ;;  %v5412_v7 = vadd.f32 %v2571_v51, %v2531_v44  ;;  %v2532_v33 = vadd.f32 %v2524_v39, %v2484_v18  ;;  %v2533_v32 = vadd.f32 %v2525_v61, %v2485_v10  ;;  %v2541_v53 = vpop.permute.xlu0 %2540  ;;  %v5414_v48 = vpop.permute.xlu1 %2586  ;;  %v2230_v17 = vld [vmem:[#allocation9 + $0x4c0] sm:$0xff]  ;;  %v2231_v44 = vld [vmem:[#allocation9 + $0x4c8] sm:$0xff]  ;;  %v2232_v39 = vld [vmem:[#allocation9 + $0x4d0] sm:$0xff] }
 0x68a   : > { %v2318_v18 = vld [vmem:[#allocation9 + $0x1c0] sm:$0xff]  ;;  %v2319_v10 = vld [vmem:[#allocation9 + $0x1c8] sm:$0xff]  ;;  %v2239_v30 = vmul.f32 %v2231_v44, %v5272_v54  ;;  %v2238_v40 = vmul.f32 %v2230_v17, %v5264_v23  ;;  %v2233_v61 = vld [vmem:[#allocation9 + $0x4d8] sm:$0xff] }
 0x68b   : > { %v2273_v54 = vld [vmem:[#allocation9 + $0xd8] sm:$0xff]  ;;  %v2320_v44 = vld [vmem:[#allocation9 + $0x1d0] sm:$0xff] }
 0x68d   : > { %v2549_v20 = vpop.permute.xlu0 %2548  ;;  %v2247_v13 = vpop.permute.xlu1 %2246 }
 0x68e   : > { %v2553_v11 = vsel %vm799_vm7, %v2541_v53, %v2549_v20  ;;  %v2557_v63 = vsel %vm799_vm7, %v2549_v20, %v2541_v53 }
 0x68f   : > { %v2572_v26 = vmul.f32 %v2564_v36, %v2553_v11  ;;  %v2573_v35 = vmul.f32 %v2565_v49, %v2557_v63  ;;  %v2272_v36 = vld [vmem:[#allocation9 + $0xd0] sm:$0xff]  ;;  %v2414_v63 = vld [vmem:[#allocation9 + $0x3c0] sm:$0xff] }
 0x691   : > { %v5420_v14 = vadd.f32 %v2572_v26, %v2532_v33  ;;  %v5422_v24 = vadd.f32 %v2573_v35, %v2533_v32  ;;  %v2255_v55 = vpop.permute.xlu1 %2254  ;;  %v5424_v1 = vpop.permute.xlu0 %2588  ;;  %v2415_v26 = vld [vmem:[#allocation9 + $0x3c8] sm:$0xff] }
 0x692   : > { %v2262_v60 = vsel %vm500_vm1, %v2247_v13, %v2255_v55  ;;  %v2266_v2 = vsel %vm500_vm1, %v2255_v55, %v2247_v13 }
 0x693   : > { %v2278_v12 = vmul.f32 %v2270_v56, %v2266_v2  ;;  %v2279_v15 = vmul.f32 %v2271_v62, %v2262_v60 }
 0x695   : > { %v2295_v9 = vpop.permute.xlu1 %2294  ;;  %v2286_v32 = vadd.f32 %v2278_v12, %v2238_v40  ;;  %v2287_v53 = vadd.f32 %v2279_v15, %v2239_v30  ;;  %v2368_v30 = vld [vmem:[#allocation9 + $0x2d0] sm:$0xff]  ;;  %v2369_v40 = vld [vmem:[#allocation9 + $0x2d8] sm:$0xff] }
 0x699   : > { %v2249_v21 = vpop.permute.xlu0 %2248  ;;  %v2303_v16 = vpop.permute.xlu1 %2302 }
 0x69a   : > { %v2310_v52 = vsel %vm549_vm2, %v2295_v9, %v2303_v16  ;;  %v2314_v46 = vsel %vm549_vm2, %v2303_v16, %v2295_v9 }
 0x69b   : > { %v2326_v3 = vmul.f32 %v2318_v18, %v2314_v46  ;;  %v2327_v42 = vmul.f32 %v2319_v10, %v2310_v52 }
 0x69d   : > { %v2257_v34 = vpop.permute.xlu0 %2256  ;;  %v2343_v45 = vpop.permute.xlu1 %2342  ;;  %v2334_v9 = vadd.f32 %v2326_v3, %v2286_v32  ;;  %v2335_v16 = vadd.f32 %v2327_v42, %v2287_v53 }
 0x69e   : > { %v2263_v23 = vsel %vm500_vm1, %v2249_v21, %v2257_v34  ;;  %v2267_v49 = vsel %vm500_vm1, %v2257_v34, %v2249_v21  ;;  %v2462_v21 = vld [vmem:[#allocation9 + $0x5c0] sm:$0xff]  ;;  %v2463_v34 = vld [vmem:[#allocation9 + $0x5c8] sm:$0xff] }
 0x69f   : > { %v2280_v56 = vmul.f32 %v2272_v36, %v2267_v49  ;;  %v2281_v62 = vmul.f32 %v2273_v54, %v2263_v23 }
 0x6a1   : > { %v5426_v4 = vpop.permute.xlu0 %2296  ;;  %v2351_v37 = vpop.permute.xlu1 %2350 }
 0x6a2   : > { %v2358_v8 = vsel %vm599_vm3, %v2343_v45, %v2351_v37  ;;  %v2362_v51 = vsel %vm599_vm3, %v2351_v37, %v2343_v45  ;;  %v2240_v45 = vmul.f32 %v2232_v39, %v5287_v47  ;;  %v2241_v37 = vmul.f32 %v2233_v61, %v5294_v31 }
 0x6a3   : > { %v2374_v13 = vmul.f32 %v2366_v27, %v2362_v51  ;;  %v2375_v11 = vmul.f32 %v2367_v38, %v2358_v8  ;;  %v2558_v8 = vld [vmem:[#allocation9 + $0x7c0] sm:$0xff]  ;;  %v2559_v51 = vld [vmem:[#allocation9 + $0x7c8] sm:$0xff] }
 0x6a4   : > { %v2288_v23 = vadd.f32 %v2280_v56, %v2240_v45  ;;  %v2606_v45 = vld [vmem:[#allocation9 + $0x8c0] sm:$0xff] }
 0x6a5   : > { %v5428_v59 = vpop.permute.xlu0 %2304  ;;  %v2391_v57 = vpop.permute.xlu1 %2390  ;;  %v2382_v52 = vadd.f32 %v2374_v13, %v2334_v9  ;;  %v2383_v46 = vadd.f32 %v2375_v11, %v2335_v16  ;;  %v2416_v9 = vld [vmem:[#allocation9 + $0x3d0] sm:$0xff] }
 0x6a6   : > { %v2311_v47 = vsel %vm549_vm2, %v5426_v4, %v5428_v59  ;;  %v2315_v31 = vsel %vm549_vm2, %v5428_v59, %v5426_v4 }
 0x6a7   : > { %v2328_v27 = vmul.f32 %v2320_v44, %v2315_v31 }
 0x6a9   : > { %v5430_v29 = vpop.permute.xlu0 %2344  ;;  %v2399_v43 = vpop.permute.xlu1 %2398 }
 0x6aa   : > { %v2406_v35 = vsel %vm649_vm4, %v2391_v57, %v2399_v43  ;;  %v2410_v55 = vsel %vm649_vm4, %v2399_v43, %v2391_v57  ;;  %v2321_v57 = vld [vmem:[#allocation9 + $0x1d8] sm:$0xff] }
 0x6ab   : > { %v2422_v43 = vmul.f32 %v2414_v63, %v2410_v55  ;;  %v2423_v18 = vmul.f32 %v2415_v26, %v2406_v35  ;;  %v2329_v38 = vmul.f32 %v2321_v57, %v2311_v47  ;;  %v2336_v35 = vadd.f32 %v2328_v27, %v2288_v23 }
 0x6ad   : > { %v5432_v0 = vpop.permute.xlu0 %2352  ;;  %v2439_v19 = vpop.permute.xlu1 %2438  ;;  %v2430_v61 = vadd.f32 %v2422_v43, %v2382_v52  ;;  %v2431_v32 = vadd.f32 %v2423_v18, %v2383_v46 }
 0x6ae   : > { %v2359_v4 = vsel %vm599_vm3, %v5430_v29, %v5432_v0  ;;  %v2363_v59 = vsel %vm599_vm3, %v5432_v0, %v5430_v29  ;;  %v2289_v29 = vadd.f32 %v2281_v62, %v2241_v37  ;;  %v2607_v37 = vld [vmem:[#allocation9 + $0x8c8] sm:$0xff]  ;;  %v2417_v62 = vld [vmem:[#allocation9 + $0x3d8] sm:$0xff] }
 0x6af   : > { %v2376_v0 = vmul.f32 %v2368_v30, %v2363_v59  ;;  %v2377_v49 = vmul.f32 %v2369_v40, %v2359_v4  ;;  %v2610_v30 = vld [vmem:[#allocation9 + $0x8e0] sm:$0xff]  ;;  %v2611_v40 = vld [vmem:[#allocation9 + $0x8e8] sm:$0xff]  ;;  %v2513_v4 = vld [vmem:[#allocation9 + $0x6d8] sm:$0xff] }
 0x6b0   : > { %v2337_v55 = vadd.f32 %v2329_v38, %v2289_v29 }
 0x6b1   : > { %v5434_v6 = vpop.permute.xlu0 %2392  ;;  %v2447_v28 = vpop.permute.xlu1 %2446 }
 0x6b2   : > { %v2454_v60 = vsel %vm699_vm5, %v2439_v19, %v2447_v28  ;;  %v2458_v2 = vsel %vm699_vm5, %v2447_v28, %v2439_v19  ;;  %v2510_v19 = vld [vmem:[#allocation9 + $0x6c0] sm:$0xff]  ;;  %v2511_v28 = vld [vmem:[#allocation9 + $0x6c8] sm:$0xff] }
 0x6b3   : > { %v2470_v3 = vmul.f32 %v2462_v21, %v2454_v60  ;;  %v2471_v42 = vmul.f32 %v2463_v34, %v2458_v2  ;;  %v2464_v60 = vld [vmem:[#allocation9 + $0x5d0] sm:$0xff]  ;;  %v2465_v2 = vld [vmem:[#allocation9 + $0x5d8] sm:$0xff] }
 0x6b5   : > { %v5436_v50 = vpop.permute.xlu0 %2400  ;;  %v5438_v58 = vpop.permute.xlu1 %2486  ;;  %v2478_v13 = vadd.f32 %v2470_v3, %v2430_v61  ;;  %v2479_v11 = vadd.f32 %v2471_v42, %v2431_v32  ;;  %v5967_v61 = vld [vmem:[#allocation51_spill] sm:$0xff] }
 0x6b6   : > { %v2411_v16 = vsel %vm649_vm4, %v5436_v50, %v5434_v6 }
 0x6b9   : > { %v5448_v25 = vpop.permute.xlu0 %2440  ;;  %v2495_v22 = vpop.permute.xlu1 %2494 }
 0x6ba   : > { %v2502_v12 = vsel %vm749_vm6, %v5438_v58, %v2495_v22  ;;  %v2506_v15 = vsel %vm749_vm6, %v2495_v22, %v5438_v58 }
 0x6bb   : > { %v2518_v53 = vmul.f32 %v2510_v19, %v2502_v12  ;;  %v2519_v36 = vmul.f32 %v2511_v28, %v2506_v15  ;;  %v2424_v19 = vmul.f32 %v2416_v9, %v2411_v16  ;;  %v5969_v9 = vld [vmem:[#allocation50_spill] sm:$0xff] }
 0x6bd   : > { %v5456_v33 = vpop.permute.xlu0 %2448  ;;  %v2535_v20 = vpop.permute.xlu1 %2534  ;;  %v2526_v21 = vadd.f32 %v2518_v53, %v2478_v13  ;;  %v2527_v34 = vadd.f32 %v2519_v36, %v2479_v11  ;;  %v2560_v36 = vld [vmem:[#allocation9 + $0x7d0] sm:$0xff] }
 0x6be   : > { %v2455_v44 = vsel %vm699_vm5, %v5448_v25, %v5456_v33  ;;  %v2459_v57 = vsel %vm699_vm5, %v5456_v33, %v5448_v25  ;;  %v2512_v33 = vld [vmem:[#allocation9 + $0x6d0] sm:$0xff] }
 0x6bf   : > { %v2472_v12 = vmul.f32 %v2464_v60, %v2455_v44  ;;  %v2473_v15 = vmul.f32 %v2465_v2, %v2459_v57  ;;  %v2612_v57 = vld [vmem:[#allocation9 + $0x8f0] sm:$0xff] }
 0x6c1   : > { %v5472_v17 = vpop.permute.xlu0 %2488  ;;  %v2543_v10 = vpop.permute.xlu1 %2542 }
 0x6c2   : > { %v2550_v58 = vsel %vm799_vm7, %v2535_v20, %v2543_v10  ;;  %v2554_v22 = vsel %vm799_vm7, %v2543_v10, %v2535_v20  ;;  %v2407_v20 = vsel %vm649_vm4, %v5434_v6, %v5436_v50  ;;  %v2384_v6 = vadd.f32 %v2376_v0, %v2336_v35 }
 0x6c3   : > { %v2566_v63 = vmul.f32 %v2558_v8, %v2550_v58  ;;  %v2567_v26 = vmul.f32 %v2559_v51, %v2554_v22  ;;  %v2385_v50 = vadd.f32 %v2377_v49, %v2337_v55  ;;  %v2425_v28 = vmul.f32 %v2417_v62, %v2407_v20 }
 0x6c4   : > { %v2432_v23 = vadd.f32 %v2424_v19, %v2384_v6 }
 0x6c5   : > { %v2497_v39 = vpop.permute.xlu0 %2496  ;;  %v2583_v54 = vpop.permute.xlu1 %2582  ;;  %v2574_v18 = vadd.f32 %v2566_v63, %v2526_v21  ;;  %v2575_v10 = vadd.f32 %v2567_v26, %v2527_v34  ;;  %v2433_v29 = vadd.f32 %v2425_v28, %v2385_v50 }
 0x6c6   : > { %v2503_v59 = vsel %vm749_vm6, %v5472_v17, %v2497_v39  ;;  %v2507_v3 = vsel %vm749_vm6, %v2497_v39, %v5472_v17  ;;  %v2480_v63 = vadd.f32 %v2472_v12, %v2432_v23 }
 0x6c7   : > { %v2520_v0 = vmul.f32 %v2512_v33, %v2503_v59  ;;  %v2521_v49 = vmul.f32 %v2513_v4, %v2507_v3  ;;  %v2481_v26 = vadd.f32 %v2473_v15, %v2433_v29 }
 0x6c9   : > { %v2537_v56 = vpop.permute.xlu0 %2536  ;;  %v2591_v47 = vpop.permute.xlu1 %2590  ;;  %v2529_v62 = vadd.f32 %v2521_v49, %v2481_v26 }
 0x6ca   : > { %v2598_v31 = vsel %vm849_vm8, %v2583_v54, %v2591_v47  ;;  %v2602_v43 = vsel %vm849_vm8, %v2591_v47, %v2583_v54  ;;  %v2561_v54 = vld [vmem:[#allocation9 + $0x7d8] sm:$0xff] }
 0x6cb   : > { %v2614_v52 = vmul.f32 %v2606_v45, %v2598_v31  ;;  %v2615_v46 = vmul.f32 %v2607_v37, %v2602_v43  ;;  %v2608_v45 = vld [vmem:[#allocation9 + $0x8d0] sm:$0xff]  ;;  %v2609_v37 = vld [vmem:[#allocation9 + $0x8d8] sm:$0xff] }
 0x6cc   : > { %v2613_v47 = vld [vmem:[#allocation9 + $0x8f8] sm:$0xff] }
 0x6cd   : > { %v2545_v25 = vpop.permute.xlu0 %2544  ;;  %v2622_v42 = vadd.f32 %v2614_v52, %v2574_v18  ;;  %v2623_v27 = vadd.f32 %v2615_v46, %v2575_v10  ;;  %v2595_v38 = vpop.permute.xlu1 %2594  ;;  %v5970_v10 = vld [vmem:[#allocation53_spill] sm:$0xff] }
 0x6ce   : > { %v2600_v8 = vsel %vm849_vm8, %v5414_v48, %v2595_v38  ;;  %v2604_v51 = vsel %vm849_vm8, %v2595_v38, %v5414_v48  ;;  %v2551_v58 = vsel %vm799_vm7, %v2537_v56, %v2545_v25  ;;  %v2555_v22 = vsel %vm799_vm7, %v2545_v25, %v2537_v56 }
 0x6cf   : > { %v2646_v17 = vadd.f32 %v5967_v61, %v2622_v42  ;;  %v2647_v39 = vadd.f32 %v5967_v61, %v2623_v27  ;;  %v2618_v32 = vmul.f32 %v2610_v30, %v2600_v8  ;;  %v2619_v53 = vmul.f32 %v2611_v40, %v2604_v51 }
 0x6d0   : > { %v2568_v35 = vmul.f32 %v2560_v36, %v2551_v58  ;;  %v2569_v55 = vmul.f32 %v2561_v54, %v2555_v22  ;;  %v2528_v56 = vadd.f32 %v2520_v0, %v2480_v63 }
 0x6d1   : > { %v2585_v13 = vpop.permute.xlu0 %2584  ;;  %2654 = vst [vmem:[%s5540_s10] sm:$0xff] %v2646_v17  ;;  %2655 = vst [vmem:[%s5540_s10 + $0x8] sm:$0xff] %v2647_v39  ;;  %v2626_v48 = vadd.f32 %v2618_v32, %v5410_v5  ;;  %v2627_v11 = vadd.f32 %v2619_v53, %v5412_v7 }
 0x6d2   : > { %v2576_v34 = vadd.f32 %v2568_v35, %v2528_v56  ;;  %v2577_v60 = vadd.f32 %v2569_v55, %v2529_v62 }
 0x6d3   : > { %v2650_v20 = vadd.f32 %v5969_v9, %v2626_v48  ;;  %v2651_v16 = vadd.f32 %v5969_v9, %v2627_v11 }
 0x6d5   : > { %v2593_v21 = vpop.permute.xlu0 %2592  ;;  %2658 = vst [vmem:[%s5540_s10 + $0x20] sm:$0xff] %v2650_v20  ;;  %2659 = vst [vmem:[%s5540_s10 + $0x28] sm:$0xff] %v2651_v16 }
 0x6d6   : > { %v2599_v5 = vsel %vm849_vm8, %v2585_v13, %v2593_v21  ;;  %v2603_v7 = vsel %vm849_vm8, %v2593_v21, %v2585_v13 }
 0x6d7   : > { %v2616_v2 = vmul.f32 %v2608_v45, %v2599_v5  ;;  %v2617_v44 = vmul.f32 %v2609_v37, %v2603_v7 }
 0x6d9   : > { %v2624_v6 = vadd.f32 %v2616_v2, %v2576_v34  ;;  %v2625_v50 = vadd.f32 %v2617_v44, %v2577_v60  ;;  %v2597_v31 = vpop.permute.xlu0 %2596 }
 0x6da   : > { %v2601_v43 = vsel %vm849_vm8, %v5424_v1, %v2597_v31  ;;  %v2605_v18 = vsel %vm849_vm8, %v2597_v31, %v5424_v1  ;;  %v5971_v1 = vld [vmem:[#allocation62_spill] sm:$0xff] }
 0x6db   : > { %v2648_v52 = vadd.f32 %v5970_v10, %v2624_v6  ;;  %v2649_v46 = vadd.f32 %v5970_v10, %v2625_v50  ;;  %v2620_v19 = vmul.f32 %v2612_v57, %v2601_v43  ;;  %v2621_v28 = vmul.f32 %v2613_v47, %v2605_v18 }
 0x6dd   : > { %2656 = vst [vmem:[%s5540_s10 + $0x10] sm:$0xff] %v2648_v52  ;;  %2657 = vst [vmem:[%s5540_s10 + $0x18] sm:$0xff] %v2649_v46  ;;  %v2628_v12 = vadd.f32 %v2620_v19, %v5420_v14  ;;  %v2629_v41 = vadd.f32 %v2621_v28, %v5422_v24 }
 0x6df   : > { %v2652_v15 = vadd.f32 %v5971_v1, %v2628_v12  ;;  %v2653_v30 = vadd.f32 %v5971_v1, %v2629_v41 }
 0x6e1   : > { %2660 = vst [vmem:[%s5540_s10 + $0x30] sm:$0xff] %v2652_v15  ;;  %2661 = vst [vmem:[%s5540_s10 + $0x38] sm:$0xff] %v2653_v30 }
 0x6e2   : > { %3109 = shalt.err (!%p3106_p5)
}
 0x6e3   : > { %s3110_s14 = scalar_lea.hbm %s5573_s26, 1024  ;;  %s3114_s7 = scalar_lea.hbm %s5627_s5, 2048 }
 0x6e4   : > { %p3111_p11 = scmp.ne.s32.totalorder %s5573_s26, %s3110_s14  ;;  %p3115_p6 = scmp.lt.u32.totalorder %s5573_s26, %s5627_s5 }
 0x6e5   : > { %p3116_p2 = scmp.lt.u32.totalorder %s3114_s7, %s3110_s14  ;;  %p3118_p7 = scmp.lt.u32.totalorder %s3110_s14, %s5573_s26 }
 0x6e6   : > { %p3112_p12 = pnand %p3111_p11, %p5972_p9 }
 0x6e7   : > { %p3117_p13 = por %p3116_p2, %p3115_p6 }
 0x6e8   : > { %p3113_p3 = pneg %p3112_p12 }
 0x6e9   : > { %p3119_p10 = por %p3118_p7, %p3117_p13 }
 0x6eb   : > { %p3120_p1 = pnand %p3119_p10, %p3113_p3 }
 0x6ed   : > { %3123 = shalt.err (!%p3120_p1)
}
 0x6ee   : > { %s3188_s10 = smov 256   ;;  %s3189_s25 = smov 512  }
 0x6ef   : > { %2858 = dma.vmem_to_hbm [thread:$0]  (%p5972_p9), %s5564_s8, 1024, %s5573_s26, %s2663_s22, %s3188_s10, %s3189_s25, %s3181_s23  }
 0x6f0 PF: > { %s2691_s16 = sand.u32 1, %s3154_s18   ;;  %p5973_p0 = scmp.ne.s32.totalorder %s5746_s6, 0 }
 0x6f1   : > { %p5974_p4 = scmp.ge.s32.totalorder %s3166_s21, 2  ;;  %s2692_s17 = scalar_lea.sflag [#allocation6], %s2691_s16 }
 0x6f3   : > { %p2872_p8 = pnand %p5974_p4, %p5973_p0 }
 0x6f5   : > { %3149 = dma.done.wait (!%p2872_p8), %s2692_s17, 1024  }
 0x6f6   : > { %3151 = vsyncadd (!%p2872_p8), %s2692_s17, 4294966272  ;;  %s5975_s27 = sld [smem:[#allocation14_spill]]  ;;  %p19_p5 = scmp.ge.s32.totalorder %s3245_s24, 4  }
 0x6f7   : > { %s5976_s18 = smov %s3158_s19  ;;  %s5977_s19 = smov %s3162_s20 }
 0x6f8   : > { %s5979_s21 = smov %s3245_s24  ;;  %21 = sbr.rel (!%p19_p5) target bundleno = 8 (0x8), region = 102 }
 0x6fc   : > { %s5978_s20 = smov %s5975_s27 }
 0x6ff   :  { %2697 = vsyncpa [#allocation5], 1 }
 0x700   :  { %2699 = vsyncpa [#allocation5 + $0x1], 1 }
 0x701   :  { %2700 = vsyncpa [#allocation8], 1 }
 0x702   :  { %2701 = vsyncpa [#allocation6], 1 }
 0x703   :  { %2703 = vsyncpa [#allocation6 + $0x1], 1 }

</bundles_post_ra>
